<compile_context>
chip_gen: v7x
topology: tpu7x:2x2x1
jax: 0.10.0
libtpu: 0.0.40
codegen_flags: <defaults>
</compile_context>

<pallas_src>
import jax
import jax.numpy as jnp
from jax.experimental import pallas as pl
from jax.experimental.pallas import tpu as pltpu

FEAT_DIM = 2560
BOTTLENECK = 128
NUM_CLASSES = 10
PADDED_CLASSES = 128  # lane-dense classifier output (slice back to 10 outside)


def _round_up(x, m):
    return ((x + m - 1) // m) * m


def _cdiv(a, b):
    return (a + b - 1) // b


def _vmem_capacity_bytes():
    try:
        return int(pltpu.get_tpu_info().vmem_capacity_bytes)
    except Exception:
        return 64 << 20  # conservative fallback (v7x per-TC VMEM)


def adapter_kernel(x_ref, w1_ref, b1_ref, w2_ref, b2_ref, wc_ref, bc_ref, o_ref):
    # x arrives as f32 (no standalone HBM convert); cast to bf16 in VMEM so the
    # MXU runs its native bf16 path; accumulation stays f32 via
    # preferred_element_type; bias-add + ReLU in f32.
    x = x_ref[...].astype(jnp.bfloat16)
    h = jnp.dot(x, w1_ref[...], preferred_element_type=jnp.float32) + b1_ref[...]
    h = jnp.maximum(h, 0.0).astype(jnp.bfloat16)   # ReLU; Dropout (eval) = identity
    z = jnp.dot(h, w2_ref[...], preferred_element_type=jnp.float32) + b2_ref[...]
    z = jnp.maximum(z, 0.0).astype(jnp.bfloat16)   # ReLU; Dropout (eval) = identity
    o_ref[...] = (jnp.dot(z, wc_ref[...], preferred_element_type=jnp.float32)
                  + bc_ref[...]).astype(o_ref.dtype)


def prepare_adapter_params(w1, b1, w2, b2, wc, bc):
    """One-time weight prep, hoisted out of the per-call path.

    Weights are stored [in, out] (transposed vs. nn.Linear's [out, in])."""
    w1 = jnp.asarray(w1)
    w2 = jnp.asarray(w2)
    wc = jnp.asarray(wc)
    assert w1.shape == (FEAT_DIM, BOTTLENECK), f"W1 must be [2560,128], got {w1.shape}"
    assert w2.shape == (BOTTLENECK, FEAT_DIM), f"W2 must be [128,2560], got {w2.shape}"
    assert wc.shape == (FEAT_DIM, NUM_CLASSES), f"Wc must be [2560,10], got {wc.shape}"

    w1_bf = w1.astype(jnp.bfloat16)
    w2_bf = w2.astype(jnp.bfloat16)
    # Lane-dense classifier: zero-pad Wc / bc to 128 output lanes.
    wc_bf = jnp.zeros((FEAT_DIM, PADDED_CLASSES), jnp.bfloat16)
    wc_bf = wc_bf.at[:, :NUM_CLASSES].set(wc.astype(jnp.bfloat16))

    b1_f = jnp.asarray(b1, jnp.float32).reshape(1, BOTTLENECK)
    b2_f = jnp.asarray(b2, jnp.float32).reshape(1, FEAT_DIM)
    bc_p = jnp.zeros((1, PADDED_CLASSES), jnp.float32)
    bc_p = bc_p.at[:, :NUM_CLASSES].set(
        jnp.asarray(bc, jnp.float32).reshape(1, NUM_CLASSES))
    return (w1_bf, b1_f, w2_bf, b2_f, wc_bf, bc_p)


def _make_adapter_call(B, tile, vmem_limit, cost, single_buffer_weights):
    grid = (_cdiv(B, tile),)  # ragged last block tolerated (writes masked)

    def wspec(shape):
        if single_buffer_weights:
            # Constant index_map -> never re-fetched; single buffer saves VMEM.
            return pl.BlockSpec(shape, lambda i: (0, 0), pipeline_mode=pl.Buffered(1))
        return pl.BlockSpec(shape, lambda i: (0, 0))

    return pl.pallas_call(
        adapter_kernel,
        out_shape=jax.ShapeDtypeStruct((B, PADDED_CLASSES), jnp.bfloat16),
        grid_spec=pltpu.PrefetchScalarGridSpec(
            num_scalar_prefetch=0,
            grid=grid,
            in_specs=[
                pl.BlockSpec((tile, FEAT_DIM), lambda i: (i, 0)),   # features tile (f32)
                wspec((FEAT_DIM, BOTTLENECK)),                      # W1 (resident)
                wspec((1, BOTTLENECK)),                             # b1
                wspec((BOTTLENECK, FEAT_DIM)),                      # W2 (resident)
                wspec((1, FEAT_DIM)),                               # b2
                wspec((FEAT_DIM, PADDED_CLASSES)),                  # Wc (resident, padded)
                wspec((1, PADDED_CLASSES)),                         # bc (padded)
            ],
            out_specs=pl.BlockSpec((tile, PADDED_CLASSES), lambda i: (i, 0)),
        ),
        compiler_params=pltpu.CompilerParams(
            dimension_semantics=("parallel",),
            vmem_limit_bytes=vmem_limit,
        ),
        cost_estimate=cost,
    )


def baseline_adapter100_head(features, params, *, tile_b=512):
    """features: [B, 2560] f32 (= teacher.get_features(x)). Returns f32 [B, 10]."""
    w1_bf, b1_f, w2_bf, b2_f, wc_bf, bc_p = params
    x = jnp.asarray(features)
    assert x.ndim == 2 and x.shape[1] == FEAT_DIM, x.shape
    B = x.shape[0]

    # Tile: big for throughput, but guarantee grid >= 2 whenever B >= 16 so the
    # batch axis can shard across v7x's two TensorCores. No jnp.pad: ragged
    # last block is handled by the pipeline's boundary masking.
    tile = max(8, min(tile_b, _round_up(_cdiv(B, 2), 8)))

    # Advisory cost estimate for XLA scheduling around the teacher network.
    flops = 2 * B * (FEAT_DIM * BOTTLENECK + BOTTLENECK * FEAT_DIM
                     + FEAT_DIM * PADDED_CLASSES)
    bytes_accessed = (x.size * x.dtype.itemsize
                      + (w1_bf.size + w2_bf.size + wc_bf.size) * 2
                      + (b1_f.size + b2_f.size + bc_p.size) * 4
                      + B * PADDED_CLASSES * 2)
    cost = pl.CostEstimate(flops=flops, transcendentals=0,
                           bytes_accessed=bytes_accessed)

    # Per-step VMEM footprint: double-buffered x/out tiles, single-buffered
    # resident weights, f32/bf16 intermediates.
    vmem_est = (2 * tile * FEAT_DIM * x.dtype.itemsize      # x tile, 2 bufs
                + 2 * tile * PADDED_CLASSES * 2              # out tile (bf16), 2 bufs
                + (w1_bf.size + w2_bf.size + wc_bf.size) * 2  # resident weights
                + (b1_f.size + b2_f.size + bc_p.size) * 4     # resident biases
                + tile * FEAT_DIM * (2 + 4 + 2)               # x bf16, z f32, z bf16
                + tile * BOTTLENECK * (4 + 2))                # h f32 + bf16
    vmem_limit = None
    if vmem_est > (14 << 20):  # exceeds v5e's default scoped-VMEM headroom
        cap = max(_vmem_capacity_bytes() - (16 << 20), 32 << 20)
        vmem_limit = min(int(vmem_est * 3 // 2), cap)

    args = (x, w1_bf, b1_f, w2_bf, b2_f, wc_bf, bc_p)
    try:
        out = _make_adapter_call(B, tile, vmem_limit, cost, True)(*args)
    except Exception:
        # Fallback if this build rejects pipeline_mode on pallas_call inputs.
        out = _make_adapter_call(B, tile, vmem_limit, cost, False)(*args)

    return out[:B, :NUM_CLASSES].astype(jnp.float32)


def reference_bf16(x, w1, b1, w2, b2, wc, bc):
    """Same math / same bf16-operand, f32-accum precision as the kernel."""
    xb = x.astype(jnp.bfloat16)
    h = jnp.dot(xb, w1.astype(jnp.bfloat16), preferred_element_type=jnp.float32) + b1
    h = jnp.maximum(h, 0.0)
    z = jnp.dot(h.astype(jnp.bfloat16), w2.astype(jnp.bfloat16),
                preferred_element_type=jnp.float32) + b2
    z = jnp.maximum(z, 0.0)
    return jnp.dot(z.astype(jnp.bfloat16), wc.astype(jnp.bfloat16),
                   preferred_element_type=jnp.float32) + bc


def reference_f32(x, w1, b1, w2, b2, wc, bc):
    h = jnp.maximum(x @ w1 + b1, 0.0)
    z = jnp.maximum(h @ w2 + b2, 0.0)
    return z @ wc + bc


if __name__ == "__main__":
    key = jax.random.PRNGKey(0)
    k_x, k_w1, k_b1, k_w2, k_b2, k_wc, k_bc = jax.random.split(key, 7)

    B = 16  # small demo batch; "features" = teacher.get_features(x) output
    features = jax.random.normal(k_x, (B, FEAT_DIM), dtype=jnp.float32)

    # Deterministic parameter init (uniform, matching nn.Linear fan-in scaling).
    def linear_init(kw, kb, fan_in, fan_out):
        bound = 1.0 / jnp.sqrt(fan_in)
        w = jax.random.uniform(kw, (fan_in, fan_out), jnp.float32, -bound, bound)
        b = jax.random.uniform(kb, (1, fan_out), jnp.float32, -bound, bound)
        return w, b

    w1, b1 = linear_init(k_w1, k_b1, FEAT_DIM, BOTTLENECK)
    w2, b2 = linear_init(k_w2, k_b2, BOTTLENECK, FEAT_DIM)
    wc, bc = linear_init(k_wc, k_bc, FEAT_DIM, NUM_CLASSES)

    # One-time weight prep (hoisted out of the per-call path).
    params = prepare_adapter_params(w1, b1, w2, b2, wc, bc)

    # First call: B=16 -> tile=8, grid=(2,) (exercises the megacore split path).
    out = jax.block_until_ready(baseline_adapter100_head(features, params))
    assert out.shape == (B, NUM_CLASSES)

    ref_bf = reference_bf16(features, w1, b1, w2, b2, wc, bc)
    assert jnp.allclose(out, ref_bf, atol=2e-2, rtol=2e-2)

    ref_f32 = reference_f32(features, w1, b1, w2, b2, wc, bc)
    assert jnp.allclose(out, ref_f32, atol=5e-2, rtol=5e-2)

    # Second call: batch not a multiple of the tile -> ragged last block
    # (no jnp.pad copy), multi-step grid.
    B2 = 40
    feats2 = jax.random.normal(jax.random.PRNGKey(1), (B2, FEAT_DIM),
                               dtype=jnp.float32)
    out2 = jax.block_until_ready(
        baseline_adapter100_head(feats2, params, tile_b=16))
    assert out2.shape == (B2, NUM_CLASSES)
    ref2 = reference_bf16(feats2, w1, b1, w2, b2, wc, bc)
    assert jnp.allclose(out2, ref2, atol=2e-2, rtol=2e-2)

    print("KERNEL_OK")
</pallas_src>

<mosaic_0001>
module attributes {stable_mosaic.version = 11 : i64} {
  func.func @adapter_kernel(%arg0: i32, %arg1: memref<8x2560xf32, #tpu.memory_space<vmem>>, %arg2: memref<2560x128xbf16, #tpu.memory_space<vmem>>, %arg3: memref<1x128xf32, #tpu.memory_space<vmem>>, %arg4: memref<128x2560xbf16, #tpu.memory_space<vmem>>, %arg5: memref<1x2560xf32, #tpu.memory_space<vmem>>, %arg6: memref<2560x128xbf16, #tpu.memory_space<vmem>>, %arg7: memref<1x128xf32, #tpu.memory_space<vmem>>, %arg8: memref<8x128xbf16, #tpu.memory_space<vmem>>) attributes {dimension_semantics = [#tpu.dimension_semantics<parallel>], iteration_bounds = array<i64: 2>, scalar_prefetch = 0 : i64, scratch_operands = 0 : i64, tpu.core_type = #tpu.core_type<tc>, window_params = [{transform_indices = @transform_0, window_bounds = array<i64: 8, 2560>}, {pipeline_mode = #tpu.pipeline_mode<synchronous>, transform_indices = @transform_1, window_bounds = array<i64: 2560, 128>}, {pipeline_mode = #tpu.pipeline_mode<synchronous>, transform_indices = @transform_2, window_bounds = array<i64: 1, 128>}, {pipeline_mode = #tpu.pipeline_mode<synchronous>, transform_indices = @transform_3, window_bounds = array<i64: 128, 2560>}, {pipeline_mode = #tpu.pipeline_mode<synchronous>, transform_indices = @transform_4, window_bounds = array<i64: 1, 2560>}, {pipeline_mode = #tpu.pipeline_mode<synchronous>, transform_indices = @transform_5, window_bounds = array<i64: 2560, 128>}, {pipeline_mode = #tpu.pipeline_mode<synchronous>, transform_indices = @transform_6, window_bounds = array<i64: 1, 128>}, {transform_indices = @transform_7, window_bounds = array<i64: 8, 128>}]} {
    %c0 = arith.constant 0 : index
    %c0_0 = arith.constant 0 : index
    %0 = vector.load %arg1[%c0, %c0_0] : memref<8x2560xf32, #tpu.memory_space<vmem>>, vector<8x2560xf32>
    %1 = arith.truncf %0 : vector<8x2560xf32> to vector<8x2560xbf16>
    %c0_1 = arith.constant 0 : index
    %c0_2 = arith.constant 0 : index
    %2 = vector.load %arg2[%c0_1, %c0_2] : memref<2560x128xbf16, #tpu.memory_space<vmem>>, vector<2560x128xbf16>
    %cst = arith.constant dense<0.000000e+00> : vector<8x128xf32>
    %3 = tpu.matmul %1, %2, %cst {dimension_numbers = #tpu.dot_dimension_numbers<[1], [0], [0], [1], [0, 0, 1, 1], [], []>} : vector<8x2560xbf16>, vector<2560x128xbf16>, vector<8x128xf32> -> vector<8x128xf32>
    %c0_3 = arith.constant 0 : index
    %c0_4 = arith.constant 0 : index
    %4 = vector.load %arg3[%c0_3, %c0_4] : memref<1x128xf32, #tpu.memory_space<vmem>>, vector<1x128xf32>
    %5 = vector.broadcast %4 : vector<1x128xf32> to vector<8x128xf32>
    %6 = arith.addf %3, %5 : vector<8x128xf32>
    %cst_5 = arith.constant 0.000000e+00 : f32
    %7 = vector.broadcast %cst_5 : f32 to vector<8x128xf32>
    %8 = arith.maximumf %6, %7 : vector<8x128xf32>
    %9 = arith.truncf %8 : vector<8x128xf32> to vector<8x128xbf16>
    %c0_6 = arith.constant 0 : index
    %c0_7 = arith.constant 0 : index
    %10 = vector.load %arg4[%c0_6, %c0_7] : memref<128x2560xbf16, #tpu.memory_space<vmem>>, vector<128x2560xbf16>
    %cst_8 = arith.constant dense<0.000000e+00> : vector<8x2560xf32>
    %11 = tpu.matmul %9, %10, %cst_8 {dimension_numbers = #tpu.dot_dimension_numbers<[1], [0], [0], [1], [0, 0, 1, 1], [], []>} : vector<8x128xbf16>, vector<128x2560xbf16>, vector<8x2560xf32> -> vector<8x2560xf32>
    %c0_9 = arith.constant 0 : index
    %c0_10 = arith.constant 0 : index
    %12 = vector.load %arg5[%c0_9, %c0_10] : memref<1x2560xf32, #tpu.memory_space<vmem>>, vector<1x2560xf32>
    %13 = vector.broadcast %12 : vector<1x2560xf32> to vector<8x2560xf32>
    %14 = arith.addf %11, %13 : vector<8x2560xf32>
    %cst_11 = arith.constant 0.000000e+00 : f32
    %15 = vector.broadcast %cst_11 : f32 to vector<8x2560xf32>
    %16 = arith.maximumf %14, %15 : vector<8x2560xf32>
    %17 = arith.truncf %16 : vector<8x2560xf32> to vector<8x2560xbf16>
    %c0_12 = arith.constant 0 : index
    %c0_13 = arith.constant 0 : index
    %18 = vector.load %arg6[%c0_12, %c0_13] : memref<2560x128xbf16, #tpu.memory_space<vmem>>, vector<2560x128xbf16>
    %cst_14 = arith.constant dense<0.000000e+00> : vector<8x128xf32>
    %19 = tpu.matmul %17, %18, %cst_14 {dimension_numbers = #tpu.dot_dimension_numbers<[1], [0], [0], [1], [0, 0, 1, 1], [], []>} : vector<8x2560xbf16>, vector<2560x128xbf16>, vector<8x128xf32> -> vector<8x128xf32>
    %c0_15 = arith.constant 0 : index
    %c0_16 = arith.constant 0 : index
    %20 = vector.load %arg7[%c0_15, %c0_16] : memref<1x128xf32, #tpu.memory_space<vmem>>, vector<1x128xf32>
    %21 = vector.broadcast %20 : vector<1x128xf32> to vector<8x128xf32>
    %22 = arith.addf %19, %21 : vector<8x128xf32>
    %23 = arith.truncf %22 : vector<8x128xf32> to vector<8x128xbf16>
    %c0_17 = arith.constant 0 : index
    %c0_18 = arith.constant 0 : index
    %24 = vector.load %arg8[%c0_17, %c0_18] : memref<8x128xbf16, #tpu.memory_space<vmem>>, vector<8x128xbf16>
    tpu.vector_store %arg8[%c0_17, %c0_18], %23 {strides = array<i32>} : memref<8x128xbf16, #tpu.memory_space<vmem>>, vector<8x128xbf16>,
    return
  }
  func.func @transform_0(%arg0: i32) -> (i32, i32) {
    %c0_i32 = arith.constant 0 : i32
    %c0_i32_0 = arith.constant 0 : i32
    return %arg0, %c0_i32 : i32, i32
  }
  func.func @transform_1(%arg0: i32) -> (i32, i32) {
    %c0_i32 = arith.constant 0 : i32
    %c0_i32_0 = arith.constant 0 : i32
    %c0_i32_1 = arith.constant 0 : i32
    return %c0_i32, %c0_i32_0 : i32, i32
  }
  func.func @transform_2(%arg0: i32) -> (i32, i32) {
    %c0_i32 = arith.constant 0 : i32
    %c0_i32_0 = arith.constant 0 : i32
    %c0_i32_1 = arith.constant 0 : i32
    return %c0_i32, %c0_i32_0 : i32, i32
  }
  func.func @transform_3(%arg0: i32) -> (i32, i32) {
    %c0_i32 = arith.constant 0 : i32
    %c0_i32_0 = arith.constant 0 : i32
    %c0_i32_1 = arith.constant 0 : i32
    return %c0_i32, %c0_i32_0 : i32, i32
  }
  func.func @transform_4(%arg0: i32) -> (i32, i32) {
    %c0_i32 = arith.constant 0 : i32
    %c0_i32_0 = arith.constant 0 : i32
    %c0_i32_1 = arith.constant 0 : i32
    return %c0_i32, %c0_i32_0 : i32, i32
  }
  func.func @transform_5(%arg0: i32) -> (i32, i32) {
    %c0_i32 = arith.constant 0 : i32
    %c0_i32_0 = arith.constant 0 : i32
    %c0_i32_1 = arith.constant 0 : i32
    return %c0_i32, %c0_i32_0 : i32, i32
  }
  func.func @transform_6(%arg0: i32) -> (i32, i32) {
    %c0_i32 = arith.constant 0 : i32
    %c0_i32_0 = arith.constant 0 : i32
    %c0_i32_1 = arith.constant 0 : i32
    return %c0_i32, %c0_i32_0 : i32, i32
  }
  func.func @transform_7(%arg0: i32) -> (i32, i32) {
    %c0_i32 = arith.constant 0 : i32
    %c0_i32_0 = arith.constant 0 : i32
    return %arg0, %c0_i32 : i32, i32
  }
}

module attributes {stable_mosaic.version = 11 : i64} {
  func.func @adapter_kernel(%arg0: i32, %arg1: memref<8x2560xf32, #tpu.memory_space<vmem>>, %arg2: memref<2560x128xbf16, #tpu.memory_space<vmem>>, %arg3: memref<1x128xf32, #tpu.memory_space<vmem>>, %arg4: memref<128x2560xbf16, #tpu.memory_space<vmem>>, %arg5: memref<1x2560xf32, #tpu.memory_space<vmem>>, %arg6: memref<2560x128xbf16, #tpu.memory_space<vmem>>, %arg7: memref<1x128xf32, #tpu.memory_space<vmem>>, %arg8: memref<8x128xbf16, #tpu.memory_space<vmem>>) attributes {dimension_semantics = [#tpu.dimension_semantics<parallel>], iteration_bounds = array<i64: 2>, scalar_prefetch = 0 : i64, scratch_operands = 0 : i64, tpu.core_type = #tpu.core_type<tc>, window_params = [{transform_indices = @transform_0, window_bounds = array<i64: 8, 2560>}, {pipeline_mode = #tpu.pipeline_mode<synchronous>, transform_indices = @transform_1, window_bounds = array<i64: 2560, 128>}, {pipeline_mode = #tpu.pipeline_mode<synchronous>, transform_indices = @transform_2, window_bounds = array<i64: 1, 128>}, {pipeline_mode = #tpu.pipeline_mode<synchronous>, transform_indices = @transform_3, window_bounds = array<i64: 128, 2560>}, {pipeline_mode = #tpu.pipeline_mode<synchronous>, transform_indices = @transform_4, window_bounds = array<i64: 1, 2560>}, {pipeline_mode = #tpu.pipeline_mode<synchronous>, transform_indices = @transform_5, window_bounds = array<i64: 2560, 128>}, {pipeline_mode = #tpu.pipeline_mode<synchronous>, transform_indices = @transform_6, window_bounds = array<i64: 1, 128>}, {transform_indices = @transform_7, window_bounds = array<i64: 8, 128>}]} {
    %c0 = arith.constant 0 : index
    %c0_0 = arith.constant 0 : index
    %0 = vector.load %arg1[%c0, %c0_0] : memref<8x2560xf32, #tpu.memory_space<vmem>>, vector<8x2560xf32>
    %1 = arith.truncf %0 : vector<8x2560xf32> to vector<8x2560xbf16>
    %c0_1 = arith.constant 0 : index
    %c0_2 = arith.constant 0 : index
    %2 = vector.load %arg2[%c0_1, %c0_2] : memref<2560x128xbf16, #tpu.memory_space<vmem>>, vector<2560x128xbf16>
    %cst = arith.constant dense<0.000000e+00> : vector<8x128xf32>
    %3 = tpu.matmul %1, %2, %cst {dimension_numbers = #tpu.dot_dimension_numbers<[1], [0], [0], [1], [0, 0, 1, 1], [], []>} : vector<8x2560xbf16>, vector<2560x128xbf16>, vector<8x128xf32> -> vector<8x128xf32>
    %c0_3 = arith.constant 0 : index
    %c0_4 = arith.constant 0 : index
    %4 = vector.load %arg3[%c0_3, %c0_4] : memref<1x128xf32, #tpu.memory_space<vmem>>, vector<1x128xf32>
    %5 = vector.broadcast %4 : vector<1x128xf32> to vector<8x128xf32>
    %6 = arith.addf %3, %5 : vector<8x128xf32>
    %cst_5 = arith.constant 0.000000e+00 : f32
    %7 = vector.broadcast %cst_5 : f32 to vector<8x128xf32>
    %8 = arith.maximumf %6, %7 : vector<8x128xf32>
    %9 = arith.truncf %8 : vector<8x128xf32> to vector<8x128xbf16>
    %c0_6 = arith.constant 0 : index
    %c0_7 = arith.constant 0 : index
    %10 = vector.load %arg4[%c0_6, %c0_7] : memref<128x2560xbf16, #tpu.memory_space<vmem>>, vector<128x2560xbf16>
    %cst_8 = arith.constant dense<0.000000e+00> : vector<8x2560xf32>
    %11 = tpu.matmul %9, %10, %cst_8 {dimension_numbers = #tpu.dot_dimension_numbers<[1], [0], [0], [1], [0, 0, 1, 1], [], []>} : vector<8x128xbf16>, vector<128x2560xbf16>, vector<8x2560xf32> -> vector<8x2560xf32>
    %c0_9 = arith.constant 0 : index
    %c0_10 = arith.constant 0 : index
    %12 = vector.load %arg5[%c0_9, %c0_10] : memref<1x2560xf32, #tpu.memory_space<vmem>>, vector<1x2560xf32>
    %13 = vector.broadcast %12 : vector<1x2560xf32> to vector<8x2560xf32>
    %14 = arith.addf %11, %13 : vector<8x2560xf32>
    %cst_11 = arith.constant 0.000000e+00 : f32
    %15 = vector.broadcast %cst_11 : f32 to vector<8x2560xf32>
    %16 = arith.maximumf %14, %15 : vector<8x2560xf32>
    %17 = arith.truncf %16 : vector<8x2560xf32> to vector<8x2560xbf16>
    %c0_12 = arith.constant 0 : index
    %c0_13 = arith.constant 0 : index
    %18 = vector.load %arg6[%c0_12, %c0_13] : memref<2560x128xbf16, #tpu.memory_space<vmem>>, vector<2560x128xbf16>
    %cst_14 = arith.constant dense<0.000000e+00> : vector<8x128xf32>
    %19 = tpu.matmul %17, %18, %cst_14 {dimension_numbers = #tpu.dot_dimension_numbers<[1], [0], [0], [1], [0, 0, 1, 1], [], []>} : vector<8x2560xbf16>, vector<2560x128xbf16>, vector<8x128xf32> -> vector<8x128xf32>
    %c0_15 = arith.constant 0 : index
    %c0_16 = arith.constant 0 : index
    %20 = vector.load %arg7[%c0_15, %c0_16] : memref<1x128xf32, #tpu.memory_space<vmem>>, vector<1x128xf32>
    %21 = vector.broadcast %20 : vector<1x128xf32> to vector<8x128xf32>
    %22 = arith.addf %19, %21 : vector<8x128xf32>
    %23 = arith.truncf %22 : vector<8x128xf32> to vector<8x128xbf16>
    %c0_17 = arith.constant 0 : index
    %c0_18 = arith.constant 0 : index
    %24 = vector.load %arg8[%c0_17, %c0_18] : memref<8x128xbf16, #tpu.memory_space<vmem>>, vector<8x128xbf16>
    tpu.vector_store %arg8[%c0_17, %c0_18], %23 {strides = array<i32>} : memref<8x128xbf16, #tpu.memory_space<vmem>>, vector<8x128xbf16>,
    return
  }
  func.func @transform_0(%arg0: i32) -> (i32, i32) {
    %c0_i32 = arith.constant 0 : i32
    %c0_i32_0 = arith.constant 0 : i32
    return %arg0, %c0_i32 : i32, i32
  }
  func.func @transform_1(%arg0: i32) -> (i32, i32) {
    %c0_i32 = arith.constant 0 : i32
    %c0_i32_0 = arith.constant 0 : i32
    %c0_i32_1 = arith.constant 0 : i32
    return %c0_i32, %c0_i32_0 : i32, i32
  }
  func.func @transform_2(%arg0: i32) -> (i32, i32) {
    %c0_i32 = arith.constant 0 : i32
    %c0_i32_0 = arith.constant 0 : i32
    %c0_i32_1 = arith.constant 0 : i32
    return %c0_i32, %c0_i32_0 : i32, i32
  }
  func.func @transform_3(%arg0: i32) -> (i32, i32) {
    %c0_i32 = arith.constant 0 : i32
    %c0_i32_0 = arith.constant 0 : i32
    %c0_i32_1 = arith.constant 0 : i32
    return %c0_i32, %c0_i32_0 : i32, i32
  }
  func.func @transform_4(%arg0: i32) -> (i32, i32) {
    %c0_i32 = arith.constant 0 : i32
    %c0_i32_0 = arith.constant 0 : i32
    %c0_i32_1 = arith.constant 0 : i32
    return %c0_i32, %c0_i32_0 : i32, i32
  }
  func.func @transform_5(%arg0: i32) -> (i32, i32) {
    %c0_i32 = arith.constant 0 : i32
    %c0_i32_0 = arith.constant 0 : i32
    %c0_i32_1 = arith.constant 0 : i32
    return %c0_i32, %c0_i32_0 : i32, i32
  }
  func.func @transform_6(%arg0: i32) -> (i32, i32) {
    %c0_i32 = arith.constant 0 : i32
    %c0_i32_0 = arith.constant 0 : i32
    %c0_i32_1 = arith.constant 0 : i32
    return %c0_i32, %c0_i32_0 : i32, i32
  }
  func.func @transform_7(%arg0: i32) -> (i32, i32) {
    %c0_i32 = arith.constant 0 : i32
    %c0_i32_0 = arith.constant 0 : i32
    return %arg0, %c0_i32 : i32, i32
  }
}

</mosaic_0001>

<bundles_post_ra>
// kernel: tpu_custom_call.1
= control target key start
LH: loop header
LB: loop body
LE: loop exit
PB: predicated region body
PF: predicated region fallthrough
CT: control target
= control target key end

     0   :  { %s7669_s0 = inlined_call_operand.hbm [shape: f32[16,2560], index: 0, kind: input, shape index: {}]   ;;  %s7670_s1 = inlined_call_operand.hbm [shape: bf16[2560,128], index: 1, kind: input, shape index: {}]   ;;  %s7671_s2 = inlined_call_operand.vmem [shape: f32[1,128], index: 2, kind: input, shape index: {}]   ;;  %s7672_s3 = inlined_call_operand.hbm [shape: bf16[128,2560], index: 3, kind: input, shape index: {}]   ;;  %s7673_s4 = inlined_call_operand.hbm [shape: f32[1,2560], index: 4, kind: input, shape index: {}]   ;;  %s7674_s5 = inlined_call_operand.hbm [shape: bf16[2560,128], index: 5, kind: input, shape index: {}]   ;;  %s7675_s6 = inlined_call_operand.vmem [shape: f32[1,128], index: 6, kind: input, shape index: {}]   ;;  %s7676_s7 = inlined_call_operand.hbm [shape: bf16[16,128], index: 7, kind: output, shape index: {}]  }
   0x1   :  { %7681 = sst [smem:[#allocation16_spill]] %s7670_s1 }
   0x2   :  { %12 = vsyncpa [#allocation3], 0 }
   0x3   :  { %14 = vsyncpa [#allocation3 + $0x1], 0 }
   0x4   :  { %15 = vsyncpa [#allocation6], 0 }
   0x5   :  { %16 = vsyncpa [#allocation9], 0 }
   0x6   :  { %17 = vsyncpa [#allocation4], 0 }
   0x7   :  { %19 = vsyncpa [#allocation4 + $0x1], 0  ;;  %s7272_s24 = smov 0   ;;  %s7274_s25 = smov 0  }
   0x8   :  { %s7276_s26 = smov 0   ;;  %s7278_s27 = smov 0  }
   0x9 LB: > { %s7221_s28 = smov [#allocation5]   ;;  %s7293_s30 = sadd.s32 4294967295, %s7219_s27   ;;  %s7219_s27 = sphi %s7278_s27, %s7703_s27   ;;  %s7215_s26 = sphi %s7276_s26, %s7702_s26   ;;  %s7211_s25 = sphi %s7274_s25, %s7701_s25   ;;  %s7207_s24 = sphi %s7272_s24, %s7700_s24  }
   0xa   : > { %s220_s29 = sshll.u32 %s7221_s28, 4  ;;  %p5409_p0 = scmp.ge.s32.totalorder %s7219_s27, 1  ;;  %s7298_s29 = int_to_ptr.vmem [resolvable:$true] %s220_s29 }
   0xb   : > { %p7678_p1 = scmp.eq.s32.totalorder %s7293_s30, 0  ;;  %p208_p2 = scmp.lt.s32.totalorder %s7219_s27, 3 }
   0xc   : > { %s7222_s9 = smov [#allocation8]   ;;  %s7223_s12 = smov [#allocation7]  }
   0xd   : > { %p7300_p3 = pnand %p5409_p0, %p208_p2  ;;  %s250_s10 = sshll.u32 %s7222_s9, 4  ;;  %s7313_s10 = int_to_ptr.vmem [resolvable:$true] %s250_s10 }
   0xe   : > { %s236_s13 = sshll.u32 %s7223_s12, 4  ;;  %s7684_s1 = sld [smem:[#allocation16_spill]]  ;;  %s7315_s13 = int_to_ptr.vmem [resolvable:$true] %s236_s13 }
   0xf   : > { %s7682_s8 = scalar_select %p7300_p3, 1, 0 }
  0x10   : > { %p6371_p5 = pneg %p7300_p3 }
  0x12   : > { %p7309_p6 = pnand %p6371_p5, %p7678_p1 }
  0x14   : > { %s7003_s16 = scalar_lea.hbm %s7684_s1, 20480  ;;  %p7325_p8 = pneg %p7309_p6 }
  0x15   : > { %p7004_p7 = scmp.ne.s32.totalorder %s7684_s1, %s7003_s16  ;;  %p7010_p11 = scmp.lt.u32.totalorder %s7003_s16, %s7684_s1 }
  0x17   : > { %p7006_p9 = pnand %p7325_p8, %p7004_p7 }
  0x19   : > { %p7007_p10 = pneg %p7006_p9 }
  0x1b   : > { %p7012_p12 = pnand %p7010_p11, %p7007_p10 }
  0x1d   : > { %7015 = shalt.err (!%p7012_p12)
}
  0x1e   : > { %s7016_s22 = scalar_lea.vmem %s7298_s29, 20480  ;;  %p7024_p5 = scmp.lt.s32.totalorder %s7298_s29, %s7298_s29 }
  0x1f   : > { %p7017_p13 = scmp.ne.s32.totalorder %s7298_s29, %s7016_s22  ;;  %p7025_p4 = scmp.lt.s32.totalorder %s7016_s22, %s7016_s22 }
  0x21   : > { %p7019_p0 = pnand %p7017_p13, %p7325_p8  ;;  %p7026_p7 = por %p7025_p4, %p7024_p5 }
  0x23   : > { %p7020_p2 = pneg %p7019_p0 }
  0x25   : > { %p7027_p9 = pnand %p7026_p7, %p7020_p2 }
  0x27   : > { %7030 = shalt.err (!%p7027_p9)
}
  0x28   : > { %s7677_s23 = smov 64   ;;  %s7225_s28 = smov 4  }
  0x29   : > { %6374 = dma.hbm_to_vmem [thread:$0]  (!%p7309_p6), %s7684_s1, 20480, %s7298_s29, [#allocation6], %s7677_s23, %s7677_s23, %s7225_s28  }
  0x2a   : > { %s7031_s16 = scalar_lea.hbm %s7673_s4, 320 }
  0x2b   : > { %p7032_p4 = scmp.ne.s32.totalorder %s7673_s4, %s7031_s16  ;;  %p7038_p12 = scmp.lt.u32.totalorder %s7031_s16, %s7673_s4 }
  0x2d   : > { %p7034_p10 = pnand %p7032_p4, %p7325_p8 }
  0x2f   : > { %p7035_p11 = pneg %p7034_p10 }
  0x31   : > { %p7040_p13 = pnand %p7038_p12, %p7035_p11 }
  0x33   : > { %7043 = shalt.err (!%p7040_p13)
}
  0x34   : > { %s7044_s29 = scalar_lea.vmem %s7313_s10, 320  ;;  %p7052_p7 = scmp.lt.s32.totalorder %s7313_s10, %s7313_s10 }
  0x35   : > { %p7045_p0 = scmp.ne.s32.totalorder %s7313_s10, %s7044_s29  ;;  %p7053_p9 = scmp.lt.s32.totalorder %s7044_s29, %s7044_s29 }
  0x37   : > { %p7047_p2 = pnand %p7045_p0, %p7325_p8  ;;  %p7054_p4 = por %p7053_p9, %p7052_p7 }
  0x39   : > { %p7048_p5 = pneg %p7047_p2 }
  0x3b   : > { %p7055_p10 = pnand %p7054_p4, %p7048_p5 }
  0x3d   : > { %7058 = shalt.err (!%p7055_p10)
}
  0x3e   : > { %6380 = dma.hbm_to_vmem [thread:$0]  (!%p7309_p6), %s7673_s4, 320, %s7313_s10, [#allocation9]  }
  0x3f   : > { %s7059_s15 = scalar_lea.hbm %s7672_s3, 20480 }
  0x40   : > { %p7060_p11 = scmp.ne.s32.totalorder %s7672_s3, %s7059_s15  ;;  %p7066_p0 = scmp.lt.u32.totalorder %s7059_s15, %s7672_s3 }
  0x42   : > { %p7062_p12 = pnand %p7060_p11, %p7325_p8 }
  0x44   : > { %p7063_p13 = pneg %p7062_p12 }
  0x46   : > { %p7068_p2 = pnand %p7066_p0, %p7063_p13 }
  0x48   : > { %7071 = shalt.err (!%p7068_p2)
}
  0x49   : > { %s7072_s10 = scalar_lea.vmem %s7315_s13, 20480  ;;  %p7080_p4 = scmp.lt.s32.totalorder %s7315_s13, %s7315_s13 }
  0x4a   : > { %p7073_p5 = scmp.ne.s32.totalorder %s7315_s13, %s7072_s10  ;;  %p7081_p10 = scmp.lt.s32.totalorder %s7072_s10, %s7072_s10 }
  0x4c   : > { %p7075_p7 = pnand %p7073_p5, %p7325_p8  ;;  %p7082_p11 = por %p7081_p10, %p7080_p4 }
  0x4e   : > { %p7076_p9 = pneg %p7075_p7 }
  0x50   : > { %p7083_p12 = pnand %p7082_p11, %p7076_p9 }
  0x52   : > { %7086 = shalt.err (!%p7083_p12)
}
  0x53   : > { %s7226_s21 = smov 1280   ;;  %s7227_s29 = smov 80  }
  0x54   : > { %6377 = dma.hbm_to_vmem [thread:$0]  (!%p7309_p6), %s7672_s3, 20480, %s7315_s13, [#allocation6], %s7226_s21, %s7226_s21, %s7227_s29  }
  0x55   : > { %s7228_s12 = smov [#allocation10]   ;;  %s7087_s17 = scalar_lea.hbm %s7674_s5, 20480 }
  0x56   : > { %s260_s14 = sshll.u32 %s7228_s12, 4  ;;  %p7088_p13 = scmp.ne.s32.totalorder %s7674_s5, %s7087_s17  ;;  %s261_s14 = int_to_ptr.vmem [resolvable:$true] %s260_s14 }
  0x57   : > { %p7094_p5 = scmp.lt.u32.totalorder %s7087_s17, %s7674_s5 }
  0x58   : > { %p7090_p0 = pnand %p7088_p13, %p7325_p8 }
  0x5a   : > { %p7091_p2 = pneg %p7090_p0 }
  0x5c   : > { %p7096_p7 = pnand %p7094_p5, %p7091_p2 }
  0x5e   : > { %7099 = shalt.err (!%p7096_p7)
}
  0x5f   : > { %s7100_s13 = scalar_lea.vmem %s261_s14, 20480  ;;  %p7108_p11 = scmp.lt.s32.totalorder %s261_s14, %s261_s14 }
  0x60   : > { %p7101_p9 = scmp.ne.s32.totalorder %s261_s14, %s7100_s13  ;;  %p7109_p12 = scmp.lt.s32.totalorder %s7100_s13, %s7100_s13 }
  0x62   : > { %p7103_p4 = pnand %p7101_p9, %p7325_p8  ;;  %p7110_p1 = por %p7109_p12, %p7108_p11 }
  0x64   : > { %p7104_p10 = pneg %p7103_p4 }
  0x66   : > { %p7111_p3 = pnand %p7110_p1, %p7104_p10 }
  0x68   : > { %7114 = shalt.err (!%p7111_p3)
}
  0x69   : > { %s7686_s21 = smov 64   ;;  %s5408_s11 = sadd.s32 4294967294, %s7219_s27  }
  0x6a   : > { %6383 = dma.hbm_to_vmem [thread:$0]  (!%p7309_p6), %s7674_s5, 20480, %s261_s14, [#allocation9], %s7686_s21, %s7686_s21, %s7225_s28  }
  0x6b   : > { %s7418_s19 = sadd.s32 1, %s7219_s27   ;;  %s32_s9 = sadd.s32 1, %s7215_s26 }
  0x6c   : > { %s29_s22 = ssub.s32 %s7219_s27, %s7418_s19  ;;  %p39_p3 = scmp.ne.s32.totalorder %s7215_s26, %s7211_s25 }
  0x6d   : > { %p30_p1 = scmp.eq.s32.totalorder %s29_s22, 0  ;;  %p40_p8 = scmp.eq.s32.totalorder %s7219_s27, 0 }
  0x6e   : > { %p45_p13 = scmp.ne.s32.totalorder %s7211_s25, %s7207_s24  ;;  %p7687_p2 = scmp.eq.s32.totalorder %s7293_s30, 0 }
  0x6f   : > { %s7429_s12 = scalar_select %p30_p1, %s7215_s26, %s32_s9  }
  0x70   : > { %p41_p0 = por %p40_p8, %p39_p3  ;;  %p7433_p5 = por %p7687_p2, %p45_p13 }
  0x71   : > { %p195_p6 = scmp.eq.s32.totalorder %s7293_s30, 1  ;;  %p201_p7 = scmp.eq.s32.totalorder %s5408_s11, 1 }
  0x72   : > { %p6396_p9 = scmp.lt.s32.totalorder %s7219_s27, 2  ;;  %s277_s28 = sand.u32 1, %s7215_s26  }
  0x73   : > { %p7440_p4 = por %p195_p6, %p39_p3  ;;  %p7444_p10 = por %p201_p7, %p45_p13 }
  0x74   : > { %s6348_s17 = smul.u32 160, %s277_s28  ;;  %p7449_p11 = pnand %p6396_p9, %p41_p0 }
  0x75   : > { %s7689_s14 = scalar_select %p7440_p4, 1, 0 }
  0x76   : > { %s7690_s16 = scalar_select %p7444_p10, 1, 0 }
  0x77   : > { %s6349_s18 = smul.u32 2560, %s7219_s27  ;;  %s281_s23 = scalar_lea.vmem [#allocation2], %s6348_s17 }
  0x78   : > { %s289_s29 = sshll.u32 %s281_s23, 4  ;;  %s278_s11 = scalar_lea.sflag [#allocation3], %s277_s28  ;;  %s7458_s29 = int_to_ptr.vmem [resolvable:$true] %s289_s29 }
  0x79   : > { %s7456_s21 = scalar_lea.hbm %s7669_s0, %s6349_s18  ;;  %p7117_p1 = pneg %p7449_p11 }
  0x7a   : > { %s7115_s22 = scalar_lea.hbm %s7456_s21, 2560  ;;  %s7120_s10 = scalar_lea.hbm %s7669_s0, 5120 }
  0x7b   : > { %p7116_p12 = scmp.ne.s32.totalorder %s7456_s21, %s7115_s22  ;;  %p7121_p13 = scmp.lt.u32.totalorder %s7456_s21, %s7669_s0 }
  0x7c   : > { %p7122_p0 = scmp.lt.u32.totalorder %s7120_s10, %s7115_s22  ;;  %p7124_p6 = scmp.lt.u32.totalorder %s7115_s22, %s7456_s21 }
  0x7d   : > { %p7118_p3 = pnand %p7117_p1, %p7116_p12 }
  0x7e   : > { %p7123_p2 = por %p7122_p0, %p7121_p13 }
  0x7f   : > { %p7119_p8 = pneg %p7118_p3 }
  0x80   : > { %p7125_p7 = por %p7124_p6, %p7123_p2 }
  0x82   : > { %p7126_p9 = pnand %p7125_p7, %p7119_p8 }
  0x84   : > { %7129 = shalt.err (!%p7126_p9)
}
  0x85   : > { %s7130_s28 = scalar_lea.vmem %s7458_s29, 2560  ;;  %s7229_s17 = smov [#allocation2]  }
  0x86   : > { %p7131_p12 = scmp.ne.s32.totalorder %s7458_s29, %s7130_s28  ;;  %s7135_s23 = sshll.u32 %s7229_s17, 4  ;;  %s7136_s23 = int_to_ptr.vmem [resolvable:$false] %s7135_s23 }
  0x87   : > { %s7137_s1 = scalar_lea.vmem %s7136_s23, 5120  ;;  %p7138_p4 = scmp.lt.s32.totalorder %s7458_s29, %s7136_s23 }
  0x88   : > { %p7133_p3 = pnand %p7131_p12, %p7117_p1  ;;  %p7139_p13 = scmp.lt.s32.totalorder %s7137_s1, %s7130_s28 }
  0x8a   : > { %p7134_p10 = pneg %p7133_p3  ;;  %p7140_p0 = por %p7139_p13, %p7138_p4 }
  0x8c   : > { %p7141_p2 = pnand %p7140_p0, %p7134_p10 }
  0x8e   : > { %7144 = shalt.err (!%p7141_p2)
}
  0x8f   : > { %6387 = dma.hbm_to_vmem [thread:$0]  (!%p7449_p11), %s7456_s21, 2560, %s7458_s29, %s278_s11  }
  0x90   : > { %p7692_p8 = scmp.ne.s32.totalorder %s7682_s8, 0 }
  0x91   : > { %s7488_s22 = sand.u32 (!%p7692_p8), 1, %s7211_s25  }
  0x92   : > { %298 = sbr.rel (%p7692_p8) target bundleno = 1128 (0x468), region = 48  ;;  %s301_s18 = scalar_lea.sflag (!%p7692_p8), [#allocation3], %s7488_s22 }
  0x93   : > { %s6350_s9 = smul.u32 (!%p7692_p8), 160, %s7488_s22 }
  0x95   : > { %s7492_s10 = scalar_lea.vmem (!%p7692_p8), [#allocation2], %s6350_s9 }
  0x99   : > { %7190 = dma.done.wait (%p7433_p5), %s301_s18, 2560  }
  0x9a   : > { %7192 = vsyncadd (%p7433_p5), %s301_s18, 4294964736  ;;  %p7693_p4 = scmp.eq.s32.totalorder %s7293_s30, 0 }
  0x9c   : > { %7194 = dma.done.wait (%p7693_p4), [#allocation6], 40960   ;;  %p7694_p10 = pmov %p7693_p4 }
  0x9d   : > { %p7695_p11 = pmov %p7693_p4 }
  0x9e   : > { %7196 = vsyncadd (%p7694_p10), [#allocation6], 4294926336 }
  0x9f   : > { %7198 = dma.done.wait (%p7695_p11), [#allocation9], 20800   ;;  %p7696_p1 = pmov %p7693_p4 }
  0xa0   : > { %v6443_v0 = vld [vmem:[#allocation5 + $0x40] sm:$0xff]   ;;  %v6447_v4 = vld [vmem:[#allocation5 + $0x48] sm:$0xff]   ;;  %v6451_v8 = vld [vmem:[#allocation5 + $0x50] sm:$0xff]   ;;  %s5421_s29 = sshll.u32 %s7488_s22, 2  ;;  %s5905_s11 = sshll.u32 %s7293_s30, 6 }
  0xa1   : > { %7200 = vsyncadd (%p7696_p1), [#allocation9], 4294946496  ;;  %v6444_v1 = vld [vmem:[#allocation5 + $0xc0] sm:$0xff]   ;;  %5908 = vmatprep.subr.bf16.mxu0 %v6443_v0  ;;  %v6448_v5 = vld [vmem:[#allocation5 + $0xc8] sm:$0xff]   ;;  %s350_s13 = scalar_lea.vmem [#allocation11], %s5421_s29  ;;  %s7625_s1 = scalar_lea.hbm %s7676_s7, %s5905_s11 }
  0xa2   : > { %v6445_v2 = vld [vmem:[#allocation5] sm:$0xff]   ;;  %5930 = vmatprep.subr.bf16.mxu1 %v6444_v1  ;;  %v6449_v6 = vld [vmem:[#allocation5 + $0x8] sm:$0xff]   ;;  %v6452_v9 = vld [vmem:[#allocation5 + $0xd0] sm:$0xff]   ;;  %s5300_s28 = sshll.u32 %s350_s13, 4  ;;  %s5287_s9 = scalar_lea.sflag [#allocation4], %s7488_s22  ;;  %s7627_s28 = int_to_ptr.vmem [resolvable:$true] %s5300_s28 }
  0xa3   : > { %v6446_v3 = vld [vmem:[#allocation5 + $0x80] sm:$0xff]   ;;  %5909 = vmatpush3.bf16.msra.mxu0 %v6445_v2  ;;  %v6450_v7 = vld [vmem:[#allocation5 + $0x88] sm:$0xff]   ;;  %v6453_v10 = vld [vmem:[#allocation5 + $0x10] sm:$0xff]   ;;  %s7145_s18 = scalar_lea.vmem %s7627_s28, 64  ;;  %p7697_p6 = scmp.ne.s32.totalorder %s7689_s14, 0 }
  0xa4   : > { %5931 = vmatpush3.bf16.msra.mxu1 %v6446_v3  ;;  %5910 = vmatprep.subr.bf16.mxu0 %v6447_v4  ;;  %v6454_v11 = vld [vmem:[#allocation5 + $0x90] sm:$0xff]   ;;  %v6455_v12 = vld [vmem:[#allocation5 + $0x58] sm:$0xff]   ;;  %v6459_v16 = vld [vmem:[#allocation5 + $0x60] sm:$0xff]   ;;  %p7146_p5 = scmp.ne.s32.totalorder %s7627_s28, %s7145_s18  ;;  %s7231_s30 = smov [#allocation11]  }
  0xa5   : > { %5932 = vmatprep.subr.bf16.mxu1 %v6448_v5  ;;  %v6456_v13 = vld [vmem:[#allocation5 + $0xd8] sm:$0xff]   ;;  %v6460_v17 = vld [vmem:[#allocation5 + $0xe0] sm:$0xff]   ;;  %v6463_v20 = vld [vmem:[#allocation5 + $0x68] sm:$0xff]  }
  0xa6   : > { %v6457_v14 = vld [vmem:[#allocation5 + $0x18] sm:$0xff]   ;;  %v6461_v18 = vld [vmem:[#allocation5 + $0x20] sm:$0xff]   ;;  %v6464_v21 = vld [vmem:[#allocation5 + $0xe8] sm:$0xff]   ;;  %p7147_p7 = pnand %p7146_p5, %p7697_p6 }
  0xa7   : > { %5911 = vmatpush3.bf16.msra.mxu0 %v6449_v6  ;;  %v6458_v15 = vld [vmem:[#allocation5 + $0x98] sm:$0xff]   ;;  %v6462_v19 = vld [vmem:[#allocation5 + $0xa0] sm:$0xff]   ;;  %v6465_v22 = vld [vmem:[#allocation5 + $0x28] sm:$0xff]  }
  0xa8   : > { %5933 = vmatpush3.bf16.msra.mxu1 %v6450_v7  ;;  %5912 = vmatprep.subr.bf16.mxu0 %v6451_v8  ;;  %v6466_v23 = vld [vmem:[#allocation5 + $0xa8] sm:$0xff]   ;;  %v6467_v24 = vld [vmem:[#allocation5 + $0x70] sm:$0xff]   ;;  %v6471_v28 = vld [vmem:[#allocation5 + $0x78] sm:$0xff]   ;;  %p7148_p9 = pneg %p7147_p7 }
  0xa9   : > { %5934 = vmatprep.subr.bf16.mxu1 %v6452_v9  ;;  %v6468_v25 = vld [vmem:[#allocation5 + $0xf0] sm:$0xff]   ;;  %v6472_v29 = vld [vmem:[#allocation5 + $0xf8] sm:$0xff]   ;;  %v353_v32 = vld [vmem:[%s7492_s10 + $0x8] sm:$0xff] }
  0xaa   : > { %v6469_v26 = vld [vmem:[#allocation5 + $0x30] sm:$0xff]   ;;  %v6473_v30 = vld [vmem:[#allocation5 + $0x38] sm:$0xff]   ;;  %v352_v34 = vld [vmem:[%s7492_s10] sm:$0xff]  ;;  %v373_v35 = vpack.c.bf16 %v353_v32, %v353_v32 }
  0xab   : > { %5913 = vmatpush3.bf16.msra.mxu0 %v6453_v10  ;;  %v6470_v27 = vld [vmem:[#allocation5 + $0xb0] sm:$0xff]   ;;  %v6474_v31 = vld [vmem:[#allocation5 + $0xb8] sm:$0xff]   ;;  %v372_v37 = vpack.c.bf16 %v352_v34, %v352_v34  ;;  %v6475_v40 = vld [vmem:[#allocation5 + $0x140] sm:$0xff]  }
  0xac   : > { %5935 = vmatpush3.bf16.msra.mxu1 %v6454_v11  ;;  %5914 = vmatprep.subr.bf16.mxu0 %v6455_v12  ;;  %v355_v33 = vld [vmem:[%s7492_s10 + $0x18] sm:$0xff]  ;;  %v354_v38 = vld [vmem:[%s7492_s10 + $0x10] sm:$0xff]  ;;  %v6476_v41 = vld [vmem:[#allocation5 + $0x1c0] sm:$0xff]  }
  0xad   : > { %5936 = vmatprep.subr.bf16.mxu1 %v6456_v13  ;;  %v375_v36 = vpack.c.bf16 %v355_v33, %v355_v33  ;;  %v374_v39 = vpack.c.bf16 %v354_v38, %v354_v38  ;;  %1711 = vmatprep.mubr.bf16.mxu0 %v373_v35  ;;  %v6477_v42 = vld [vmem:[#allocation5 + $0x100] sm:$0xff]   ;;  %v6479_v44 = vld [vmem:[#allocation5 + $0x148] sm:$0xff]   ;;  %v6483_v48 = vld [vmem:[#allocation5 + $0x150] sm:$0xff]  }
  0xae   : > { %v6478_v43 = vld [vmem:[#allocation5 + $0x180] sm:$0xff]   ;;  %v6480_v45 = vld [vmem:[#allocation5 + $0x1c8] sm:$0xff]   ;;  %v6484_v49 = vld [vmem:[#allocation5 + $0x1d0] sm:$0xff]  }
  0xaf   : > { %5915 = vmatpush3.bf16.msra.mxu0 %v6457_v14  ;;  %1751 = vmatprep.mubr.bf16.mxu1 %v375_v36  ;;  %v6481_v46 = vld [vmem:[#allocation5 + $0x108] sm:$0xff]   ;;  %v6485_v50 = vld [vmem:[#allocation5 + $0x110] sm:$0xff]   ;;  %v6487_v52 = vld [vmem:[#allocation5 + $0x158] sm:$0xff]  }
  0xb0   : > { %5937 = vmatpush3.bf16.msra.mxu1 %v6458_v15  ;;  %5916 = vmatprep.subr.bf16.mxu0 %v6459_v16  ;;  %v6482_v47 = vld [vmem:[#allocation5 + $0x188] sm:$0xff]   ;;  %v6486_v51 = vld [vmem:[#allocation5 + $0x190] sm:$0xff]   ;;  %v6488_v53 = vld [vmem:[#allocation5 + $0x1d8] sm:$0xff]  }
  0xb1   : > { %5938 = vmatprep.subr.bf16.mxu1 %v6460_v17  ;;  %v6489_v54 = vld [vmem:[#allocation5 + $0x118] sm:$0xff]   ;;  %v6491_v56 = vld [vmem:[#allocation5 + $0x160] sm:$0xff]   ;;  %v6495_v60 = vld [vmem:[#allocation5 + $0x168] sm:$0xff]  }
  0xb2   : > { %v6490_v55 = vld [vmem:[#allocation5 + $0x198] sm:$0xff]   ;;  %v6492_v57 = vld [vmem:[#allocation5 + $0x1e0] sm:$0xff]   ;;  %v6496_v61 = vld [vmem:[#allocation5 + $0x1e8] sm:$0xff]  }
  0xb3   : > { %5917 = vmatpush3.bf16.msra.mxu0 %v6461_v18  ;;  %v6493_v58 = vld [vmem:[#allocation5 + $0x120] sm:$0xff]   ;;  %v6497_v62 = vld [vmem:[#allocation5 + $0x128] sm:$0xff]   ;;  %v6499_v0 = vld [vmem:[#allocation5 + $0x170] sm:$0xff]  }
  0xb4   : > { %5939 = vmatpush3.bf16.msra.mxu1 %v6462_v19  ;;  %5918 = vmatprep.subr.bf16.mxu0 %v6463_v20  ;;  %v6494_v59 = vld [vmem:[#allocation5 + $0x1a0] sm:$0xff]   ;;  %v6498_v63 = vld [vmem:[#allocation5 + $0x1a8] sm:$0xff]   ;;  %v6500_v1 = vld [vmem:[#allocation5 + $0x1f0] sm:$0xff]  }
  0xb5   : > { %5940 = vmatprep.subr.bf16.mxu1 %v6464_v21  ;;  %v6501_v2 = vld [vmem:[#allocation5 + $0x130] sm:$0xff]   ;;  %v6503_v4 = vld [vmem:[#allocation5 + $0x178] sm:$0xff]   ;;  %v357_v8 = vld [vmem:[%s7492_s10 + $0x28] sm:$0xff] }
  0xb6   : > { %v6502_v3 = vld [vmem:[#allocation5 + $0x1b0] sm:$0xff]   ;;  %v6504_v5 = vld [vmem:[#allocation5 + $0x1f8] sm:$0xff]   ;;  %v377_v10 = vpack.c.bf16 %v357_v8, %v357_v8  ;;  %v356_v12 = vld [vmem:[%s7492_s10 + $0x20] sm:$0xff] }
  0xb7   : > { %5919 = vmatpush3.bf16.msra.mxu0 %v6465_v22  ;;  %v6505_v6 = vld [vmem:[#allocation5 + $0x138] sm:$0xff]   ;;  %v358_v13 = vld [vmem:[%s7492_s10 + $0x30] sm:$0xff]  ;;  %v376_v14 = vpack.c.bf16 %v356_v12, %v356_v12  ;;  %v6507_v16 = vld [vmem:[#allocation5 + $0x240] sm:$0xff]  }
  0xb8   : > { %5941 = vmatpush3.bf16.msra.mxu1 %v6466_v23  ;;  %5920 = vmatprep.subr.bf16.mxu0 %v6467_v24  ;;  %v6506_v7 = vld [vmem:[#allocation5 + $0x1b8] sm:$0xff]   ;;  %v378_v15 = vpack.c.bf16 %v358_v13, %v358_v13  ;;  %v6508_v17 = vld [vmem:[#allocation5 + $0x2c0] sm:$0xff]   ;;  %v6511_v20 = vld [vmem:[#allocation5 + $0x248] sm:$0xff]  }
  0xb9   : > { %5942 = vmatprep.subr.bf16.mxu1 %v6468_v25  ;;  %v359_v9 = vld [vmem:[%s7492_s10 + $0x38] sm:$0xff]  ;;  %v6509_v18 = vld [vmem:[#allocation5 + $0x200] sm:$0xff]   ;;  %v6512_v21 = vld [vmem:[#allocation5 + $0x2c8] sm:$0xff]  }
  0xba   : > { %v379_v11 = vpack.c.bf16 %v359_v9, %v359_v9  ;;  %v6510_v19 = vld [vmem:[#allocation5 + $0x280] sm:$0xff]   ;;  %v6513_v22 = vld [vmem:[#allocation5 + $0x208] sm:$0xff]   ;;  %v6515_v24 = vld [vmem:[#allocation5 + $0x250] sm:$0xff]  }
  0xbb   : > { %5921 = vmatpush3.bf16.msra.mxu0 %v6469_v26  ;;  %v6514_v23 = vld [vmem:[#allocation5 + $0x288] sm:$0xff]   ;;  %v6516_v25 = vld [vmem:[#allocation5 + $0x2d0] sm:$0xff]   ;;  %v6523_v32 = vld [vmem:[#allocation5 + $0x260] sm:$0xff]  }
  0xbc   : > { %5943 = vmatpush3.bf16.msra.mxu1 %v6470_v27  ;;  %5922 = vmatprep.subr.bf16.mxu0 %v6471_v28  ;;  %v6517_v26 = vld [vmem:[#allocation5 + $0x210] sm:$0xff]   ;;  %v6519_v28 = vld [vmem:[#allocation5 + $0x258] sm:$0xff]   ;;  %v6524_v33 = vld [vmem:[#allocation5 + $0x2e0] sm:$0xff]  }
  0xbd   : > { %5944 = vmatprep.subr.bf16.mxu1 %v6472_v29  ;;  %v6518_v27 = vld [vmem:[#allocation5 + $0x290] sm:$0xff]   ;;  %v6520_v29 = vld [vmem:[#allocation5 + $0x2d8] sm:$0xff]   ;;  %v6525_v34 = vld [vmem:[#allocation5 + $0x220] sm:$0xff]  }
  0xbe   : > { %v6526_v35 = vld [vmem:[#allocation5 + $0x2a0] sm:$0xff]   ;;  %v6527_v36 = vld [vmem:[#allocation5 + $0x268] sm:$0xff]  }
  0xbf   : > { %5923 = vmatpush3.bf16.msra.mxu0 %v6473_v30  ;;  %v6521_v30 = vld [vmem:[#allocation5 + $0x218] sm:$0xff]   ;;  %v6529_v38 = vld [vmem:[#allocation5 + $0x228] sm:$0xff]   ;;  %v6555_v8 = vld [vmem:[#allocation5 + $0x360] sm:$0xff]  }
  0xc0   : > { %5945 = vmatpush3.bf16.msra.mxu1 %v6474_v31  ;;  %5952 = vmatprep.subr.bf16.mxu0 %v6475_v40  ;;  %v6522_v31 = vld [vmem:[#allocation5 + $0x298] sm:$0xff]   ;;  %v6531_v40 = vld [vmem:[#allocation5 + $0x270] sm:$0xff]   ;;  %v6556_v9 = vld [vmem:[#allocation5 + $0x3e0] sm:$0xff]  }
  0xc1   : > { %5974 = vmatprep.subr.bf16.mxu1 %v6476_v41  ;;  %v6532_v41 = vld [vmem:[#allocation5 + $0x2f0] sm:$0xff]   ;;  %v6559_v12 = vld [vmem:[#allocation5 + $0x368] sm:$0xff]  }
  0xc2   : > { %1712 = vmatmul.mubr.bf16.vlgmr.msra.gmra.mrb[0].mxu0 %v372_v37  ;;  %v6528_v37 = vld [vmem:[#allocation5 + $0x2e8] sm:$0xff]  }
  0xc3   : > { %1752 = vmatmul.mubr.bf16.vlgmr.msra.gmra.mrb[0].mxu1 %v374_v39  ;;  %5953 = vmatpush3.bf16.msra.mxu0 %v6477_v42  ;;  %v6530_v39 = vld [vmem:[#allocation5 + $0x2a8] sm:$0xff]   ;;  %v6533_v42 = vld [vmem:[#allocation5 + $0x230] sm:$0xff]  }
  0xc4   : > { %5975 = vmatpush3.bf16.msra.mxu1 %v6478_v43  ;;  %5954 = vmatprep.subr.bf16.mxu0 %v6479_v44  ;;  %v6534_v43 = vld [vmem:[#allocation5 + $0x2b0] sm:$0xff]   ;;  %v6535_v44 = vld [vmem:[#allocation5 + $0x278] sm:$0xff]   ;;  %v6560_v13 = vld [vmem:[#allocation5 + $0x3e8] sm:$0xff]  }
  0xc5   : > { %5976 = vmatprep.subr.bf16.mxu1 %v6480_v45  ;;  %1791 = vmatprep.mubr.bf16.mxu0 %v377_v10  ;;  %v6536_v45 = vld [vmem:[#allocation5 + $0x2f8] sm:$0xff]   ;;  %v6557_v10 = vld [vmem:[#allocation5 + $0x320] sm:$0xff]  }
  0xc6   : > { %1831 = vmatprep.mubr.bf16.mxu1 %v379_v11  ;;  %v6558_v11 = vld [vmem:[#allocation5 + $0x3a0] sm:$0xff]  }
  0xc7   : > { %5955 = vmatpush3.bf16.msra.mxu0 %v6481_v46  ;;  %v6537_v46 = vld [vmem:[#allocation5 + $0x238] sm:$0xff]  }
  0xc8   : > { %5977 = vmatpush3.bf16.msra.mxu1 %v6482_v47  ;;  %5956 = vmatprep.subr.bf16.mxu0 %v6483_v48  ;;  %v6538_v47 = vld [vmem:[#allocation5 + $0x2b8] sm:$0xff]   ;;  %v361_v48 = vld [vmem:[%s7492_s10 + $0x48] sm:$0xff] }
  0xc9   : > { %5978 = vmatprep.subr.bf16.mxu1 %v6484_v49  ;;  %v381_v49 = vpack.c.bf16 %v361_v48, %v361_v48  ;;  %v6587_v48 = vld [vmem:[#allocation5 + $0x460] sm:$0xff]  }
  0xcb   : > { %5957 = vmatpush3.bf16.msra.mxu0 %v6485_v50  ;;  %v363_v50 = vld [vmem:[%s7492_s10 + $0x58] sm:$0xff] }
  0xcc   : > { %5979 = vmatpush3.bf16.msra.mxu1 %v6486_v51  ;;  %5958 = vmatprep.subr.bf16.mxu0 %v6487_v52  ;;  %v360_v51 = vld [vmem:[%s7492_s10 + $0x40] sm:$0xff]  ;;  %v362_v52 = vld [vmem:[%s7492_s10 + $0x50] sm:$0xff] }
  0xcd   : > { %5980 = vmatprep.subr.bf16.mxu1 %v6488_v53  ;;  %v383_v53 = vpack.c.bf16 %v363_v50, %v363_v50  ;;  %v6589_v50 = vld [vmem:[#allocation5 + $0x420] sm:$0xff]  }
  0xcf   : > { %5959 = vmatpush3.bf16.msra.mxu0 %v6489_v54  ;;  %v380_v54 = vpack.c.bf16 %v360_v51, %v360_v51  ;;  %v6590_v51 = vld [vmem:[#allocation5 + $0x4a0] sm:$0xff]  }
  0xd0   : > { %5981 = vmatpush3.bf16.msra.mxu1 %v6490_v55  ;;  %5960 = vmatprep.subr.bf16.mxu0 %v6491_v56  ;;  %v382_v55 = vpack.c.bf16 %v362_v52, %v362_v52  ;;  %v6539_v56 = vld [vmem:[#allocation5 + $0x340] sm:$0xff]   ;;  %v6591_v52 = vld [vmem:[#allocation5 + $0x468] sm:$0xff]  }
  0xd1   : > { %5982 = vmatprep.subr.bf16.mxu1 %v6492_v57  ;;  %v6540_v57 = vld [vmem:[#allocation5 + $0x3c0] sm:$0xff]  }
  0xd3   : > { %5961 = vmatpush3.bf16.msra.mxu0 %v6493_v58  ;;  %v6541_v58 = vld [vmem:[#allocation5 + $0x300] sm:$0xff]  }
  0xd4   : > { %5983 = vmatpush3.bf16.msra.mxu1 %v6494_v59  ;;  %5962 = vmatprep.subr.bf16.mxu0 %v6495_v60  ;;  %v6542_v59 = vld [vmem:[#allocation5 + $0x380] sm:$0xff]   ;;  %v6543_v60 = vld [vmem:[#allocation5 + $0x348] sm:$0xff]  }
  0xd5   : > { %5984 = vmatprep.subr.bf16.mxu1 %v6496_v61  ;;  %v6544_v61 = vld [vmem:[#allocation5 + $0x3c8] sm:$0xff]  }
  0xd7   : > { %5963 = vmatpush3.bf16.msra.mxu0 %v6497_v62  ;;  %v6545_v62 = vld [vmem:[#allocation5 + $0x308] sm:$0xff]  }
  0xd8   : > { %5985 = vmatpush3.bf16.msra.mxu1 %v6498_v63  ;;  %5964 = vmatprep.subr.bf16.mxu0 %v6499_v0  ;;  %v6546_v63 = vld [vmem:[#allocation5 + $0x388] sm:$0xff]   ;;  %v6547_v0 = vld [vmem:[#allocation5 + $0x350] sm:$0xff]  }
  0xd9   : > { %5986 = vmatprep.subr.bf16.mxu1 %v6500_v1  ;;  %v6548_v1 = vld [vmem:[#allocation5 + $0x3d0] sm:$0xff]  }
  0xdb   : > { %5965 = vmatpush3.bf16.msra.mxu0 %v6501_v2  ;;  %v6549_v2 = vld [vmem:[#allocation5 + $0x310] sm:$0xff]  }
  0xdc   : > { %5987 = vmatpush3.bf16.msra.mxu1 %v6502_v3  ;;  %5966 = vmatprep.subr.bf16.mxu0 %v6503_v4  ;;  %v6550_v3 = vld [vmem:[#allocation5 + $0x390] sm:$0xff]   ;;  %v6551_v4 = vld [vmem:[#allocation5 + $0x358] sm:$0xff]  }
  0xdd   : > { %5988 = vmatprep.subr.bf16.mxu1 %v6504_v5  ;;  %v6552_v5 = vld [vmem:[#allocation5 + $0x3d8] sm:$0xff]  }
  0xdf   : > { %5967 = vmatpush3.bf16.msra.mxu0 %v6505_v6  ;;  %v6553_v6 = vld [vmem:[#allocation5 + $0x318] sm:$0xff]  }
  0xe0   : > { %5989 = vmatpush3.bf16.msra.mxu1 %v6506_v7  ;;  %5996 = vmatprep.subr.bf16.mxu0 %v6507_v16  ;;  %v6554_v7 = vld [vmem:[#allocation5 + $0x398] sm:$0xff]   ;;  %v6563_v16 = vld [vmem:[#allocation5 + $0x370] sm:$0xff]  }
  0xe1   : > { %6018 = vmatprep.subr.bf16.mxu1 %v6508_v17  ;;  %v6564_v17 = vld [vmem:[#allocation5 + $0x3f0] sm:$0xff]  }
  0xe2   : > { %1792 = vmatmul.mubr.bf16.vlgmr.msra.gmra.mrb[4].mxu0 %v376_v14  ;;  %v6561_v14 = vld [vmem:[#allocation5 + $0x328] sm:$0xff]  }
  0xe3   : > { %1832 = vmatmul.mubr.bf16.vlgmr.msra.gmra.mrb[4].mxu1 %v378_v15  ;;  %5997 = vmatpush3.bf16.msra.mxu0 %v6509_v18  ;;  %v6562_v15 = vld [vmem:[#allocation5 + $0x3a8] sm:$0xff]   ;;  %v6565_v18 = vld [vmem:[#allocation5 + $0x330] sm:$0xff]  }
  0xe4   : > { %6019 = vmatpush3.bf16.msra.mxu1 %v6510_v19  ;;  %5998 = vmatprep.subr.bf16.mxu0 %v6511_v20  ;;  %v6566_v19 = vld [vmem:[#allocation5 + $0x3b0] sm:$0xff]   ;;  %v6567_v20 = vld [vmem:[#allocation5 + $0x378] sm:$0xff]  }
  0xe5   : > { %6020 = vmatprep.subr.bf16.mxu1 %v6512_v21  ;;  %1871 = vmatprep.mubr.bf16.mxu0 %v381_v49  ;;  %v6568_v21 = vld [vmem:[#allocation5 + $0x3f8] sm:$0xff]   ;;  %v6588_v49 = vld [vmem:[#allocation5 + $0x4e0] sm:$0xff]  }
  0xe6   : > { %1911 = vmatprep.mubr.bf16.mxu1 %v383_v53  ;;  %v6592_v53 = vld [vmem:[#allocation5 + $0x4e8] sm:$0xff]  }
  0xe7   : > { %5999 = vmatpush3.bf16.msra.mxu0 %v6513_v22  ;;  %v6569_v22 = vld [vmem:[#allocation5 + $0x338] sm:$0xff]  }
  0xe8   : > { %6021 = vmatpush3.bf16.msra.mxu1 %v6514_v23  ;;  %6000 = vmatprep.subr.bf16.mxu0 %v6515_v24  ;;  %v6570_v23 = vld [vmem:[#allocation5 + $0x3b8] sm:$0xff]   ;;  %v365_v24 = vld [vmem:[%s7492_s10 + $0x68] sm:$0xff] }
  0xe9   : > { %6022 = vmatprep.subr.bf16.mxu1 %v6516_v25  ;;  %v367_v25 = vld [vmem:[%s7492_s10 + $0x78] sm:$0xff] }
  0xeb   : > { %6001 = vmatpush3.bf16.msra.mxu0 %v6517_v26  ;;  %v364_v26 = vld [vmem:[%s7492_s10 + $0x60] sm:$0xff] }
  0xec   : > { %6023 = vmatpush3.bf16.msra.mxu1 %v6518_v27  ;;  %6002 = vmatprep.subr.bf16.mxu0 %v6519_v28  ;;  %v385_v27 = vpack.c.bf16 %v365_v24, %v365_v24  ;;  %v387_v28 = vpack.c.bf16 %v367_v25, %v367_v25  ;;  %v6629_v24 = vld [vmem:[#allocation7 + $0x284] ss:$80 sps:$4 sm:$0xff]   ;;  %v6632_v25 = vld [vmem:[#allocation7 + $0x28c] ss:$80 sps:$4 sm:$0xff]  }
  0xed   : > { %6024 = vmatprep.subr.bf16.mxu1 %v6520_v29  ;;  %v384_v29 = vpack.c.bf16 %v364_v26, %v364_v26  ;;  %v6627_v26 = vld [vmem:[#allocation7 + $0x280] ss:$80 sps:$4 sm:$0xff]  }
  0xef   : > { %6003 = vmatpush3.bf16.msra.mxu0 %v6521_v30  ;;  %v366_v30 = vld [vmem:[%s7492_s10 + $0x70] sm:$0xff] }
  0xf0   : > { %6025 = vmatpush3.bf16.msra.mxu1 %v6522_v31  ;;  %6004 = vmatprep.subr.bf16.mxu0 %v6523_v32  ;;  %v386_v31 = vpack.c.bf16 %v366_v30, %v366_v30  ;;  %v6571_v32 = vld [vmem:[#allocation5 + $0x440] sm:$0xff]  }
  0xf1   : > { %6026 = vmatprep.subr.bf16.mxu1 %v6524_v33  ;;  %v6572_v33 = vld [vmem:[#allocation5 + $0x4c0] sm:$0xff]  }
  0xf2   : > { %v6633_v30 = vld [vmem:[#allocation7 + $0x320] ss:$80 sps:$4 sm:$0xff]  }
  0xf3   : > { %6005 = vmatpush3.bf16.msra.mxu0 %v6525_v34  ;;  %v6573_v34 = vld [vmem:[#allocation5 + $0x400] sm:$0xff]  }
  0xf4   : > { %6027 = vmatpush3.bf16.msra.mxu1 %v6526_v35  ;;  %6006 = vmatprep.subr.bf16.mxu0 %v6527_v36  ;;  %v6574_v35 = vld [vmem:[#allocation5 + $0x480] sm:$0xff]   ;;  %v6575_v36 = vld [vmem:[#allocation5 + $0x448] sm:$0xff]  }
  0xf5   : > { %6028 = vmatprep.subr.bf16.mxu1 %v6528_v37  ;;  %v6576_v37 = vld [vmem:[#allocation5 + $0x4c8] sm:$0xff]  }
  0xf7   : > { %6007 = vmatpush3.bf16.msra.mxu0 %v6529_v38  ;;  %v6577_v38 = vld [vmem:[#allocation5 + $0x408] sm:$0xff]  }
  0xf8   : > { %6029 = vmatpush3.bf16.msra.mxu1 %v6530_v39  ;;  %6008 = vmatprep.subr.bf16.mxu0 %v6531_v40  ;;  %v6578_v39 = vld [vmem:[#allocation5 + $0x488] sm:$0xff]   ;;  %v6579_v40 = vld [vmem:[#allocation5 + $0x450] sm:$0xff]  }
  0xf9   : > { %6030 = vmatprep.subr.bf16.mxu1 %v6532_v41  ;;  %v6580_v41 = vld [vmem:[#allocation5 + $0x4d0] sm:$0xff]  }
  0xfb   : > { %6009 = vmatpush3.bf16.msra.mxu0 %v6533_v42  ;;  %v6581_v42 = vld [vmem:[#allocation5 + $0x410] sm:$0xff]  }
  0xfc   : > { %6031 = vmatpush3.bf16.msra.mxu1 %v6534_v43  ;;  %6010 = vmatprep.subr.bf16.mxu0 %v6535_v44  ;;  %v6582_v43 = vld [vmem:[#allocation5 + $0x490] sm:$0xff]   ;;  %v6583_v44 = vld [vmem:[#allocation5 + $0x458] sm:$0xff]  }
  0xfd   : > { %6032 = vmatprep.subr.bf16.mxu1 %v6536_v45  ;;  %v6584_v45 = vld [vmem:[#allocation5 + $0x4d8] sm:$0xff]  }
  0xff   : > { %6011 = vmatpush3.bf16.msra.mxu0 %v6537_v46  ;;  %v6585_v46 = vld [vmem:[#allocation5 + $0x418] sm:$0xff]  }
 0x100   : > { %6033 = vmatpush3.bf16.msra.mxu1 %v6538_v47  ;;  %6040 = vmatprep.subr.bf16.mxu0 %v6539_v56  ;;  %v6586_v47 = vld [vmem:[#allocation5 + $0x498] sm:$0xff]   ;;  %v6595_v56 = vld [vmem:[#allocation5 + $0x470] sm:$0xff]  }
 0x101   : > { %6062 = vmatprep.subr.bf16.mxu1 %v6540_v57  ;;  %v6596_v57 = vld [vmem:[#allocation5 + $0x4f0] sm:$0xff]  }
 0x102   : > { %1872 = vmatmul.mubr.bf16.vlgmr.msra.gmra.mrb[8].mxu0 %v380_v54  ;;  %v6593_v54 = vld [vmem:[#allocation5 + $0x428] sm:$0xff]  }
 0x103   : > { %1912 = vmatmul.mubr.bf16.vlgmr.msra.gmra.mrb[8].mxu1 %v382_v55  ;;  %6041 = vmatpush3.bf16.msra.mxu0 %v6541_v58  ;;  %v6594_v55 = vld [vmem:[#allocation5 + $0x4a8] sm:$0xff]   ;;  %v6597_v58 = vld [vmem:[#allocation5 + $0x430] sm:$0xff]  }
 0x104   : > { %6063 = vmatpush3.bf16.msra.mxu1 %v6542_v59  ;;  %6042 = vmatprep.subr.bf16.mxu0 %v6543_v60  ;;  %v6598_v59 = vld [vmem:[#allocation5 + $0x4b0] sm:$0xff]   ;;  %v6599_v60 = vld [vmem:[#allocation5 + $0x478] sm:$0xff]  }
 0x105   : > { %6064 = vmatprep.subr.bf16.mxu1 %v6544_v61  ;;  %1951 = vmatprep.mubr.bf16.mxu0 %v385_v27  ;;  %v6600_v61 = vld [vmem:[#allocation5 + $0x4f8] sm:$0xff]  }
 0x106   : > { %1991 = vmatprep.mubr.bf16.mxu1 %v387_v28  ;;  %v6630_v27 = vld [vmem:[#allocation7 + $0x288] ss:$80 sps:$4 sm:$0xff]   ;;  %v6635_v28 = vld [vmem:[#allocation7 + $0x324] ss:$80 sps:$4 sm:$0xff]  }
 0x107   : > { %6043 = vmatpush3.bf16.msra.mxu0 %v6545_v62  ;;  %v6601_v62 = vld [vmem:[#allocation5 + $0x438] sm:$0xff]  }
 0x108   : > { %6065 = vmatpush3.bf16.msra.mxu1 %v6546_v63  ;;  %6044 = vmatprep.subr.bf16.mxu0 %v6547_v0  ;;  %v6602_v63 = vld [vmem:[#allocation5 + $0x4b8] sm:$0xff]   ;;  %v369_v0 = vld [vmem:[%s7492_s10 + $0x88] sm:$0xff] }
 0x109   : > { %6066 = vmatprep.subr.bf16.mxu1 %v6548_v1  ;;  %v371_v1 = vld [vmem:[%s7492_s10 + $0x98] sm:$0xff] }
 0x10b   : > { %6045 = vmatpush3.bf16.msra.mxu0 %v6549_v2  ;;  %v389_v2 = vpack.c.bf16 %v369_v0, %v369_v0 }
 0x10c   : > { %6067 = vmatpush3.bf16.msra.mxu1 %v6550_v3  ;;  %6046 = vmatprep.subr.bf16.mxu0 %v6551_v4  ;;  %v391_v3 = vpack.c.bf16 %v371_v1, %v371_v1  ;;  %v368_v4 = vld [vmem:[%s7492_s10 + $0x80] sm:$0xff] }
 0x10d   : > { %6068 = vmatprep.subr.bf16.mxu1 %v6552_v5  ;;  %v370_v5 = vld [vmem:[%s7492_s10 + $0x90] sm:$0xff]  ;;  %s7149_s10 = sshll.u32 %s7231_s30, 4  ;;  %s7150_s10 = int_to_ptr.vmem [resolvable:$false] %s7149_s10 }
 0x10e   : > { %s7151_s8 = scalar_lea.vmem %s7150_s10, 128  ;;  %p7152_p12 = scmp.lt.s32.totalorder %s7627_s28, %s7150_s10 }
 0x10f   : > { %6047 = vmatpush3.bf16.msra.mxu0 %v6553_v6  ;;  %v388_v6 = vpack.c.bf16 %v368_v4, %v368_v4  ;;  %p7153_p3 = scmp.lt.s32.totalorder %s7151_s8, %s7145_s18 }
 0x110   : > { %6069 = vmatpush3.bf16.msra.mxu1 %v6554_v7  ;;  %6048 = vmatprep.subr.bf16.mxu0 %v6555_v8  ;;  %v390_v7 = vpack.c.bf16 %v370_v5, %v370_v5  ;;  %v6603_v8 = vld [vmem:[#allocation7] ss:$80 sps:$4 sm:$0xff]  }
 0x111   : > { %6070 = vmatprep.subr.bf16.mxu1 %v6556_v9  ;;  %v6605_v9 = vld [vmem:[#allocation7 + $0x4] ss:$80 sps:$4 sm:$0xff]   ;;  %p7154_p13 = por %p7153_p3, %p7152_p12 }
 0x113   : > { %6049 = vmatpush3.bf16.msra.mxu0 %v6557_v10  ;;  %v6606_v10 = vld [vmem:[#allocation7 + $0x8] ss:$80 sps:$4 sm:$0xff]   ;;  %p7155_p0 = pnand %p7154_p13, %p7148_p9 }
 0x114   : > { %6071 = vmatpush3.bf16.msra.mxu1 %v6558_v11  ;;  %6050 = vmatprep.subr.bf16.mxu0 %v6559_v12  ;;  %v6608_v11 = vld [vmem:[#allocation7 + $0xc] ss:$80 sps:$4 sm:$0xff]   ;;  %v6611_v12 = vld [vmem:[#allocation7 + $0xa4] ss:$80 sps:$4 sm:$0xff]  }
 0x115   : > { %6072 = vmatprep.subr.bf16.mxu1 %v6560_v13  ;;  %v6614_v13 = vld [vmem:[#allocation7 + $0xac] ss:$80 sps:$4 sm:$0xff]  }
 0x117   : > { %6051 = vmatpush3.bf16.msra.mxu0 %v6561_v14  ;;  %v6609_v14 = vld [vmem:[#allocation7 + $0xa0] ss:$80 sps:$4 sm:$0xff]  }
 0x118   : > { %6073 = vmatpush3.bf16.msra.mxu1 %v6562_v15  ;;  %6052 = vmatprep.subr.bf16.mxu0 %v6563_v16  ;;  %v6612_v15 = vld [vmem:[#allocation7 + $0xa8] ss:$80 sps:$4 sm:$0xff]   ;;  %v6617_v16 = vld [vmem:[#allocation7 + $0x144] ss:$80 sps:$4 sm:$0xff]  }
 0x119   : > { %6074 = vmatprep.subr.bf16.mxu1 %v6564_v17  ;;  %v6620_v17 = vld [vmem:[#allocation7 + $0x14c] ss:$80 sps:$4 sm:$0xff]  }
 0x11b   : > { %6053 = vmatpush3.bf16.msra.mxu0 %v6565_v18  ;;  %v6615_v18 = vld [vmem:[#allocation7 + $0x140] ss:$80 sps:$4 sm:$0xff]  }
 0x11c   : > { %6075 = vmatpush3.bf16.msra.mxu1 %v6566_v19  ;;  %6054 = vmatprep.subr.bf16.mxu0 %v6567_v20  ;;  %v6618_v19 = vld [vmem:[#allocation7 + $0x148] ss:$80 sps:$4 sm:$0xff]   ;;  %v6623_v20 = vld [vmem:[#allocation7 + $0x1e4] ss:$80 sps:$4 sm:$0xff]  }
 0x11d   : > { %6076 = vmatprep.subr.bf16.mxu1 %v6568_v21  ;;  %v6626_v21 = vld [vmem:[#allocation7 + $0x1ec] ss:$80 sps:$4 sm:$0xff]  }
 0x11f   : > { %6055 = vmatpush3.bf16.msra.mxu0 %v6569_v22  ;;  %v6621_v22 = vld [vmem:[#allocation7 + $0x1e0] ss:$80 sps:$4 sm:$0xff]  }
 0x120   : > { %6077 = vmatpush3.bf16.msra.mxu1 %v6570_v23  ;;  %6084 = vmatprep.subr.bf16.mxu0 %v6571_v32  ;;  %v6624_v23 = vld [vmem:[#allocation7 + $0x1e8] ss:$80 sps:$4 sm:$0xff]   ;;  %v5422_v32 = vld [vmem:[%s7671_s2] ss:$0 sm:$0xff] }
 0x121   : > { %6106 = vmatprep.subr.bf16.mxu1 %v6572_v33 }
 0x122   : > { %1952 = vmatmul.mubr.bf16.vlgmr.msra.gmra.mrb[12].mxu0 %v384_v29  ;;  %v6638_v29 = vld [vmem:[#allocation7 + $0x32c] ss:$80 sps:$4 sm:$0xff]  }
 0x123   : > { %1992 = vmatmul.mubr.bf16.vlgmr.msra.gmra.mrb[12].mxu1 %v386_v31  ;;  %6085 = vmatpush3.bf16.msra.mxu0 %v6573_v34  ;;  %v6636_v31 = vld [vmem:[#allocation7 + $0x328] ss:$80 sps:$4 sm:$0xff]  }
 0x124   : > { %6107 = vmatpush3.bf16.msra.mxu1 %v6574_v35  ;;  %6086 = vmatprep.subr.bf16.mxu0 %v6575_v36 }
 0x125   : > { %6108 = vmatprep.subr.bf16.mxu1 %v6576_v37  ;;  %2031 = vmatprep.mubr.bf16.mxu0 %v389_v2 }
 0x126   : > { %2071 = vmatprep.mubr.bf16.mxu1 %v391_v3 }
 0x127   : > { %6087 = vmatpush3.bf16.msra.mxu0 %v6577_v38 }
 0x128   : > { %6109 = vmatpush3.bf16.msra.mxu1 %v6578_v39  ;;  %6088 = vmatprep.subr.bf16.mxu0 %v6579_v40 }
 0x129   : > { %6110 = vmatprep.subr.bf16.mxu1 %v6580_v41 }
 0x12b   : > { %6089 = vmatpush3.bf16.msra.mxu0 %v6581_v42 }
 0x12c   : > { %6111 = vmatpush3.bf16.msra.mxu1 %v6582_v43  ;;  %6090 = vmatprep.subr.bf16.mxu0 %v6583_v44 }
 0x12d   : > { %6112 = vmatprep.subr.bf16.mxu1 %v6584_v45  ;;  %v6641_v45 = vld [vmem:[#allocation7 + $0x3c4] ss:$80 sps:$4 sm:$0xff]  }
 0x12f   : > { %6091 = vmatpush3.bf16.msra.mxu0 %v6585_v46  ;;  %v6644_v46 = vld [vmem:[#allocation7 + $0x3cc] ss:$80 sps:$4 sm:$0xff]  }
 0x130   : > { %6113 = vmatpush3.bf16.msra.mxu1 %v6586_v47  ;;  %6092 = vmatprep.subr.bf16.mxu0 %v6587_v48  ;;  %v6639_v47 = vld [vmem:[#allocation7 + $0x3c0] ss:$80 sps:$4 sm:$0xff]   ;;  %v6642_v48 = vld [vmem:[#allocation7 + $0x3c8] ss:$80 sps:$4 sm:$0xff]  }
 0x131   : > { %6114 = vmatprep.subr.bf16.mxu1 %v6588_v49  ;;  %v6647_v49 = vld [vmem:[#allocation7 + $0x464] ss:$80 sps:$4 sm:$0xff]  }
 0x133   : > { %6093 = vmatpush3.bf16.msra.mxu0 %v6589_v50  ;;  %v6650_v50 = vld [vmem:[#allocation7 + $0x46c] ss:$80 sps:$4 sm:$0xff]  }
 0x134   : > { %6115 = vmatpush3.bf16.msra.mxu1 %v6590_v51  ;;  %6094 = vmatprep.subr.bf16.mxu0 %v6591_v52  ;;  %v6645_v51 = vld [vmem:[#allocation7 + $0x460] ss:$80 sps:$4 sm:$0xff]   ;;  %v6648_v52 = vld [vmem:[#allocation7 + $0x468] ss:$80 sps:$4 sm:$0xff]  }
 0x135   : > { %6116 = vmatprep.subr.bf16.mxu1 %v6592_v53  ;;  %v6653_v53 = vld [vmem:[#allocation7 + $0x14] ss:$80 sps:$4 sm:$0xff]  }
 0x137   : > { %6095 = vmatpush3.bf16.msra.mxu0 %v6593_v54  ;;  %v7230_v54 = vmov 0  }
 0x138   : > { %6117 = vmatpush3.bf16.msra.mxu1 %v6594_v55  ;;  %6096 = vmatprep.subr.bf16.mxu0 %v6595_v56  ;;  %v6656_v55 = vld [vmem:[#allocation7 + $0x1c] ss:$80 sps:$4 sm:$0xff]  }
 0x139   : > { %6118 = vmatprep.subr.bf16.mxu1 %v6596_v57 }
 0x13b   : > { %6097 = vmatpush3.bf16.msra.mxu0 %v6597_v58 }
 0x13c   : > { %6119 = vmatpush3.bf16.msra.mxu1 %v6598_v59  ;;  %6098 = vmatprep.subr.bf16.mxu0 %v6599_v60 }
 0x13d   : > { %6120 = vmatprep.subr.bf16.mxu1 %v6600_v61 }
 0x13f   : > { %6099 = vmatpush3.bf16.msra.mxu0 %v6601_v62 }
 0x140   : > { %6121 = vmatpush3.bf16.msra.mxu1 %v6602_v63  ;;  %3147 = vmatprep.subr.bf16.mxu0 %v6605_v9 }
 0x141   : > { %3188 = vmatprep.subr.bf16.mxu1 %v6608_v11 }
 0x142   : > { %2032 = vmatmul.mubr.bf16.vlgmr.msra.gmra.mrb[16].mxu0 %v388_v6 }
 0x143   : > { %2072 = vmatmul.mubr.bf16.vlgmr.msra.gmra.mrb[16].mxu1 %v390_v7  ;;  %3148 = vmatpush1.bf16.msra.mxu0 %v6603_v8 }
 0x144   : > { %3189 = vmatpush1.bf16.msra.mxu1 %v6606_v10  ;;  %3149 = vmatprep.subr.bf16.mxu0 %v6611_v12 }
 0x145   : > { %3190 = vmatprep.subr.bf16.mxu1 %v6614_v13  ;;  %3179 = vmatprep.mubr.bf16.mxu0 %v7230_v54 }
 0x146   : > { %3220 = vmatprep.mubr.bf16.mxu1 %v7230_v54 }
 0x147   : > { %3150 = vmatpush1.bf16.msra.mxu0 %v6609_v14 }
 0x148   : > { %3191 = vmatpush1.bf16.msra.mxu1 %v6612_v15  ;;  %3151 = vmatprep.subr.bf16.mxu0 %v6617_v16 }
 0x149   : > { %3192 = vmatprep.subr.bf16.mxu1 %v6620_v17 }
 0x14b   : > { %3152 = vmatpush1.bf16.msra.mxu0 %v6615_v18 }
 0x14c   : > { %3193 = vmatpush1.bf16.msra.mxu1 %v6618_v19  ;;  %3153 = vmatprep.subr.bf16.mxu0 %v6623_v20 }
 0x14d   : > { %3194 = vmatprep.subr.bf16.mxu1 %v6626_v21 }
 0x14f   : > { %3154 = vmatpush1.bf16.msra.mxu0 %v6621_v22 }
 0x150   : > { %3195 = vmatpush1.bf16.msra.mxu1 %v6624_v23  ;;  %3155 = vmatprep.subr.bf16.mxu0 %v6629_v24 }
 0x151   : > { %3196 = vmatprep.subr.bf16.mxu1 %v6632_v25 }
 0x153   : > { %3156 = vmatpush1.bf16.msra.mxu0 %v6627_v26 }
 0x154   : > { %3197 = vmatpush1.bf16.msra.mxu1 %v6630_v27  ;;  %3157 = vmatprep.subr.bf16.mxu0 %v6635_v28 }
 0x155   : > { %3198 = vmatprep.subr.bf16.mxu1 %v6638_v29 }
 0x157   : > { %3158 = vmatpush1.bf16.msra.mxu0 %v6633_v30 }
 0x158   : > { %3199 = vmatpush1.bf16.msra.mxu1 %v6636_v31  ;;  %3159 = vmatprep.subr.bf16.mxu0 %v6641_v45  ;;  %v6662_v45 = vld [vmem:[#allocation7 + $0xbc] ss:$80 sps:$4 sm:$0xff]  }
 0x159   : > { %3200 = vmatprep.subr.bf16.mxu1 %v6644_v46  ;;  %v6657_v46 = vld [vmem:[#allocation7 + $0xb0] ss:$80 sps:$4 sm:$0xff]  }
 0x15b   : > { %3160 = vmatpush1.bf16.msra.mxu0 %v6639_v47  ;;  %v6660_v47 = vld [vmem:[#allocation7 + $0xb8] ss:$80 sps:$4 sm:$0xff]  }
 0x15c   : > { %3201 = vmatpush1.bf16.msra.mxu1 %v6642_v48  ;;  %3161 = vmatprep.subr.bf16.mxu0 %v6647_v49  ;;  %v6665_v48 = vld [vmem:[#allocation7 + $0x154] ss:$80 sps:$4 sm:$0xff]   ;;  %v6668_v49 = vld [vmem:[#allocation7 + $0x15c] ss:$80 sps:$4 sm:$0xff]  }
 0x15d   : > { %3202 = vmatprep.subr.bf16.mxu1 %v6650_v50  ;;  %v6663_v50 = vld [vmem:[#allocation7 + $0x150] ss:$80 sps:$4 sm:$0xff]  }
 0x15f   : > { %3162 = vmatpush1.bf16.msra.mxu0 %v6645_v51  ;;  %v6666_v51 = vld [vmem:[#allocation7 + $0x158] ss:$80 sps:$4 sm:$0xff]  }
 0x160   : > { %3203 = vmatpush1.bf16.msra.mxu1 %v6648_v52  ;;  %3229 = vmatprep.subr.bf16.mxu0 %v6653_v53  ;;  %v6671_v52 = vld [vmem:[#allocation7 + $0x1f4] ss:$80 sps:$4 sm:$0xff]   ;;  %v6674_v53 = vld [vmem:[#allocation7 + $0x1fc] ss:$80 sps:$4 sm:$0xff]  }
 0x161   : > { %3270 = vmatprep.subr.bf16.mxu1 %v6656_v55  ;;  %v6669_v55 = vld [vmem:[#allocation7 + $0x1f0] ss:$80 sps:$4 sm:$0xff]  }
 0x195   : > { %v5924_v33 = vpop.f32.mrb[0].mxu0 }
 0x196   : > { %v5946_v34 = vpop.f32.mrb[0].mxu1  ;;  %v5925_v35 = vpop.f32.mrb[1].mxu0 }
 0x197   : > { %v5947_v36 = vpop.f32.mrb[1].mxu1  ;;  %v5926_v37 = vadd.f32 %v5925_v35, %v5924_v33  ;;  %v5927_v39 = vpop.f32.mrb[2].mxu0 }
 0x198   : > { %v5948_v38 = vadd.f32 %v5947_v36, %v5946_v34  ;;  %v5949_v40 = vpop.f32.mrb[2].mxu1  ;;  %v5928_v41 = vpop.f32.mrb[3].mxu0 }
 0x199   : > { %v5950_v42 = vpop.f32.mrb[3].mxu1  ;;  %v1714_v43 = vadd.f32 %v5926_v37, %v5422_v32  ;;  %v6651_v41 = vld [vmem:[#allocation7 + $0x10] ss:$80 sps:$4 sm:$0xff]  }
 0x19a   : > { %v6654_v42 = vld [vmem:[#allocation7 + $0x18] ss:$80 sps:$4 sm:$0xff]  }
 0x19b   : > { %v1754_v44 = vadd.f32 %v5948_v38, %v1714_v43 }
 0x1b5   : > { %v5968_v56 = vpop.f32.mrb[4].mxu0 }
 0x1b6   : > { %v5990_v57 = vpop.f32.mrb[4].mxu1  ;;  %v5969_v58 = vpop.f32.mrb[5].mxu0 }
 0x1b7   : > { %v5970_v59 = vadd.f32 %v5969_v58, %v5968_v56  ;;  %v5991_v60 = vpop.f32.mrb[5].mxu1  ;;  %v5971_v61 = vpop.f32.mrb[6].mxu0  ;;  %v6672_v56 = vld [vmem:[#allocation7 + $0x1f8] ss:$80 sps:$4 sm:$0xff]   ;;  %v6680_v58 = vld [vmem:[#allocation7 + $0x29c] ss:$80 sps:$4 sm:$0xff]  }
 0x1b8   : > { %v5992_v62 = vadd.f32 %v5991_v60, %v5990_v57  ;;  %v5993_v63 = vpop.f32.mrb[6].mxu1  ;;  %v5972_v0 = vpop.f32.mrb[7].mxu0  ;;  %v6677_v57 = vld [vmem:[#allocation7 + $0x294] ss:$80 sps:$4 sm:$0xff]   ;;  %v6678_v60 = vld [vmem:[#allocation7 + $0x298] ss:$80 sps:$4 sm:$0xff]  }
 0x1b9   : > { %v1794_v1 = vadd.f32 %v5970_v59, %v1754_v44  ;;  %v5994_v2 = vpop.f32.mrb[7].mxu1  ;;  %v6659_v44 = vld [vmem:[#allocation7 + $0xb4] ss:$80 sps:$4 sm:$0xff]   ;;  %v6675_v59 = vld [vmem:[#allocation7 + $0x290] ss:$80 sps:$4 sm:$0xff]  }
 0x1ba   : > { %v6683_v61 = vld [vmem:[#allocation7 + $0x334] ss:$80 sps:$4 sm:$0xff]   ;;  %v6681_v63 = vld [vmem:[#allocation7 + $0x330] ss:$80 sps:$4 sm:$0xff]   ;;  %v6684_v0 = vld [vmem:[#allocation7 + $0x338] ss:$80 sps:$4 sm:$0xff]  }
 0x1bb   : > { %v1834_v3 = vadd.f32 %v5992_v62, %v1794_v1  ;;  %v6686_v62 = vld [vmem:[#allocation7 + $0x33c] ss:$80 sps:$4 sm:$0xff]   ;;  %v6689_v1 = vld [vmem:[#allocation7 + $0x3d4] ss:$80 sps:$4 sm:$0xff]  }
 0x1bc   : > { %v6692_v2 = vld [vmem:[#allocation7 + $0x3dc] ss:$80 sps:$4 sm:$0xff]  }
 0x1d5   : > { %v6012_v4 = vpop.f32.mrb[8].mxu0 }
 0x1d6   : > { %v6034_v5 = vpop.f32.mrb[8].mxu1  ;;  %v6013_v6 = vpop.f32.mrb[9].mxu0 }
 0x1d7   : > { %v6014_v7 = vadd.f32 %v6013_v6, %v6012_v4  ;;  %v6035_v8 = vpop.f32.mrb[9].mxu1  ;;  %v6015_v9 = vpop.f32.mrb[10].mxu0  ;;  %v6690_v4 = vld [vmem:[#allocation7 + $0x3d8] ss:$80 sps:$4 sm:$0xff]   ;;  %v6698_v6 = vld [vmem:[#allocation7 + $0x47c] ss:$80 sps:$4 sm:$0xff]  }
 0x1d8   : > { %v6036_v10 = vadd.f32 %v6035_v8, %v6034_v5  ;;  %v6037_v11 = vpop.f32.mrb[10].mxu1  ;;  %v6016_v12 = vpop.f32.mrb[11].mxu0  ;;  %v6695_v5 = vld [vmem:[#allocation7 + $0x474] ss:$80 sps:$4 sm:$0xff]   ;;  %v6696_v8 = vld [vmem:[#allocation7 + $0x478] ss:$80 sps:$4 sm:$0xff]  }
 0x1d9   : > { %v1874_v13 = vadd.f32 %v6014_v7, %v1834_v3  ;;  %v6038_v14 = vpop.f32.mrb[11].mxu1  ;;  %v6687_v3 = vld [vmem:[#allocation7 + $0x3d0] ss:$80 sps:$4 sm:$0xff]   ;;  %v6701_v9 = vld [vmem:[#allocation7 + $0x24] ss:$80 sps:$4 sm:$0xff]  }
 0x1da   : > { %v6693_v7 = vld [vmem:[#allocation7 + $0x470] ss:$80 sps:$4 sm:$0xff]   ;;  %v6702_v12 = vld [vmem:[#allocation7 + $0x28] ss:$80 sps:$4 sm:$0xff]   ;;  %v6710_v14 = vld [vmem:[#allocation7 + $0xcc] ss:$80 sps:$4 sm:$0xff]  }
 0x1db   : > { %v1914_v15 = vadd.f32 %v6036_v10, %v1874_v13  ;;  %v6704_v10 = vld [vmem:[#allocation7 + $0x2c] ss:$80 sps:$4 sm:$0xff]   ;;  %v6699_v11 = vld [vmem:[#allocation7 + $0x20] ss:$80 sps:$4 sm:$0xff]   ;;  %v6707_v13 = vld [vmem:[#allocation7 + $0xc4] ss:$80 sps:$4 sm:$0xff]  }
 0x1f5   : > { %v6056_v16 = vpop.f32.mrb[12].mxu0 }
 0x1f6   : > { %v6078_v17 = vpop.f32.mrb[12].mxu1  ;;  %v6057_v18 = vpop.f32.mrb[13].mxu0 }
 0x1f7   : > { %v6079_v19 = vpop.f32.mrb[13].mxu1  ;;  %v6058_v20 = vadd.f32 %v6057_v18, %v6056_v16  ;;  %v6059_v22 = vpop.f32.mrb[14].mxu0  ;;  %v6708_v16 = vld [vmem:[#allocation7 + $0xc8] ss:$80 sps:$4 sm:$0xff]   ;;  %v6716_v18 = vld [vmem:[#allocation7 + $0x16c] ss:$80 sps:$4 sm:$0xff]  }
 0x1f8   : > { %v6080_v21 = vadd.f32 %v6079_v19, %v6078_v17  ;;  %v6081_v23 = vpop.f32.mrb[14].mxu1  ;;  %v6060_v24 = vpop.f32.mrb[15].mxu0  ;;  %v6713_v17 = vld [vmem:[#allocation7 + $0x164] ss:$80 sps:$4 sm:$0xff]   ;;  %v6711_v19 = vld [vmem:[#allocation7 + $0x160] ss:$80 sps:$4 sm:$0xff]  }
 0x1f9   : > { %v6082_v25 = vpop.f32.mrb[15].mxu1  ;;  %v1954_v26 = vadd.f32 %v6058_v20, %v1914_v15  ;;  %v6705_v15 = vld [vmem:[#allocation7 + $0xc0] ss:$80 sps:$4 sm:$0xff]   ;;  %v6714_v20 = vld [vmem:[#allocation7 + $0x168] ss:$80 sps:$4 sm:$0xff]  }
 0x1fa   : > { %v6722_v22 = vld [vmem:[#allocation7 + $0x20c] ss:$80 sps:$4 sm:$0xff]   ;;  %v6717_v23 = vld [vmem:[#allocation7 + $0x200] ss:$80 sps:$4 sm:$0xff]   ;;  %v6720_v24 = vld [vmem:[#allocation7 + $0x208] ss:$80 sps:$4 sm:$0xff]  }
 0x1fb   : > { %v1994_v27 = vadd.f32 %v6080_v21, %v1954_v26  ;;  %v6719_v21 = vld [vmem:[#allocation7 + $0x204] ss:$80 sps:$4 sm:$0xff]   ;;  %v6728_v26 = vld [vmem:[#allocation7 + $0x2ac] ss:$80 sps:$4 sm:$0xff]  }
 0x1fc   : > { %v6725_v25 = vld [vmem:[#allocation7 + $0x2a4] ss:$80 sps:$4 sm:$0xff]  }
 0x215   : > { %v6100_v28 = vpop.f32.mrb[16].mxu0 }
 0x216   : > { %v6122_v29 = vpop.f32.mrb[16].mxu1  ;;  %v6101_v30 = vpop.f32.mrb[17].mxu0 }
 0x217   : > { %v6102_v31 = vadd.f32 %v6101_v30, %v6100_v28  ;;  %v6123_v32 = vpop.f32.mrb[17].mxu1  ;;  %v6103_v33 = vpop.f32.mrb[18].mxu0  ;;  %v6726_v28 = vld [vmem:[#allocation7 + $0x2a8] ss:$80 sps:$4 sm:$0xff]   ;;  %v6734_v30 = vld [vmem:[#allocation7 + $0x34c] ss:$80 sps:$4 sm:$0xff]  }
 0x218   : > { %v6124_v34 = vadd.f32 %v6123_v32, %v6122_v29  ;;  %v6125_v35 = vpop.f32.mrb[18].mxu1  ;;  %v6104_v36 = vpop.f32.mrb[19].mxu0  ;;  %v6731_v29 = vld [vmem:[#allocation7 + $0x344] ss:$80 sps:$4 sm:$0xff]   ;;  %v6732_v32 = vld [vmem:[#allocation7 + $0x348] ss:$80 sps:$4 sm:$0xff]  }
 0x219   : > { %v2034_v37 = vadd.f32 %v6102_v31, %v1994_v27  ;;  %v6126_v38 = vpop.f32.mrb[19].mxu1  ;;  %v6723_v27 = vld [vmem:[#allocation7 + $0x2a0] ss:$80 sps:$4 sm:$0xff]   ;;  %v6737_v33 = vld [vmem:[#allocation7 + $0x3e4] ss:$80 sps:$4 sm:$0xff]  }
 0x21a   : > { %v6729_v31 = vld [vmem:[#allocation7 + $0x340] ss:$80 sps:$4 sm:$0xff]   ;;  %v6738_v36 = vld [vmem:[#allocation7 + $0x3e8] ss:$80 sps:$4 sm:$0xff]   ;;  %v6746_v38 = vld [vmem:[#allocation7 + $0x48c] ss:$80 sps:$4 sm:$0xff]  }
 0x21b   : > { %v2074_v39 = vadd.f32 %v6124_v34, %v2034_v37  ;;  %v6740_v34 = vld [vmem:[#allocation7 + $0x3ec] ss:$80 sps:$4 sm:$0xff]   ;;  %v6735_v35 = vld [vmem:[#allocation7 + $0x3e0] ss:$80 sps:$4 sm:$0xff]   ;;  %v6743_v37 = vld [vmem:[#allocation7 + $0x484] ss:$80 sps:$4 sm:$0xff]  }
 0x21d   : > { %v2079_v40 = vmax.f32 %v2074_v39, 0.0  ;;  %v6741_v39 = vld [vmem:[#allocation7 + $0x480] ss:$80 sps:$4 sm:$0xff]  }
 0x21f   : > { %v7531_v43 = vpack.c.bf16 %v2079_v40, %v2079_v40  ;;  %v6744_v40 = vld [vmem:[#allocation7 + $0x488] ss:$80 sps:$4 sm:$0xff]  }
 0x221   : > { %3180 = vmatmul.mubr.bf16.vlgmr.msra.gmra.mrb[20].mxu0 %v7531_v43  ;;  %3221 = vmatmul.mubr.bf16.vlgmr.msra.gmra.mrb[20].mxu1 %v7531_v43 }
 0x222   : > { %3230 = vmatpush1.bf16.msra.mxu0 %v6651_v41  ;;  %3271 = vmatpush1.bf16.msra.mxu1 %v6654_v42  ;;  %v6749_v41 = vld [vmem:[#allocation7 + $0x34] ss:$80 sps:$4 sm:$0xff]   ;;  %v6752_v42 = vld [vmem:[#allocation7 + $0x3c] ss:$80 sps:$4 sm:$0xff]  }
 0x223   : > { %3231 = vmatprep.subr.bf16.mxu0 %v6659_v44  ;;  %3272 = vmatprep.subr.bf16.mxu1 %v6662_v45  ;;  %v6747_v44 = vld [vmem:[#allocation7 + $0x30] ss:$80 sps:$4 sm:$0xff]   ;;  %v6750_v45 = vld [vmem:[#allocation7 + $0x38] ss:$80 sps:$4 sm:$0xff]  }
 0x224   : > { %3261 = vmatprep.mubr.bf16.mxu0 %v7230_v54  ;;  %3302 = vmatprep.mubr.bf16.mxu1 %v7230_v54 }
 0x226   : > { %3232 = vmatpush1.bf16.msra.mxu0 %v6657_v46  ;;  %3273 = vmatpush1.bf16.msra.mxu1 %v6660_v47  ;;  %v6755_v46 = vld [vmem:[#allocation7 + $0xd4] ss:$80 sps:$4 sm:$0xff]   ;;  %v6758_v47 = vld [vmem:[#allocation7 + $0xdc] ss:$80 sps:$4 sm:$0xff]  }
 0x227   : > { %3233 = vmatprep.subr.bf16.mxu0 %v6665_v48  ;;  %3274 = vmatprep.subr.bf16.mxu1 %v6668_v49  ;;  %v6753_v48 = vld [vmem:[#allocation7 + $0xd0] ss:$80 sps:$4 sm:$0xff]   ;;  %v6756_v49 = vld [vmem:[#allocation7 + $0xd8] ss:$80 sps:$4 sm:$0xff]  }
 0x22a   : > { %3234 = vmatpush1.bf16.msra.mxu0 %v6663_v50  ;;  %3275 = vmatpush1.bf16.msra.mxu1 %v6666_v51  ;;  %v6761_v50 = vld [vmem:[#allocation7 + $0x174] ss:$80 sps:$4 sm:$0xff]   ;;  %v6764_v51 = vld [vmem:[#allocation7 + $0x17c] ss:$80 sps:$4 sm:$0xff]  }
 0x22b   : > { %3235 = vmatprep.subr.bf16.mxu0 %v6671_v52  ;;  %3276 = vmatprep.subr.bf16.mxu1 %v6674_v53  ;;  %v6759_v52 = vld [vmem:[#allocation7 + $0x170] ss:$80 sps:$4 sm:$0xff]   ;;  %v6762_v53 = vld [vmem:[#allocation7 + $0x178] ss:$80 sps:$4 sm:$0xff]  }
 0x22e   : > { %3236 = vmatpush1.bf16.msra.mxu0 %v6669_v55  ;;  %3277 = vmatpush1.bf16.msra.mxu1 %v6672_v56  ;;  %v6767_v55 = vld [vmem:[#allocation7 + $0x214] ss:$80 sps:$4 sm:$0xff]   ;;  %v6770_v56 = vld [vmem:[#allocation7 + $0x21c] ss:$80 sps:$4 sm:$0xff]  }
 0x22f   : > { %3237 = vmatprep.subr.bf16.mxu0 %v6677_v57  ;;  %3278 = vmatprep.subr.bf16.mxu1 %v6680_v58  ;;  %v6765_v57 = vld [vmem:[#allocation7 + $0x210] ss:$80 sps:$4 sm:$0xff]   ;;  %v6768_v58 = vld [vmem:[#allocation7 + $0x218] ss:$80 sps:$4 sm:$0xff]  }
 0x232   : > { %3238 = vmatpush1.bf16.msra.mxu0 %v6675_v59  ;;  %3279 = vmatpush1.bf16.msra.mxu1 %v6678_v60  ;;  %v6773_v59 = vld [vmem:[#allocation7 + $0x2b4] ss:$80 sps:$4 sm:$0xff]   ;;  %v6776_v60 = vld [vmem:[#allocation7 + $0x2bc] ss:$80 sps:$4 sm:$0xff]  }
 0x233   : > { %3239 = vmatprep.subr.bf16.mxu0 %v6683_v61  ;;  %3280 = vmatprep.subr.bf16.mxu1 %v6686_v62  ;;  %v6771_v61 = vld [vmem:[#allocation7 + $0x2b0] ss:$80 sps:$4 sm:$0xff]   ;;  %v6774_v62 = vld [vmem:[#allocation7 + $0x2b8] ss:$80 sps:$4 sm:$0xff]  }
 0x236   : > { %3240 = vmatpush1.bf16.msra.mxu0 %v6681_v63  ;;  %3281 = vmatpush1.bf16.msra.mxu1 %v6684_v0  ;;  %v6779_v63 = vld [vmem:[#allocation7 + $0x354] ss:$80 sps:$4 sm:$0xff]   ;;  %v6782_v0 = vld [vmem:[#allocation7 + $0x35c] ss:$80 sps:$4 sm:$0xff]  }
 0x237   : > { %3241 = vmatprep.subr.bf16.mxu0 %v6689_v1  ;;  %3282 = vmatprep.subr.bf16.mxu1 %v6692_v2  ;;  %v6777_v1 = vld [vmem:[#allocation7 + $0x350] ss:$80 sps:$4 sm:$0xff]   ;;  %v6780_v2 = vld [vmem:[#allocation7 + $0x358] ss:$80 sps:$4 sm:$0xff]  }
 0x23a   : > { %3242 = vmatpush1.bf16.msra.mxu0 %v6687_v3  ;;  %3283 = vmatpush1.bf16.msra.mxu1 %v6690_v4  ;;  %v6785_v3 = vld [vmem:[#allocation7 + $0x3f4] ss:$80 sps:$4 sm:$0xff]   ;;  %v6788_v4 = vld [vmem:[#allocation7 + $0x3fc] ss:$80 sps:$4 sm:$0xff]  }
 0x23b   : > { %3243 = vmatprep.subr.bf16.mxu0 %v6695_v5  ;;  %3284 = vmatprep.subr.bf16.mxu1 %v6698_v6  ;;  %v6783_v5 = vld [vmem:[#allocation7 + $0x3f0] ss:$80 sps:$4 sm:$0xff]   ;;  %v6786_v6 = vld [vmem:[#allocation7 + $0x3f8] ss:$80 sps:$4 sm:$0xff]  }
 0x23e   : > { %3244 = vmatpush1.bf16.msra.mxu0 %v6693_v7  ;;  %3285 = vmatpush1.bf16.msra.mxu1 %v6696_v8  ;;  %v6791_v7 = vld [vmem:[#allocation7 + $0x494] ss:$80 sps:$4 sm:$0xff]   ;;  %v6794_v8 = vld [vmem:[#allocation7 + $0x49c] ss:$80 sps:$4 sm:$0xff]  }
 0x23f   : > { %3311 = vmatprep.subr.bf16.mxu0 %v6701_v9  ;;  %3352 = vmatprep.subr.bf16.mxu1 %v6704_v10  ;;  %v6789_v9 = vld [vmem:[#allocation7 + $0x490] ss:$80 sps:$4 sm:$0xff]   ;;  %v6792_v10 = vld [vmem:[#allocation7 + $0x498] ss:$80 sps:$4 sm:$0xff]  }
 0x241   : > { %3262 = vmatmul.mubr.bf16.vlgmr.msra.gmra.mrb[24].mxu0 %v7531_v43  ;;  %3303 = vmatmul.mubr.bf16.vlgmr.msra.gmra.mrb[24].mxu1 %v7531_v43 }
 0x242   : > { %3312 = vmatpush1.bf16.msra.mxu0 %v6699_v11  ;;  %3353 = vmatpush1.bf16.msra.mxu1 %v6702_v12  ;;  %v6797_v11 = vld [vmem:[#allocation7 + $0x44] ss:$80 sps:$4 sm:$0xff]   ;;  %v6800_v12 = vld [vmem:[#allocation7 + $0x4c] ss:$80 sps:$4 sm:$0xff]  }
 0x243   : > { %3313 = vmatprep.subr.bf16.mxu0 %v6707_v13  ;;  %3354 = vmatprep.subr.bf16.mxu1 %v6710_v14  ;;  %v6795_v13 = vld [vmem:[#allocation7 + $0x40] ss:$80 sps:$4 sm:$0xff]   ;;  %v6798_v14 = vld [vmem:[#allocation7 + $0x48] ss:$80 sps:$4 sm:$0xff]  }
 0x244   : > { %3343 = vmatprep.mubr.bf16.mxu0 %v7230_v54  ;;  %3384 = vmatprep.mubr.bf16.mxu1 %v7230_v54 }
 0x246   : > { %3314 = vmatpush1.bf16.msra.mxu0 %v6705_v15  ;;  %3355 = vmatpush1.bf16.msra.mxu1 %v6708_v16  ;;  %v6803_v15 = vld [vmem:[#allocation7 + $0xe4] ss:$80 sps:$4 sm:$0xff]   ;;  %v6806_v16 = vld [vmem:[#allocation7 + $0xec] ss:$80 sps:$4 sm:$0xff]  }
 0x247   : > { %3315 = vmatprep.subr.bf16.mxu0 %v6713_v17  ;;  %3356 = vmatprep.subr.bf16.mxu1 %v6716_v18  ;;  %v6801_v17 = vld [vmem:[#allocation7 + $0xe0] ss:$80 sps:$4 sm:$0xff]   ;;  %v6804_v18 = vld [vmem:[#allocation7 + $0xe8] ss:$80 sps:$4 sm:$0xff]  }
 0x24a   : > { %3316 = vmatpush1.bf16.msra.mxu0 %v6711_v19  ;;  %3357 = vmatpush1.bf16.msra.mxu1 %v6714_v20  ;;  %v6809_v19 = vld [vmem:[#allocation7 + $0x184] ss:$80 sps:$4 sm:$0xff]   ;;  %v6812_v20 = vld [vmem:[#allocation7 + $0x18c] ss:$80 sps:$4 sm:$0xff]  }
 0x24b   : > { %3317 = vmatprep.subr.bf16.mxu0 %v6719_v21  ;;  %3358 = vmatprep.subr.bf16.mxu1 %v6722_v22  ;;  %v6807_v21 = vld [vmem:[#allocation7 + $0x180] ss:$80 sps:$4 sm:$0xff]   ;;  %v6810_v22 = vld [vmem:[#allocation7 + $0x188] ss:$80 sps:$4 sm:$0xff]  }
 0x24e   : > { %3318 = vmatpush1.bf16.msra.mxu0 %v6717_v23  ;;  %3359 = vmatpush1.bf16.msra.mxu1 %v6720_v24  ;;  %v6815_v23 = vld [vmem:[#allocation7 + $0x224] ss:$80 sps:$4 sm:$0xff]   ;;  %v6818_v24 = vld [vmem:[#allocation7 + $0x22c] ss:$80 sps:$4 sm:$0xff]  }
 0x24f   : > { %3319 = vmatprep.subr.bf16.mxu0 %v6725_v25  ;;  %3360 = vmatprep.subr.bf16.mxu1 %v6728_v26  ;;  %v6813_v25 = vld [vmem:[#allocation7 + $0x220] ss:$80 sps:$4 sm:$0xff]   ;;  %v6816_v26 = vld [vmem:[#allocation7 + $0x228] ss:$80 sps:$4 sm:$0xff]  }
 0x252   : > { %3320 = vmatpush1.bf16.msra.mxu0 %v6723_v27  ;;  %3361 = vmatpush1.bf16.msra.mxu1 %v6726_v28  ;;  %v6821_v27 = vld [vmem:[#allocation7 + $0x2c4] ss:$80 sps:$4 sm:$0xff]   ;;  %v6824_v28 = vld [vmem:[#allocation7 + $0x2cc] ss:$80 sps:$4 sm:$0xff]  }
 0x253   : > { %3321 = vmatprep.subr.bf16.mxu0 %v6731_v29  ;;  %3362 = vmatprep.subr.bf16.mxu1 %v6734_v30  ;;  %v6819_v29 = vld [vmem:[#allocation7 + $0x2c0] ss:$80 sps:$4 sm:$0xff]   ;;  %v6827_v30 = vld [vmem:[#allocation7 + $0x364] ss:$80 sps:$4 sm:$0xff]  }
 0x256   : > { %3322 = vmatpush1.bf16.msra.mxu0 %v6729_v31  ;;  %3363 = vmatpush1.bf16.msra.mxu1 %v6732_v32  ;;  %v6830_v31 = vld [vmem:[#allocation7 + $0x36c] ss:$80 sps:$4 sm:$0xff]   ;;  %v6825_v32 = vld [vmem:[#allocation7 + $0x360] ss:$80 sps:$4 sm:$0xff]  }
 0x257   : > { %3323 = vmatprep.subr.bf16.mxu0 %v6737_v33  ;;  %3364 = vmatprep.subr.bf16.mxu1 %v6740_v34  ;;  %v6828_v33 = vld [vmem:[#allocation7 + $0x368] ss:$80 sps:$4 sm:$0xff]   ;;  %v6833_v34 = vld [vmem:[#allocation7 + $0x404] ss:$80 sps:$4 sm:$0xff]  }
 0x25a   : > { %3324 = vmatpush1.bf16.msra.mxu0 %v6735_v35  ;;  %3365 = vmatpush1.bf16.msra.mxu1 %v6738_v36  ;;  %v6836_v35 = vld [vmem:[#allocation7 + $0x40c] ss:$80 sps:$4 sm:$0xff]   ;;  %v6831_v36 = vld [vmem:[#allocation7 + $0x400] ss:$80 sps:$4 sm:$0xff]  }
 0x25b   : > { %3325 = vmatprep.subr.bf16.mxu0 %v6743_v37  ;;  %3366 = vmatprep.subr.bf16.mxu1 %v6746_v38  ;;  %v6834_v37 = vld [vmem:[#allocation7 + $0x408] ss:$80 sps:$4 sm:$0xff]   ;;  %v6839_v38 = vld [vmem:[#allocation7 + $0x4a4] ss:$80 sps:$4 sm:$0xff]  }
 0x25e   : > { %3326 = vmatpush1.bf16.msra.mxu0 %v6741_v39  ;;  %3367 = vmatpush1.bf16.msra.mxu1 %v6744_v40  ;;  %v6842_v39 = vld [vmem:[#allocation7 + $0x4ac] ss:$80 sps:$4 sm:$0xff]   ;;  %v6837_v40 = vld [vmem:[#allocation7 + $0x4a0] ss:$80 sps:$4 sm:$0xff]  }
 0x25f   : > { %3393 = vmatprep.subr.bf16.mxu0 %v6749_v41  ;;  %3434 = vmatprep.subr.bf16.mxu1 %v6752_v42  ;;  %v6840_v41 = vld [vmem:[#allocation7 + $0x4a8] ss:$80 sps:$4 sm:$0xff]  }
 0x260   : > { %v6843_v42 = vld [vmem:[#allocation10 + $0x40] sm:$0xff]  }
 0x261   : > { %3344 = vmatmul.mubr.bf16.vlgmr.msra.gmra.mrb[28].mxu0 %v7531_v43  ;;  %3385 = vmatmul.mubr.bf16.vlgmr.msra.gmra.mrb[28].mxu1 %v7531_v43 }
 0x262   : > { %3394 = vmatpush1.bf16.msra.mxu0 %v6747_v44  ;;  %3435 = vmatpush1.bf16.msra.mxu1 %v6750_v45  ;;  %v6844_v44 = vld [vmem:[#allocation10 + $0xc0] sm:$0xff]  }
 0x263   : > { %3395 = vmatprep.subr.bf16.mxu0 %v6755_v46  ;;  %3436 = vmatprep.subr.bf16.mxu1 %v6758_v47  ;;  %v6845_v45 = vld [vmem:[#allocation10] sm:$0xff]   ;;  %v6847_v47 = vld [vmem:[#allocation10 + $0x48] sm:$0xff]  }
 0x264   : > { %3425 = vmatprep.mubr.bf16.mxu0 %v7230_v54  ;;  %3466 = vmatprep.mubr.bf16.mxu1 %v7230_v54  ;;  %v6846_v46 = vld [vmem:[#allocation10 + $0x80] sm:$0xff]  }
 0x266   : > { %3396 = vmatpush1.bf16.msra.mxu0 %v6753_v48  ;;  %3437 = vmatpush1.bf16.msra.mxu1 %v6756_v49  ;;  %v6848_v48 = vld [vmem:[#allocation10 + $0xc8] sm:$0xff]  }
 0x267   : > { %3397 = vmatprep.subr.bf16.mxu0 %v6761_v50  ;;  %3438 = vmatprep.subr.bf16.mxu1 %v6764_v51  ;;  %v6849_v49 = vld [vmem:[#allocation10 + $0x8] sm:$0xff]   ;;  %v6851_v51 = vld [vmem:[#allocation10 + $0x50] sm:$0xff]  }
 0x268   : > { %v6850_v50 = vld [vmem:[#allocation10 + $0x88] sm:$0xff]  }
 0x26a   : > { %3398 = vmatpush1.bf16.msra.mxu0 %v6759_v52  ;;  %3439 = vmatpush1.bf16.msra.mxu1 %v6762_v53  ;;  %v6852_v52 = vld [vmem:[#allocation10 + $0xd0] sm:$0xff]  }
 0x26b   : > { %3399 = vmatprep.subr.bf16.mxu0 %v6767_v55  ;;  %3440 = vmatprep.subr.bf16.mxu1 %v6770_v56  ;;  %v6853_v53 = vld [vmem:[#allocation10 + $0x10] sm:$0xff]   ;;  %v6855_v56 = vld [vmem:[#allocation10 + $0x58] sm:$0xff]  }
 0x26c   : > { %v6854_v55 = vld [vmem:[#allocation10 + $0x90] sm:$0xff]  }
 0x26e   : > { %3400 = vmatpush1.bf16.msra.mxu0 %v6765_v57  ;;  %3441 = vmatpush1.bf16.msra.mxu1 %v6768_v58  ;;  %v6856_v57 = vld [vmem:[#allocation10 + $0xd8] sm:$0xff]  }
 0x26f   : > { %3401 = vmatprep.subr.bf16.mxu0 %v6773_v59  ;;  %3442 = vmatprep.subr.bf16.mxu1 %v6776_v60  ;;  %v6857_v58 = vld [vmem:[#allocation10 + $0x18] sm:$0xff]   ;;  %v6859_v59 = vld [vmem:[#allocation10 + $0x60] sm:$0xff]  }
 0x270   : > { %v6860_v60 = vld [vmem:[#allocation10 + $0xe0] sm:$0xff]  }
 0x272   : > { %3402 = vmatpush1.bf16.msra.mxu0 %v6771_v61  ;;  %3443 = vmatpush1.bf16.msra.mxu1 %v6774_v62  ;;  %v6861_v61 = vld [vmem:[#allocation10 + $0x20] sm:$0xff]  }
 0x273   : > { %3403 = vmatprep.subr.bf16.mxu0 %v6779_v63  ;;  %3444 = vmatprep.subr.bf16.mxu1 %v6782_v0  ;;  %v6862_v62 = vld [vmem:[#allocation10 + $0xa0] sm:$0xff]   ;;  %v6863_v63 = vld [vmem:[#allocation10 + $0x68] sm:$0xff]  }
 0x274   : > { %v6864_v0 = vld [vmem:[#allocation10 + $0xe8] sm:$0xff]  }
 0x276   : > { %3404 = vmatpush1.bf16.msra.mxu0 %v6777_v1  ;;  %3445 = vmatpush1.bf16.msra.mxu1 %v6780_v2  ;;  %v6865_v1 = vld [vmem:[#allocation10 + $0x28] sm:$0xff]  }
 0x277   : > { %3405 = vmatprep.subr.bf16.mxu0 %v6785_v3  ;;  %3446 = vmatprep.subr.bf16.mxu1 %v6788_v4  ;;  %v6866_v2 = vld [vmem:[#allocation10 + $0xa8] sm:$0xff]   ;;  %v6867_v3 = vld [vmem:[#allocation10 + $0x70] sm:$0xff]  }
 0x278   : > { %v6868_v4 = vld [vmem:[#allocation10 + $0xf0] sm:$0xff]  }
 0x27a   : > { %3406 = vmatpush1.bf16.msra.mxu0 %v6783_v5  ;;  %3447 = vmatpush1.bf16.msra.mxu1 %v6786_v6  ;;  %v6869_v5 = vld [vmem:[#allocation10 + $0x30] sm:$0xff]  }
 0x27b   : > { %3407 = vmatprep.subr.bf16.mxu0 %v6791_v7  ;;  %3448 = vmatprep.subr.bf16.mxu1 %v6794_v8  ;;  %v6870_v6 = vld [vmem:[#allocation10 + $0xb0] sm:$0xff]   ;;  %v6871_v7 = vld [vmem:[#allocation10 + $0x78] sm:$0xff]  }
 0x27c   : > { %v6872_v8 = vld [vmem:[#allocation10 + $0xf8] sm:$0xff]  }
 0x27e   : > { %3408 = vmatpush1.bf16.msra.mxu0 %v6789_v9  ;;  %3449 = vmatpush1.bf16.msra.mxu1 %v6792_v10  ;;  %v6873_v9 = vld [vmem:[#allocation10 + $0x38] sm:$0xff]  }
 0x27f   : > { %3475 = vmatprep.subr.bf16.mxu0 %v6797_v11  ;;  %3516 = vmatprep.subr.bf16.mxu1 %v6800_v12  ;;  %v6874_v10 = vld [vmem:[#allocation10 + $0xb8] sm:$0xff]   ;;  %v6875_v11 = vld [vmem:[#allocation10 + $0x140] sm:$0xff]  }
 0x280   : > { %v6876_v12 = vld [vmem:[#allocation10 + $0x1c0] sm:$0xff]  }
 0x281   : > { %3426 = vmatmul.mubr.bf16.vlgmr.msra.gmra.mrb[32].mxu0 %v7531_v43  ;;  %3467 = vmatmul.mubr.bf16.vlgmr.msra.gmra.mrb[32].mxu1 %v7531_v43 }
 0x282   : > { %3476 = vmatpush1.bf16.msra.mxu0 %v6795_v13  ;;  %3517 = vmatpush1.bf16.msra.mxu1 %v6798_v14  ;;  %v2247_v13 = vlaneseq }
 0x283   : > { %3477 = vmatprep.subr.bf16.mxu0 %v6803_v15  ;;  %3518 = vmatprep.subr.bf16.mxu1 %v6806_v16 }
 0x284   : > { %3507 = vmatprep.mubr.bf16.mxu0 %v7230_v54  ;;  %3548 = vmatprep.mubr.bf16.mxu1 %v7230_v54  ;;  %v6822_v54 = vld [vmem:[#allocation7 + $0x2c8] ss:$80 sps:$4 sm:$0xff]   ;;  %v7551_v14 = vshrl.u32 %v2247_v13, 7 }
 0x285   : > { %v6902_v13 = vld [vmem:[#allocation10 + $0x1b0] sm:$0xff]  }
 0x286   : > { %3478 = vmatpush1.bf16.msra.mxu0 %v6801_v17  ;;  %3519 = vmatpush1.bf16.msra.mxu1 %v6804_v18  ;;  %v7554_v15 = vsub.s32 0, %v7551_v14  ;;  %v7557_v16 = vsub.s32 2, %v7551_v14  ;;  %v7559_v17 = vld [vmem:[#allocation8] sm:$0xff]  ;;  %v7562_v18 = vsub.s32 1, %v7551_v14 }
 0x287   : > { %3479 = vmatprep.subr.bf16.mxu0 %v6809_v19  ;;  %3520 = vmatprep.subr.bf16.mxu1 %v6812_v20  ;;  %v7565_v19 = vsub.s32 3, %v7551_v14 }
 0x288   : > { %v2250_v20 = vrot.slane %v7559_v17, %v7554_v15 }
 0x28a   : > { %3480 = vmatpush1.bf16.msra.mxu0 %v6807_v21  ;;  %3521 = vmatpush1.bf16.msra.mxu1 %v6810_v22  ;;  %v2258_v21 = vrot.slane %v7559_v17, %v7557_v16  ;;  %v2254_v22 = vrot.slane %v7559_v17, %v7562_v18 }
 0x28b   : > { %3481 = vmatprep.subr.bf16.mxu0 %v6815_v23  ;;  %3522 = vmatprep.subr.bf16.mxu1 %v6818_v24  ;;  %v2262_v23 = vrot.slane %v7559_v17, %v7565_v19 }
 0x28e   : > { %3482 = vmatpush1.bf16.msra.mxu0 %v6813_v25  ;;  %3523 = vmatpush1.bf16.msra.mxu1 %v6816_v26 }
 0x28f   : > { %3483 = vmatprep.subr.bf16.mxu0 %v6821_v27  ;;  %3524 = vmatprep.subr.bf16.mxu1 %v6824_v28 }
 0x292   : > { %3484 = vmatpush1.bf16.msra.mxu0 %v6819_v29  ;;  %3525 = vmatpush1.bf16.msra.mxu1 %v6822_v54 }
 0x293   : > { %3485 = vmatprep.subr.bf16.mxu0 %v6827_v30  ;;  %3526 = vmatprep.subr.bf16.mxu1 %v6830_v31 }
 0x296   : > { %3486 = vmatpush1.bf16.msra.mxu0 %v6825_v32  ;;  %3527 = vmatpush1.bf16.msra.mxu1 %v6828_v33 }
 0x297   : > { %3487 = vmatprep.subr.bf16.mxu0 %v6833_v34  ;;  %3528 = vmatprep.subr.bf16.mxu1 %v6836_v35 }
 0x29a   : > { %3488 = vmatpush1.bf16.msra.mxu0 %v6831_v36  ;;  %3529 = vmatpush1.bf16.msra.mxu1 %v6834_v37 }
 0x29b   : > { %3489 = vmatprep.subr.bf16.mxu0 %v6839_v38  ;;  %3530 = vmatprep.subr.bf16.mxu1 %v6842_v39 }
 0x29e   : > { %3490 = vmatpush1.bf16.msra.mxu0 %v6837_v40  ;;  %3531 = vmatpush1.bf16.msra.mxu1 %v6840_v41  ;;  %v6877_v41 = vld [vmem:[#allocation10 + $0x100] sm:$0xff]  }
 0x29f   : > { %6128 = vmatprep.subr.bf16.mxu0 %v6843_v42  ;;  %6150 = vmatprep.subr.bf16.mxu1 %v6844_v44  ;;  %v6878_v42 = vld [vmem:[#allocation10 + $0x180] sm:$0xff]  }
 0x2a1   : > { %3508 = vmatmul.mubr.bf16.vlgmr.msra.gmra.mrb[36].mxu0 %v7531_v43  ;;  %3549 = vmatmul.mubr.bf16.vlgmr.msra.gmra.mrb[36].mxu1 %v7531_v43  ;;  %v6858_v43 = vld [vmem:[#allocation10 + $0x98] sm:$0xff]  }
 0x2a2   : > { %6129 = vmatpush3.bf16.msra.mxu0 %v6845_v45  ;;  %6151 = vmatpush3.bf16.msra.mxu1 %v6846_v46  ;;  %v6879_v46 = vld [vmem:[#allocation10 + $0x148] sm:$0xff]  }
 0x2a3   : > { %6130 = vmatprep.subr.bf16.mxu0 %v6847_v47  ;;  %6152 = vmatprep.subr.bf16.mxu1 %v6848_v48  ;;  %v6880_v47 = vld [vmem:[#allocation10 + $0x1c8] sm:$0xff]  }
 0x2a4   : > { %v6881_v48 = vld [vmem:[#allocation10 + $0x108] sm:$0xff]  }
 0x2a6   : > { %6131 = vmatpush3.bf16.msra.mxu0 %v6849_v49  ;;  %6153 = vmatpush3.bf16.msra.mxu1 %v6850_v50  ;;  %v6882_v49 = vld [vmem:[#allocation10 + $0x188] sm:$0xff]   ;;  %v6883_v50 = vld [vmem:[#allocation10 + $0x150] sm:$0xff]  }
 0x2a7   : > { %6132 = vmatprep.subr.bf16.mxu0 %v6851_v51  ;;  %6154 = vmatprep.subr.bf16.mxu1 %v6852_v52  ;;  %v6884_v51 = vld [vmem:[#allocation10 + $0x1d0] sm:$0xff]  }
 0x2a8   : > { %v6885_v52 = vld [vmem:[#allocation10 + $0x110] sm:$0xff]  }
 0x2aa   : > { %6133 = vmatpush3.bf16.msra.mxu0 %v6853_v53  ;;  %6155 = vmatpush3.bf16.msra.mxu1 %v6854_v55  ;;  %v6886_v53 = vld [vmem:[#allocation10 + $0x190] sm:$0xff]   ;;  %v6887_v55 = vld [vmem:[#allocation10 + $0x158] sm:$0xff]  }
 0x2ab   : > { %6134 = vmatprep.subr.bf16.mxu0 %v6855_v56  ;;  %6156 = vmatprep.subr.bf16.mxu1 %v6856_v57  ;;  %v6888_v56 = vld [vmem:[#allocation10 + $0x1d8] sm:$0xff]  }
 0x2ac   : > { %v6889_v57 = vld [vmem:[#allocation10 + $0x118] sm:$0xff]  }
 0x2ae   : > { %6135 = vmatpush3.bf16.msra.mxu0 %v6857_v58  ;;  %6157 = vmatpush3.bf16.msra.mxu1 %v6858_v43  ;;  %v6890_v58 = vld [vmem:[#allocation10 + $0x198] sm:$0xff]   ;;  %v6891_v43 = vld [vmem:[#allocation10 + $0x160] sm:$0xff]  }
 0x2af   : > { %6136 = vmatprep.subr.bf16.mxu0 %v6859_v59  ;;  %6158 = vmatprep.subr.bf16.mxu1 %v6860_v60  ;;  %v6892_v59 = vld [vmem:[#allocation10 + $0x1e0] sm:$0xff]  }
 0x2b0   : > { %v6893_v60 = vld [vmem:[#allocation10 + $0x120] sm:$0xff]  }
 0x2b2   : > { %6137 = vmatpush3.bf16.msra.mxu0 %v6861_v61  ;;  %6159 = vmatpush3.bf16.msra.mxu1 %v6862_v62  ;;  %v6894_v61 = vld [vmem:[#allocation10 + $0x1a0] sm:$0xff]   ;;  %v6895_v62 = vld [vmem:[#allocation10 + $0x168] sm:$0xff]  }
 0x2b3   : > { %6138 = vmatprep.subr.bf16.mxu0 %v6863_v63  ;;  %6160 = vmatprep.subr.bf16.mxu1 %v6864_v0  ;;  %v6896_v63 = vld [vmem:[#allocation10 + $0x1e8] sm:$0xff]   ;;  %v2265_v0 = vsub.s32 4, %v7551_v14 }
 0x2b6   : > { %6139 = vmatpush3.bf16.msra.mxu0 %v6865_v1  ;;  %6161 = vmatpush3.bf16.msra.mxu1 %v6866_v2  ;;  %v2273_v1 = vsub.s32 6, %v7551_v14  ;;  %v6897_v2 = vld [vmem:[#allocation10 + $0x128] sm:$0xff]  }
 0x2b7   : > { %6140 = vmatprep.subr.bf16.mxu0 %v6867_v3  ;;  %6162 = vmatprep.subr.bf16.mxu1 %v6868_v4  ;;  %v6898_v3 = vld [vmem:[#allocation10 + $0x1a8] sm:$0xff]   ;;  %v2269_v4 = vsub.s32 5, %v7551_v14 }
 0x2ba   : > { %6141 = vmatpush3.bf16.msra.mxu0 %v6869_v5  ;;  %6163 = vmatpush3.bf16.msra.mxu1 %v6870_v6  ;;  %v2277_v5 = vsub.s32 7, %v7551_v14  ;;  %v6899_v6 = vld [vmem:[#allocation10 + $0x170] sm:$0xff]   ;;  %v6969_v14 = vld [vmem:[#allocation10 + $0x338] sm:$0xff]  }
 0x2bb   : > { %6142 = vmatprep.subr.bf16.mxu0 %v6871_v7  ;;  %6164 = vmatprep.subr.bf16.mxu1 %v6872_v8  ;;  %v6900_v7 = vld [vmem:[#allocation10 + $0x1f0] sm:$0xff]   ;;  %v2266_v8 = vrot.slane %v7559_v17, %v2265_v0 }
 0x2be   : > { %6143 = vmatpush3.bf16.msra.mxu0 %v6873_v9  ;;  %6165 = vmatpush3.bf16.msra.mxu1 %v6874_v10  ;;  %v2274_v9 = vrot.slane %v7559_v17, %v2273_v1  ;;  %v2270_v10 = vrot.slane %v7559_v17, %v2269_v4 }
 0x2bf   : > { %6172 = vmatprep.subr.bf16.mxu0 %v6875_v11  ;;  %6194 = vmatprep.subr.bf16.mxu1 %v6876_v12  ;;  %v2278_v11 = vrot.slane %v7559_v17, %v2277_v5  ;;  %v6901_v12 = vld [vmem:[#allocation10 + $0x130] sm:$0xff]   ;;  %v6906_v17 = vld [vmem:[#allocation10 + $0x1b8] sm:$0xff]  }
 0x2f4   : > { %v3181_v24 = vpop.f32.mrb[20].mxu0  ;;  %v3222_v25 = vpop.f32.mrb[20].mxu1 }
 0x2f5   : > { %v3182_v26 = vadd.f32 %v3181_v24, %v2250_v20  ;;  %v3223_v27 = vadd.f32 %v3222_v25, %v2258_v21  ;;  %v3183_v28 = vpop.f32.mrb[21].mxu0  ;;  %v3224_v29 = vpop.f32.mrb[21].mxu1  ;;  %v6903_v20 = vld [vmem:[#allocation10 + $0x178] sm:$0xff]  }
 0x2f6   : > { %v3184_v54 = vadd.f32 %v3183_v28, %v2254_v22  ;;  %v3225_v30 = vadd.f32 %v3224_v29, %v2262_v23  ;;  %v3185_v31 = vpop.f32.mrb[22].mxu0  ;;  %v3226_v32 = vpop.f32.mrb[22].mxu1  ;;  %v6904_v21 = vld [vmem:[#allocation10 + $0x1f8] sm:$0xff]  }
 0x2f7   : > { %v3557_v33 = vmax.f32 %v3182_v26, 0.0  ;;  %v3559_v34 = vmax.f32 %v3223_v27, 0.0  ;;  %v3186_v35 = vpop.f32.mrb[23].mxu0  ;;  %v3227_v36 = vpop.f32.mrb[23].mxu1  ;;  %v6905_v31 = vld [vmem:[#allocation10 + $0x138] sm:$0xff]  }
 0x2f8   : > { %v3558_v37 = vmax.f32 %v3184_v54, 0.0  ;;  %v3560_v38 = vmax.f32 %v3225_v30, 0.0  ;;  %v6907_v36 = vld [vmem:[#allocation10 + $0x240] sm:$0xff]  }
 0x2f9   : > { %v3577_v44 = vpack.c.bf16 %v3557_v33, %v3557_v33  ;;  %v3579_v45 = vpack.c.bf16 %v3559_v34, %v3559_v34 }
 0x2fa   : > { %v3578_v39 = vpack.c.bf16 %v3558_v37, %v3558_v37  ;;  %v3580_v40 = vpack.c.bf16 %v3560_v38, %v3560_v38  ;;  %v6908_v37 = vld [vmem:[#allocation10 + $0x2c0] sm:$0xff]  }
 0x2fc   : > { %4916 = vmatprep.mubr.bf16.mxu0 %v3578_v39  ;;  %4956 = vmatprep.mubr.bf16.mxu1 %v3580_v40 }
 0x2fd   : > { %4917 = vmatmul.mubr.bf16.vlgmr.msra.gmra.mrb[40].mxu0 %v3577_v44  ;;  %4957 = vmatmul.mubr.bf16.vlgmr.msra.gmra.mrb[40].mxu1 %v3579_v45  ;;  %v6910_v44 = vld [vmem:[#allocation10 + $0x280] sm:$0xff]  }
 0x2fe   : > { %6173 = vmatpush3.bf16.msra.mxu0 %v6877_v41  ;;  %6195 = vmatpush3.bf16.msra.mxu1 %v6878_v42  ;;  %v6909_v42 = vld [vmem:[#allocation10 + $0x200] sm:$0xff]  }
 0x2ff   : > { %6174 = vmatprep.subr.bf16.mxu0 %v6879_v46  ;;  %6196 = vmatprep.subr.bf16.mxu1 %v6880_v47  ;;  %v6911_v47 = vld [vmem:[#allocation10 + $0x248] sm:$0xff]  }
 0x302   : > { %6175 = vmatpush3.bf16.msra.mxu0 %v6881_v48  ;;  %6197 = vmatpush3.bf16.msra.mxu1 %v6882_v49  ;;  %v6912_v48 = vld [vmem:[#allocation10 + $0x2c8] sm:$0xff]  }
 0x303   : > { %6176 = vmatprep.subr.bf16.mxu0 %v6883_v50  ;;  %6198 = vmatprep.subr.bf16.mxu1 %v6884_v51  ;;  %v6913_v49 = vld [vmem:[#allocation10 + $0x208] sm:$0xff]   ;;  %v6915_v51 = vld [vmem:[#allocation10 + $0x250] sm:$0xff]  }
 0x304   : > { %v6914_v50 = vld [vmem:[#allocation10 + $0x288] sm:$0xff]  }
 0x306   : > { %6177 = vmatpush3.bf16.msra.mxu0 %v6885_v52  ;;  %6199 = vmatpush3.bf16.msra.mxu1 %v6886_v53  ;;  %v6916_v52 = vld [vmem:[#allocation10 + $0x2d0] sm:$0xff]  }
 0x307   : > { %6178 = vmatprep.subr.bf16.mxu0 %v6887_v55  ;;  %6200 = vmatprep.subr.bf16.mxu1 %v6888_v56  ;;  %v6917_v53 = vld [vmem:[#allocation10 + $0x210] sm:$0xff]   ;;  %v6919_v56 = vld [vmem:[#allocation10 + $0x258] sm:$0xff]  }
 0x308   : > { %v6918_v55 = vld [vmem:[#allocation10 + $0x290] sm:$0xff]  }
 0x30a   : > { %6179 = vmatpush3.bf16.msra.mxu0 %v6889_v57  ;;  %6201 = vmatpush3.bf16.msra.mxu1 %v6890_v58  ;;  %v6920_v57 = vld [vmem:[#allocation10 + $0x2d8] sm:$0xff]  }
 0x30b   : > { %6180 = vmatprep.subr.bf16.mxu0 %v6891_v43  ;;  %6202 = vmatprep.subr.bf16.mxu1 %v6892_v59  ;;  %v6921_v58 = vld [vmem:[#allocation10 + $0x218] sm:$0xff]   ;;  %v6923_v59 = vld [vmem:[#allocation10 + $0x260] sm:$0xff]  }
 0x30c   : > { %v6922_v43 = vld [vmem:[#allocation10 + $0x298] sm:$0xff]  }
 0x30e   : > { %6181 = vmatpush3.bf16.msra.mxu0 %v6893_v60  ;;  %6203 = vmatpush3.bf16.msra.mxu1 %v6894_v61  ;;  %v6924_v60 = vld [vmem:[#allocation10 + $0x2e0] sm:$0xff]  }
 0x30f   : > { %6182 = vmatprep.subr.bf16.mxu0 %v6895_v62  ;;  %6204 = vmatprep.subr.bf16.mxu1 %v6896_v63  ;;  %v6925_v61 = vld [vmem:[#allocation10 + $0x220] sm:$0xff]   ;;  %v6927_v63 = vld [vmem:[#allocation10 + $0x268] sm:$0xff]  }
 0x310   : > { %v6926_v62 = vld [vmem:[#allocation10 + $0x2a0] sm:$0xff]  }
 0x312   : > { %6183 = vmatpush3.bf16.msra.mxu0 %v6897_v2  ;;  %6205 = vmatpush3.bf16.msra.mxu1 %v6898_v3  ;;  %v6928_v2 = vld [vmem:[#allocation10 + $0x2e8] sm:$0xff]  }
 0x313   : > { %6184 = vmatprep.subr.bf16.mxu0 %v6899_v6  ;;  %6206 = vmatprep.subr.bf16.mxu1 %v6900_v7  ;;  %v6929_v3 = vld [vmem:[#allocation10 + $0x228] sm:$0xff]   ;;  %v7591_v7 = vld [vmem:[#allocation8 + $0x8] sm:$0xff] }
 0x314   : > { %v3263_v22 = vpop.f32.mrb[24].mxu0  ;;  %v3304_v23 = vpop.f32.mrb[24].mxu1  ;;  %v6930_v6 = vld [vmem:[#allocation10 + $0x2a8] sm:$0xff]  }
 0x315   : > { %v3264_v24 = vadd.f32 %v3263_v22, %v2266_v8  ;;  %v3305_v25 = vadd.f32 %v3304_v23, %v2274_v9  ;;  %v3265_v26 = vpop.f32.mrb[25].mxu0  ;;  %v3306_v27 = vpop.f32.mrb[25].mxu1  ;;  %v6931_v8 = vld [vmem:[#allocation10 + $0x270] sm:$0xff]   ;;  %v6935_v22 = vld [vmem:[#allocation10 + $0x278] sm:$0xff]  }
 0x316   : > { %v3266_v28 = vadd.f32 %v3265_v26, %v2270_v10  ;;  %v3307_v29 = vadd.f32 %v3306_v27, %v2278_v11  ;;  %v3267_v54 = vpop.f32.mrb[26].mxu0  ;;  %v3308_v30 = vpop.f32.mrb[26].mxu1  ;;  %6185 = vmatpush3.bf16.msra.mxu0 %v6901_v12  ;;  %6207 = vmatpush3.bf16.msra.mxu1 %v6902_v13  ;;  %v6932_v9 = vld [vmem:[#allocation10 + $0x2f0] sm:$0xff]   ;;  %v2282_v10 = vrot.slane %v7591_v7, %v7554_v15  ;;  %v6936_v23 = vld [vmem:[#allocation10 + $0x2f8] sm:$0xff]  }
 0x317   : > { %v3561_v32 = vmax.f32 %v3264_v24, 0.0  ;;  %v3563_v33 = vmax.f32 %v3305_v25, 0.0  ;;  %v3268_v34 = vpop.f32.mrb[27].mxu0  ;;  %v3309_v35 = vpop.f32.mrb[27].mxu1  ;;  %6186 = vmatprep.subr.bf16.mxu0 %v6903_v20  ;;  %6208 = vmatprep.subr.bf16.mxu1 %v6904_v21  ;;  %v2290_v11 = vrot.slane %v7591_v7, %v7557_v16  ;;  %v2286_v12 = vrot.slane %v7591_v7, %v7562_v18  ;;  %v6933_v20 = vld [vmem:[#allocation10 + $0x230] sm:$0xff]  }
 0x318   : > { %v3562_v38 = vmax.f32 %v3266_v28, 0.0  ;;  %v3564_v39 = vmax.f32 %v3307_v29, 0.0  ;;  %v2294_v13 = vrot.slane %v7591_v7, %v7565_v19  ;;  %v6934_v21 = vld [vmem:[#allocation10 + $0x2b0] sm:$0xff]  }
 0x319   : > { %v3581_v45 = vpack.c.bf16 %v3561_v32, %v3561_v32  ;;  %v3583_v46 = vpack.c.bf16 %v3563_v33, %v3563_v33  ;;  %v6937_v32 = vld [vmem:[#allocation10 + $0x238] sm:$0xff]  }
 0x31a   : > { %v3582_v40 = vpack.c.bf16 %v3562_v38, %v3562_v38  ;;  %v3584_v41 = vpack.c.bf16 %v3564_v39, %v3564_v39  ;;  %6187 = vmatpush3.bf16.msra.mxu0 %v6905_v31  ;;  %6209 = vmatpush3.bf16.msra.mxu1 %v6906_v17  ;;  %v6938_v33 = vld [vmem:[#allocation10 + $0x2b8] sm:$0xff]   ;;  %v6939_v38 = vld [vmem:[#allocation10 + $0x340] sm:$0xff]  }
 0x31b   : > { %6216 = vmatprep.subr.bf16.mxu0 %v6907_v36  ;;  %6238 = vmatprep.subr.bf16.mxu1 %v6908_v37  ;;  %v6940_v39 = vld [vmem:[#allocation10 + $0x3c0] sm:$0xff]  }
 0x31c   : > { %4996 = vmatprep.mubr.bf16.mxu0 %v3582_v40  ;;  %5036 = vmatprep.mubr.bf16.mxu1 %v3584_v41 }
 0x31d   : > { %4997 = vmatmul.mubr.bf16.vlgmr.msra.gmra.mrb[44].mxu0 %v3581_v45  ;;  %5037 = vmatmul.mubr.bf16.vlgmr.msra.gmra.mrb[44].mxu1 %v3583_v46  ;;  %v6941_v45 = vld [vmem:[#allocation10 + $0x300] sm:$0xff]  }
 0x31e   : > { %6217 = vmatpush3.bf16.msra.mxu0 %v6909_v42  ;;  %6239 = vmatpush3.bf16.msra.mxu1 %v6910_v44  ;;  %v6942_v46 = vld [vmem:[#allocation10 + $0x380] sm:$0xff]  }
 0x31f   : > { %6218 = vmatprep.subr.bf16.mxu0 %v6911_v47  ;;  %6240 = vmatprep.subr.bf16.mxu1 %v6912_v48 }
 0x322   : > { %6219 = vmatpush3.bf16.msra.mxu0 %v6913_v49  ;;  %6241 = vmatpush3.bf16.msra.mxu1 %v6914_v50  ;;  %v6943_v49 = vld [vmem:[#allocation10 + $0x348] sm:$0xff]  }
 0x323   : > { %6220 = vmatprep.subr.bf16.mxu0 %v6915_v51  ;;  %6242 = vmatprep.subr.bf16.mxu1 %v6916_v52  ;;  %v6944_v50 = vld [vmem:[#allocation10 + $0x3c8] sm:$0xff]  }
 0x324   : > { %v6945_v51 = vld [vmem:[#allocation10 + $0x308] sm:$0xff]  }
 0x325   : > { %v6946_v52 = vld [vmem:[#allocation10 + $0x388] sm:$0xff]  }
 0x326   : > { %6221 = vmatpush3.bf16.msra.mxu0 %v6917_v53  ;;  %6243 = vmatpush3.bf16.msra.mxu1 %v6918_v55  ;;  %v6947_v53 = vld [vmem:[#allocation10 + $0x350] sm:$0xff]  }
 0x327   : > { %6222 = vmatprep.subr.bf16.mxu0 %v6919_v56  ;;  %6244 = vmatprep.subr.bf16.mxu1 %v6920_v57  ;;  %v6948_v55 = vld [vmem:[#allocation10 + $0x3d0] sm:$0xff]  }
 0x328   : > { %v6949_v56 = vld [vmem:[#allocation10 + $0x310] sm:$0xff]  }
 0x329   : > { %v6950_v57 = vld [vmem:[#allocation10 + $0x390] sm:$0xff]  }
 0x32a   : > { %6223 = vmatpush3.bf16.msra.mxu0 %v6921_v58  ;;  %6245 = vmatpush3.bf16.msra.mxu1 %v6922_v43  ;;  %v6951_v58 = vld [vmem:[#allocation10 + $0x358] sm:$0xff]  }
 0x32b   : > { %6224 = vmatprep.subr.bf16.mxu0 %v6923_v59  ;;  %6246 = vmatprep.subr.bf16.mxu1 %v6924_v60  ;;  %v6952_v43 = vld [vmem:[#allocation10 + $0x3d8] sm:$0xff]  }
 0x32c   : > { %v6953_v59 = vld [vmem:[#allocation10 + $0x318] sm:$0xff]  }
 0x32d   : > { %v6954_v60 = vld [vmem:[#allocation10 + $0x398] sm:$0xff]  }
 0x32e   : > { %6225 = vmatpush3.bf16.msra.mxu0 %v6925_v61  ;;  %6247 = vmatpush3.bf16.msra.mxu1 %v6926_v62  ;;  %v6955_v61 = vld [vmem:[#allocation10 + $0x360] sm:$0xff]  }
 0x32f   : > { %6226 = vmatprep.subr.bf16.mxu0 %v6927_v63  ;;  %6248 = vmatprep.subr.bf16.mxu1 %v6928_v2  ;;  %v6956_v62 = vld [vmem:[#allocation10 + $0x3e0] sm:$0xff]  }
 0x330   : > { %v6957_v63 = vld [vmem:[#allocation10 + $0x320] sm:$0xff]  }
 0x331   : > { %v6958_v2 = vld [vmem:[#allocation10 + $0x3a0] sm:$0xff]  }
 0x332   : > { %6227 = vmatpush3.bf16.msra.mxu0 %v6929_v3  ;;  %6249 = vmatpush3.bf16.msra.mxu1 %v6930_v6  ;;  %v6959_v3 = vld [vmem:[#allocation10 + $0x368] sm:$0xff]  }
 0x333   : > { %6228 = vmatprep.subr.bf16.mxu0 %v6931_v8  ;;  %6250 = vmatprep.subr.bf16.mxu1 %v6932_v9  ;;  %v6960_v6 = vld [vmem:[#allocation10 + $0x3e8] sm:$0xff]  }
 0x334   : > { %v3345_v24 = vpop.f32.mrb[28].mxu0  ;;  %v3386_v25 = vpop.f32.mrb[28].mxu1  ;;  %v6961_v8 = vld [vmem:[#allocation10 + $0x328] sm:$0xff]  }
 0x335   : > { %v3346_v26 = vadd.f32 %v3345_v24, %v2282_v10  ;;  %v3387_v27 = vadd.f32 %v3386_v25, %v2290_v11  ;;  %v3347_v28 = vpop.f32.mrb[29].mxu0  ;;  %v3388_v29 = vpop.f32.mrb[29].mxu1  ;;  %v6962_v9 = vld [vmem:[#allocation10 + $0x3a8] sm:$0xff]   ;;  %v6963_v10 = vld [vmem:[#allocation10 + $0x370] sm:$0xff]   ;;  %v6967_v24 = vld [vmem:[#allocation10 + $0x378] sm:$0xff]  }
 0x336   : > { %v3348_v54 = vadd.f32 %v3347_v28, %v2286_v12  ;;  %v3389_v30 = vadd.f32 %v3388_v29, %v2294_v13  ;;  %v3349_v31 = vpop.f32.mrb[30].mxu0  ;;  %v3390_v17 = vpop.f32.mrb[30].mxu1  ;;  %6229 = vmatpush3.bf16.msra.mxu0 %v6933_v20  ;;  %6251 = vmatpush3.bf16.msra.mxu1 %v6934_v21  ;;  %v6964_v11 = vld [vmem:[#allocation10 + $0x3f0] sm:$0xff]   ;;  %v2298_v12 = vrot.slane %v7591_v7, %v2265_v0  ;;  %v6968_v0 = vld [vmem:[#allocation10 + $0x3f8] sm:$0xff]  }
 0x337   : > { %v3565_v34 = vmax.f32 %v3346_v26, 0.0  ;;  %v3567_v35 = vmax.f32 %v3387_v27, 0.0  ;;  %v3350_v36 = vpop.f32.mrb[31].mxu0  ;;  %v3391_v37 = vpop.f32.mrb[31].mxu1  ;;  %6230 = vmatprep.subr.bf16.mxu0 %v6935_v22  ;;  %6252 = vmatprep.subr.bf16.mxu1 %v6936_v23  ;;  %v2306_v13 = vrot.slane %v7591_v7, %v2273_v1  ;;  %v2302_v20 = vrot.slane %v7591_v7, %v2269_v4  ;;  %v6965_v22 = vld [vmem:[#allocation10 + $0x330] sm:$0xff]  }
 0x338   : > { %v3566_v40 = vmax.f32 %v3348_v54, 0.0  ;;  %v3568_v41 = vmax.f32 %v3389_v30, 0.0  ;;  %v2310_v21 = vrot.slane %v7591_v7, %v2277_v5  ;;  %v6966_v23 = vld [vmem:[#allocation10 + $0x3b0] sm:$0xff]   ;;  %v6970_v5 = vld [vmem:[#allocation10 + $0x3b8] sm:$0xff]  }
 0x339   : > { %v3585_v47 = vpack.c.bf16 %v3565_v34, %v3565_v34  ;;  %v3587_v48 = vpack.c.bf16 %v3567_v35, %v3567_v35  ;;  %v6971_v34 = vld [vmem:[#allocation10 + $0x440] sm:$0xff]  }
 0x33a   : > { %v3586_v42 = vpack.c.bf16 %v3566_v40, %v3566_v40  ;;  %v3588_v44 = vpack.c.bf16 %v3568_v41, %v3568_v41  ;;  %6231 = vmatpush3.bf16.msra.mxu0 %v6937_v32  ;;  %6253 = vmatpush3.bf16.msra.mxu1 %v6938_v33  ;;  %v6972_v35 = vld [vmem:[#allocation10 + $0x4c0] sm:$0xff]  }
 0x33b   : > { %6260 = vmatprep.subr.bf16.mxu0 %v6939_v38  ;;  %6282 = vmatprep.subr.bf16.mxu1 %v6940_v39  ;;  %v6973_v40 = vld [vmem:[#allocation10 + $0x400] sm:$0xff]  }
 0x33c   : > { %5076 = vmatprep.mubr.bf16.mxu0 %v3586_v42  ;;  %5116 = vmatprep.mubr.bf16.mxu1 %v3588_v44  ;;  %v6974_v41 = vld [vmem:[#allocation10 + $0x480] sm:$0xff]  }
 0x33d   : > { %5077 = vmatmul.mubr.bf16.vlgmr.msra.gmra.mrb[48].mxu0 %v3585_v47  ;;  %5117 = vmatmul.mubr.bf16.vlgmr.msra.gmra.mrb[48].mxu1 %v3587_v48  ;;  %v6977_v47 = vld [vmem:[#allocation10 + $0x408] sm:$0xff]  }
 0x33e   : > { %6261 = vmatpush3.bf16.msra.mxu0 %v6941_v45  ;;  %6283 = vmatpush3.bf16.msra.mxu1 %v6942_v46  ;;  %v6975_v45 = vld [vmem:[#allocation10 + $0x448] sm:$0xff]  }
 0x33f   : > { %6262 = vmatprep.subr.bf16.mxu0 %v6943_v49  ;;  %6284 = vmatprep.subr.bf16.mxu1 %v6944_v50  ;;  %v6976_v46 = vld [vmem:[#allocation10 + $0x4c8] sm:$0xff]   ;;  %v6979_v49 = vld [vmem:[#allocation10 + $0x450] sm:$0xff]  }
 0x340   : > { %v6978_v48 = vld [vmem:[#allocation10 + $0x488] sm:$0xff]   ;;  %v6980_v50 = vld [vmem:[#allocation10 + $0x4d0] sm:$0xff]  }
 0x342   : > { %6263 = vmatpush3.bf16.msra.mxu0 %v6945_v51  ;;  %6285 = vmatpush3.bf16.msra.mxu1 %v6946_v52  ;;  %v6981_v51 = vld [vmem:[#allocation10 + $0x410] sm:$0xff]  }
 0x343   : > { %6264 = vmatprep.subr.bf16.mxu0 %v6947_v53  ;;  %6286 = vmatprep.subr.bf16.mxu1 %v6948_v55  ;;  %v6982_v52 = vld [vmem:[#allocation10 + $0x490] sm:$0xff]   ;;  %v6983_v53 = vld [vmem:[#allocation10 + $0x458] sm:$0xff]  }
 0x344   : > { %v6984_v55 = vld [vmem:[#allocation10 + $0x4d8] sm:$0xff]  }
 0x346   : > { %6265 = vmatpush3.bf16.msra.mxu0 %v6949_v56  ;;  %6287 = vmatpush3.bf16.msra.mxu1 %v6950_v57  ;;  %v6985_v56 = vld [vmem:[#allocation10 + $0x418] sm:$0xff]  }
 0x347   : > { %6266 = vmatprep.subr.bf16.mxu0 %v6951_v58  ;;  %6288 = vmatprep.subr.bf16.mxu1 %v6952_v43  ;;  %v6986_v57 = vld [vmem:[#allocation10 + $0x498] sm:$0xff]   ;;  %v6987_v58 = vld [vmem:[#allocation10 + $0x460] sm:$0xff]  }
 0x348   : > { %v6988_v43 = vld [vmem:[#allocation10 + $0x4e0] sm:$0xff]  }
 0x34a   : > { %6267 = vmatpush3.bf16.msra.mxu0 %v6953_v59  ;;  %6289 = vmatpush3.bf16.msra.mxu1 %v6954_v60  ;;  %v6989_v59 = vld [vmem:[#allocation10 + $0x420] sm:$0xff]  }
 0x34b   : > { %6268 = vmatprep.subr.bf16.mxu0 %v6955_v61  ;;  %6290 = vmatprep.subr.bf16.mxu1 %v6956_v62  ;;  %v6990_v60 = vld [vmem:[#allocation10 + $0x4a0] sm:$0xff]   ;;  %v6991_v61 = vld [vmem:[#allocation10 + $0x468] sm:$0xff]  }
 0x34c   : > { %v6992_v62 = vld [vmem:[#allocation10 + $0x4e8] sm:$0xff]  }
 0x34e   : > { %6269 = vmatpush3.bf16.msra.mxu0 %v6957_v63  ;;  %6291 = vmatpush3.bf16.msra.mxu1 %v6958_v2  ;;  %v6993_v63 = vld [vmem:[#allocation10 + $0x428] sm:$0xff]  }
 0x34f   : > { %6270 = vmatprep.subr.bf16.mxu0 %v6959_v3  ;;  %6292 = vmatprep.subr.bf16.mxu1 %v6960_v6  ;;  %v6994_v2 = vld [vmem:[#allocation10 + $0x4a8] sm:$0xff]   ;;  %v2243_v3 = vld [vmem:[#allocation8 + $0x10] sm:$0xf]  ;;  %v6995_v6 = vld [vmem:[#allocation10 + $0x470] sm:$0xff]  }
 0x352   : > { %6271 = vmatpush3.bf16.msra.mxu0 %v6961_v8  ;;  %6293 = vmatpush3.bf16.msra.mxu1 %v6962_v9  ;;  %v6996_v8 = vld [vmem:[#allocation10 + $0x4f0] sm:$0xff]   ;;  %v2314_v9 = vrot.slane %v2243_v3, %v7554_v15 }
 0x353   : > { %6272 = vmatprep.subr.bf16.mxu0 %v6963_v10  ;;  %6294 = vmatprep.subr.bf16.mxu1 %v6964_v11  ;;  %v2322_v10 = vrot.slane %v2243_v3, %v7557_v16  ;;  %v2318_v11 = vrot.slane %v2243_v3, %v7562_v18  ;;  %v7001_v18 = vld [vmem:[#allocation10 + $0x438] sm:$0xff]  }
 0x354   : > { %v3427_v25 = vpop.f32.mrb[32].mxu0  ;;  %v3468_v26 = vpop.f32.mrb[32].mxu1 }
 0x355   : > { %v3428_v27 = vadd.f32 %v3427_v25, %v2298_v12  ;;  %v3469_v1 = vadd.f32 %v3468_v26, %v2306_v13  ;;  %v3429_v28 = vpop.f32.mrb[33].mxu0  ;;  %v3470_v29 = vpop.f32.mrb[33].mxu1  ;;  %v2326_v12 = vrot.slane %v2243_v3, %v7565_v19  ;;  %v6997_v13 = vld [vmem:[#allocation10 + $0x430] sm:$0xff]   ;;  %v7002_v19 = vld [vmem:[#allocation10 + $0x4b8] sm:$0xff]  }
 0x356   : > { %v3430_v54 = vadd.f32 %v3429_v28, %v2302_v20  ;;  %v3471_v30 = vadd.f32 %v3470_v29, %v2310_v21  ;;  %v3431_v31 = vpop.f32.mrb[34].mxu0  ;;  %v3472_v4 = vpop.f32.mrb[34].mxu1  ;;  %6273 = vmatpush3.bf16.msra.mxu0 %v6965_v22  ;;  %6295 = vmatpush3.bf16.msra.mxu1 %v6966_v23  ;;  %v6998_v20 = vld [vmem:[#allocation10 + $0x4b0] sm:$0xff]   ;;  %v6999_v21 = vld [vmem:[#allocation10 + $0x478] sm:$0xff]  }
 0x357   : > { %v3569_v7 = vmax.f32 %v3428_v27, 0.0  ;;  %v3571_v17 = vmax.f32 %v3469_v1, 0.0  ;;  %v3432_v32 = vpop.f32.mrb[35].mxu0  ;;  %v3473_v33 = vpop.f32.mrb[35].mxu1  ;;  %6274 = vmatprep.subr.bf16.mxu0 %v6967_v24  ;;  %6296 = vmatprep.subr.bf16.mxu1 %v6968_v0  ;;  %v7000_v22 = vld [vmem:[#allocation10 + $0x4f8] sm:$0xff]  }
 0x358   : > { %v3570_v36 = vmax.f32 %v3430_v54, 0.0  ;;  %v3572_v37 = vmax.f32 %v3471_v30, 0.0 }
 0x359   : > { %v3589_v42 = vpack.c.bf16 %v3569_v7, %v3569_v7  ;;  %v3591_v44 = vpack.c.bf16 %v3571_v17, %v3571_v17 }
 0x35a   : > { %v3590_v38 = vpack.c.bf16 %v3570_v36, %v3570_v36  ;;  %v3592_v39 = vpack.c.bf16 %v3572_v37, %v3572_v37  ;;  %6275 = vmatpush3.bf16.msra.mxu0 %v6969_v14  ;;  %6297 = vmatpush3.bf16.msra.mxu1 %v6970_v5 }
 0x35b   : > { %6304 = vmatprep.subr.bf16.mxu0 %v6971_v34  ;;  %6326 = vmatprep.subr.bf16.mxu1 %v6972_v35  ;;  %v5743_v35 = vld [vmem:[%s7675_s6] ss:$0 sm:$0xff] }
 0x35c   : > { %5156 = vmatprep.mubr.bf16.mxu0 %v3590_v38  ;;  %5196 = vmatprep.mubr.bf16.mxu1 %v3592_v39 }
 0x35d   : > { %5157 = vmatmul.mubr.bf16.vlgmr.msra.gmra.mrb[52].mxu0 %v3589_v42  ;;  %5197 = vmatmul.mubr.bf16.vlgmr.msra.gmra.mrb[52].mxu1 %v3591_v44 }
 0x35e   : > { %6305 = vmatpush3.bf16.msra.mxu0 %v6973_v40  ;;  %6327 = vmatpush3.bf16.msra.mxu1 %v6974_v41 }
 0x35f   : > { %6306 = vmatprep.subr.bf16.mxu0 %v6975_v45  ;;  %6328 = vmatprep.subr.bf16.mxu1 %v6976_v46 }
 0x362   : > { %6307 = vmatpush3.bf16.msra.mxu0 %v6977_v47  ;;  %6329 = vmatpush3.bf16.msra.mxu1 %v6978_v48 }
 0x363   : > { %6308 = vmatprep.subr.bf16.mxu0 %v6979_v49  ;;  %6330 = vmatprep.subr.bf16.mxu1 %v6980_v50 }
 0x366   : > { %6309 = vmatpush3.bf16.msra.mxu0 %v6981_v51  ;;  %6331 = vmatpush3.bf16.msra.mxu1 %v6982_v52 }
 0x367   : > { %6310 = vmatprep.subr.bf16.mxu0 %v6983_v53  ;;  %6332 = vmatprep.subr.bf16.mxu1 %v6984_v55 }
 0x36a   : > { %6311 = vmatpush3.bf16.msra.mxu0 %v6985_v56  ;;  %6333 = vmatpush3.bf16.msra.mxu1 %v6986_v57 }
 0x36b   : > { %6312 = vmatprep.subr.bf16.mxu0 %v6987_v58  ;;  %6334 = vmatprep.subr.bf16.mxu1 %v6988_v43 }
 0x36e   : > { %6313 = vmatpush3.bf16.msra.mxu0 %v6989_v59  ;;  %6335 = vmatpush3.bf16.msra.mxu1 %v6990_v60 }
 0x36f   : > { %6314 = vmatprep.subr.bf16.mxu0 %v6991_v61  ;;  %6336 = vmatprep.subr.bf16.mxu1 %v6992_v62 }
 0x372   : > { %6315 = vmatpush3.bf16.msra.mxu0 %v6993_v63  ;;  %6337 = vmatpush3.bf16.msra.mxu1 %v6994_v2 }
 0x373   : > { %6316 = vmatprep.subr.bf16.mxu0 %v6995_v6  ;;  %6338 = vmatprep.subr.bf16.mxu1 %v6996_v8 }
 0x374   : > { %v3509_v23 = vpop.f32.mrb[36].mxu0  ;;  %v3550_v24 = vpop.f32.mrb[36].mxu1 }
 0x375   : > { %v3510_v0 = vadd.f32 %v3509_v23, %v2314_v9  ;;  %v3551_v25 = vadd.f32 %v3550_v24, %v2322_v10  ;;  %v3511_v26 = vpop.f32.mrb[37].mxu0  ;;  %v3552_v15 = vpop.f32.mrb[37].mxu1 }
 0x376   : > { %v3512_v27 = vadd.f32 %v3511_v26, %v2318_v11  ;;  %v3553_v16 = vadd.f32 %v3552_v15, %v2326_v12  ;;  %v3513_v1 = vpop.f32.mrb[38].mxu0  ;;  %v3554_v28 = vpop.f32.mrb[38].mxu1  ;;  %6317 = vmatpush3.bf16.msra.mxu0 %v6997_v13  ;;  %6339 = vmatpush3.bf16.msra.mxu1 %v6998_v20 }
 0x377   : > { %v3573_v29 = vmax.f32 %v3510_v0, 0.0  ;;  %v3575_v54 = vmax.f32 %v3551_v25, 0.0  ;;  %v3514_v30 = vpop.f32.mrb[39].mxu0  ;;  %v3555_v31 = vpop.f32.mrb[39].mxu1  ;;  %6318 = vmatprep.subr.bf16.mxu0 %v6999_v21  ;;  %6340 = vmatprep.subr.bf16.mxu1 %v7000_v22 }
 0x378   : > { %v3574_v4 = vmax.f32 %v3512_v27, 0.0  ;;  %v3576_v14 = vmax.f32 %v3553_v16, 0.0 }
 0x379   : > { %v3593_v17 = vpack.c.bf16 %v3573_v29, %v3573_v29  ;;  %v3595_v32 = vpack.c.bf16 %v3575_v54, %v3575_v54 }
 0x37a   : > { %v3594_v5 = vpack.c.bf16 %v3574_v4, %v3574_v4  ;;  %v3596_v7 = vpack.c.bf16 %v3576_v14, %v3576_v14  ;;  %6319 = vmatpush3.bf16.msra.mxu0 %v7001_v18  ;;  %6341 = vmatpush3.bf16.msra.mxu1 %v7002_v19 }
 0x37c   : > { %5236 = vmatprep.mubr.bf16.mxu0 %v3594_v5  ;;  %5276 = vmatprep.mubr.bf16.mxu1 %v3596_v7 }
 0x37d   : > { %5237 = vmatmul.mubr.bf16.vlgmr.msra.gmra.mrb[56].mxu0 %v3593_v17  ;;  %5277 = vmatmul.mubr.bf16.vlgmr.msra.gmra.mrb[56].mxu1 %v3595_v32 }
 0x3d0   : > { %v6144_v33 = vpop.f32.mrb[40].mxu0  ;;  %v6166_v34 = vpop.f32.mrb[40].mxu1 }
 0x3d1   : > { %v6145_v36 = vpop.f32.mrb[41].mxu0  ;;  %v6167_v37 = vpop.f32.mrb[41].mxu1 }
 0x3d2   : > { %v6146_v38 = vadd.f32 %v6145_v36, %v6144_v33  ;;  %v6168_v39 = vadd.f32 %v6167_v37, %v6166_v34  ;;  %v6147_v40 = vpop.f32.mrb[42].mxu0  ;;  %v6169_v41 = vpop.f32.mrb[42].mxu1 }
 0x3d3   : > { %v6148_v42 = vpop.f32.mrb[43].mxu0  ;;  %v6170_v44 = vpop.f32.mrb[43].mxu1 }
 0x3d4   : > { %v4919_v45 = vadd.f32 %v6146_v38, %v5743_v35 }
 0x3d6   : > { %v4959_v46 = vadd.f32 %v6168_v39, %v4919_v45 }
 0x3f0   : > { %v6188_v47 = vpop.f32.mrb[44].mxu0  ;;  %v6210_v48 = vpop.f32.mrb[44].mxu1 }
 0x3f1   : > { %v6189_v49 = vpop.f32.mrb[45].mxu0  ;;  %v6211_v50 = vpop.f32.mrb[45].mxu1 }
 0x3f2   : > { %v6190_v51 = vadd.f32 %v6189_v49, %v6188_v47  ;;  %v6212_v52 = vadd.f32 %v6211_v50, %v6210_v48  ;;  %v6191_v53 = vpop.f32.mrb[46].mxu0  ;;  %v6213_v55 = vpop.f32.mrb[46].mxu1 }
 0x3f3   : > { %v6192_v56 = vpop.f32.mrb[47].mxu0  ;;  %v6214_v57 = vpop.f32.mrb[47].mxu1 }
 0x3f4   : > { %v4999_v58 = vadd.f32 %v6190_v51, %v4959_v46 }
 0x3f6   : > { %v5039_v43 = vadd.f32 %v6212_v52, %v4999_v58 }
 0x410   : > { %v6232_v59 = vpop.f32.mrb[48].mxu0  ;;  %v6254_v60 = vpop.f32.mrb[48].mxu1 }
 0x411   : > { %v6233_v61 = vpop.f32.mrb[49].mxu0  ;;  %v6255_v62 = vpop.f32.mrb[49].mxu1 }
 0x412   : > { %v6234_v63 = vadd.f32 %v6233_v61, %v6232_v59  ;;  %v6256_v2 = vadd.f32 %v6255_v62, %v6254_v60  ;;  %v6235_v3 = vpop.f32.mrb[50].mxu0  ;;  %v6257_v6 = vpop.f32.mrb[50].mxu1 }
 0x413   : > { %v6236_v8 = vpop.f32.mrb[51].mxu0  ;;  %v6258_v9 = vpop.f32.mrb[51].mxu1 }
 0x414   : > { %v5079_v10 = vadd.f32 %v6234_v63, %v5039_v43 }
 0x416   : > { %v5119_v11 = vadd.f32 %v6256_v2, %v5079_v10 }
 0x430   : > { %v6276_v12 = vpop.f32.mrb[52].mxu0  ;;  %v6298_v13 = vpop.f32.mrb[52].mxu1 }
 0x431   : > { %v6277_v20 = vpop.f32.mrb[53].mxu0  ;;  %v6299_v21 = vpop.f32.mrb[53].mxu1 }
 0x432   : > { %v6278_v22 = vadd.f32 %v6277_v20, %v6276_v12  ;;  %v6300_v23 = vadd.f32 %v6299_v21, %v6298_v13  ;;  %v6279_v24 = vpop.f32.mrb[54].mxu0  ;;  %v6301_v0 = vpop.f32.mrb[54].mxu1 }
 0x433   : > { %v6280_v25 = vpop.f32.mrb[55].mxu0  ;;  %v6302_v26 = vpop.f32.mrb[55].mxu1 }
 0x434   : > { %v5159_v15 = vadd.f32 %v6278_v22, %v5119_v11 }
 0x436   : > { %v5199_v27 = vadd.f32 %v6300_v23, %v5159_v15 }
 0x450   : > { %v6320_v16 = vpop.f32.mrb[56].mxu0  ;;  %v6342_v1 = vpop.f32.mrb[56].mxu1 }
 0x451   : > { %v6321_v28 = vpop.f32.mrb[57].mxu0  ;;  %v6343_v18 = vpop.f32.mrb[57].mxu1 }
 0x452   : > { %v6322_v19 = vadd.f32 %v6321_v28, %v6320_v16  ;;  %v6344_v29 = vadd.f32 %v6343_v18, %v6342_v1  ;;  %v6323_v54 = vpop.f32.mrb[58].mxu0  ;;  %v6345_v30 = vpop.f32.mrb[58].mxu1 }
 0x453   : > { %v6324_v31 = vpop.f32.mrb[59].mxu0  ;;  %v6346_v4 = vpop.f32.mrb[59].mxu1 }
 0x454   : > { %v5239_v14 = vadd.f32 %v6322_v19, %v5199_v27 }
 0x456   : > { %v5279_v5 = vadd.f32 %v6344_v29, %v5239_v14 }
 0x458   : > { %v5284_v7 = vpack.c.bf16 %v5279_v5, %v5279_v5 }
 0x45a   : > { %5285 = vst [vmem:[%s350_s13] sm:$0xf] %v5284_v7 }
 0x45b   : > { %7158 = shalt.err (!%p7155_p0)
}
 0x45c   : > { %s7159_s22 = scalar_lea.hbm %s7625_s1, 64  ;;  %s7163_s21 = scalar_lea.hbm %s7676_s7, 128 }
 0x45d   : > { %p7160_p2 = scmp.ne.s32.totalorder %s7625_s1, %s7159_s22  ;;  %p7164_p10 = scmp.lt.u32.totalorder %s7625_s1, %s7676_s7 }
 0x45e   : > { %p7165_p11 = scmp.lt.u32.totalorder %s7163_s21, %s7159_s22  ;;  %p7167_p5 = scmp.lt.u32.totalorder %s7159_s22, %s7625_s1 }
 0x45f   : > { %p7161_p8 = pnand %p7160_p2, %p7697_p6 }
 0x460   : > { %p7166_p1 = por %p7165_p11, %p7164_p10 }
 0x461   : > { %p7162_p4 = pneg %p7161_p8 }
 0x462   : > { %p7168_p7 = por %p7167_p5, %p7166_p1 }
 0x464   : > { %p7169_p9 = pnand %p7168_p7, %p7162_p4 }
 0x466   : > { %7172 = shalt.err (!%p7169_p9)
}
 0x467   : > { %6369 = dma.vmem_to_hbm [thread:$0]  (%p7697_p6), %s7627_s28, 64, %s7625_s1, %s5287_s9  }
 0x468 PF: > { %s5312_s13 = sand.u32 1, %s7207_s24   ;;  %p7698_p12 = scmp.ne.s32.totalorder %s7690_s16, 0 }
 0x469   : > { %p7699_p3 = scmp.ge.s32.totalorder %s7219_s27, 2  ;;  %s5313_s17 = scalar_lea.sflag [#allocation4], %s5312_s13 }
 0x46b   : > { %p6389_p13 = pnand %p7699_p3, %p7698_p12 }
 0x46d   : > { %7202 = dma.done.wait (!%p6389_p13), %s5313_s17, 64  }
 0x46e   : > { %7204 = vsyncadd (!%p6389_p13), %s5313_s17, 4294967232  ;;  %p22_p0 = scmp.ge.s32.totalorder %s7418_s19, 4   ;;  %s7700_s24 = smov %s7211_s25 }
 0x46f   : > { %s7701_s25 = smov %s7215_s26  ;;  %s7702_s26 = smov %s7429_s12 }
 0x470   : > { %s7703_s27 = smov %s7418_s19  ;;  %24 = sbr.rel (!%p22_p0) target bundleno = 9 (0x9), region = 109 }
 0x477   :  { %5318 = vsyncpa [#allocation3], 1 }
 0x478   :  { %5320 = vsyncpa [#allocation3 + $0x1], 1 }
 0x479   :  { %5321 = vsyncpa [#allocation6], 1 }
 0x47a   :  { %5322 = vsyncpa [#allocation9], 1 }
 0x47b   :  { %5323 = vsyncpa [#allocation4], 1 }
 0x47c   :  { %5325 = vsyncpa [#allocation4 + $0x1], 1 }

// kernel: tpu_custom_call.1
= control target key start
LH: loop header
LB: loop body
LE: loop exit
PB: predicated region body
PF: predicated region fallthrough
CT: control target
= control target key end

     0   :  { %s7669_s0 = inlined_call_operand.hbm [shape: f32[16,2560], index: 0, kind: input, shape index: {}]   ;;  %s7670_s1 = inlined_call_operand.hbm [shape: bf16[2560,128], index: 1, kind: input, shape index: {}]   ;;  %s7671_s2 = inlined_call_operand.vmem [shape: f32[1,128], index: 2, kind: input, shape index: {}]   ;;  %s7672_s3 = inlined_call_operand.hbm [shape: bf16[128,2560], index: 3, kind: input, shape index: {}]   ;;  %s7673_s4 = inlined_call_operand.hbm [shape: f32[1,2560], index: 4, kind: input, shape index: {}]   ;;  %s7674_s5 = inlined_call_operand.hbm [shape: bf16[2560,128], index: 5, kind: input, shape index: {}]   ;;  %s7675_s6 = inlined_call_operand.vmem [shape: f32[1,128], index: 6, kind: input, shape index: {}]   ;;  %s7676_s7 = inlined_call_operand.hbm [shape: bf16[16,128], index: 7, kind: output, shape index: {}]  }
   0x1   :  { %7681 = sst [smem:[#allocation16_spill]] %s7670_s1 }
   0x2   :  { %12 = vsyncpa [#allocation3], 0 }
   0x3   :  { %14 = vsyncpa [#allocation3 + $0x1], 0 }
   0x4   :  { %15 = vsyncpa [#allocation6], 0 }
   0x5   :  { %16 = vsyncpa [#allocation9], 0 }
   0x6   :  { %17 = vsyncpa [#allocation4], 0 }
   0x7   :  { %19 = vsyncpa [#allocation4 + $0x1], 0  ;;  %s7272_s24 = smov 0   ;;  %s7274_s25 = smov 0  }
   0x8   :  { %s7276_s26 = smov 0   ;;  %s7278_s27 = smov 0  }
   0x9 LB: > { %s7221_s28 = smov [#allocation5]   ;;  %s7293_s30 = sadd.s32 4294967295, %s7219_s27   ;;  %s7219_s27 = sphi %s7278_s27, %s7703_s27   ;;  %s7215_s26 = sphi %s7276_s26, %s7702_s26   ;;  %s7211_s25 = sphi %s7274_s25, %s7701_s25   ;;  %s7207_s24 = sphi %s7272_s24, %s7700_s24  }
   0xa   : > { %s220_s29 = sshll.u32 %s7221_s28, 4  ;;  %p5409_p0 = scmp.ge.s32.totalorder %s7219_s27, 1  ;;  %s7298_s29 = int_to_ptr.vmem [resolvable:$true] %s220_s29 }
   0xb   : > { %p7678_p1 = scmp.eq.s32.totalorder %s7293_s30, 0  ;;  %p208_p2 = scmp.lt.s32.totalorder %s7219_s27, 3 }
   0xc   : > { %s7222_s9 = smov [#allocation8]   ;;  %s7223_s12 = smov [#allocation7]  }
   0xd   : > { %p7300_p3 = pnand %p5409_p0, %p208_p2  ;;  %s250_s10 = sshll.u32 %s7222_s9, 4  ;;  %s7313_s10 = int_to_ptr.vmem [resolvable:$true] %s250_s10 }
   0xe   : > { %s236_s13 = sshll.u32 %s7223_s12, 4  ;;  %s7684_s1 = sld [smem:[#allocation16_spill]]  ;;  %s7315_s13 = int_to_ptr.vmem [resolvable:$true] %s236_s13 }
   0xf   : > { %s7682_s8 = scalar_select %p7300_p3, 1, 0 }
  0x10   : > { %p6371_p5 = pneg %p7300_p3 }
  0x12   : > { %p7309_p6 = pnand %p6371_p5, %p7678_p1 }
  0x14   : > { %s7003_s16 = scalar_lea.hbm %s7684_s1, 20480  ;;  %p7325_p8 = pneg %p7309_p6 }
  0x15   : > { %p7004_p7 = scmp.ne.s32.totalorder %s7684_s1, %s7003_s16  ;;  %p7010_p11 = scmp.lt.u32.totalorder %s7003_s16, %s7684_s1 }
  0x17   : > { %p7006_p9 = pnand %p7325_p8, %p7004_p7 }
  0x19   : > { %p7007_p10 = pneg %p7006_p9 }
  0x1b   : > { %p7012_p12 = pnand %p7010_p11, %p7007_p10 }
  0x1d   : > { %7015 = shalt.err (!%p7012_p12)
}
  0x1e   : > { %s7016_s22 = scalar_lea.vmem %s7298_s29, 20480  ;;  %p7024_p5 = scmp.lt.s32.totalorder %s7298_s29, %s7298_s29 }
  0x1f   : > { %p7017_p13 = scmp.ne.s32.totalorder %s7298_s29, %s7016_s22  ;;  %p7025_p4 = scmp.lt.s32.totalorder %s7016_s22, %s7016_s22 }
  0x21   : > { %p7019_p0 = pnand %p7017_p13, %p7325_p8  ;;  %p7026_p7 = por %p7025_p4, %p7024_p5 }
  0x23   : > { %p7020_p2 = pneg %p7019_p0 }
  0x25   : > { %p7027_p9 = pnand %p7026_p7, %p7020_p2 }
  0x27   : > { %7030 = shalt.err (!%p7027_p9)
}
  0x28   : > { %s7677_s23 = smov 64   ;;  %s7225_s28 = smov 4  }
  0x29   : > { %6374 = dma.hbm_to_vmem [thread:$0]  (!%p7309_p6), %s7684_s1, 20480, %s7298_s29, [#allocation6], %s7677_s23, %s7677_s23, %s7225_s28  }
  0x2a   : > { %s7031_s16 = scalar_lea.hbm %s7673_s4, 320 }
  0x2b   : > { %p7032_p4 = scmp.ne.s32.totalorder %s7673_s4, %s7031_s16  ;;  %p7038_p12 = scmp.lt.u32.totalorder %s7031_s16, %s7673_s4 }
  0x2d   : > { %p7034_p10 = pnand %p7032_p4, %p7325_p8 }
  0x2f   : > { %p7035_p11 = pneg %p7034_p10 }
  0x31   : > { %p7040_p13 = pnand %p7038_p12, %p7035_p11 }
  0x33   : > { %7043 = shalt.err (!%p7040_p13)
}
  0x34   : > { %s7044_s29 = scalar_lea.vmem %s7313_s10, 320  ;;  %p7052_p7 = scmp.lt.s32.totalorder %s7313_s10, %s7313_s10 }
  0x35   : > { %p7045_p0 = scmp.ne.s32.totalorder %s7313_s10, %s7044_s29  ;;  %p7053_p9 = scmp.lt.s32.totalorder %s7044_s29, %s7044_s29 }
  0x37   : > { %p7047_p2 = pnand %p7045_p0, %p7325_p8  ;;  %p7054_p4 = por %p7053_p9, %p7052_p7 }
  0x39   : > { %p7048_p5 = pneg %p7047_p2 }
  0x3b   : > { %p7055_p10 = pnand %p7054_p4, %p7048_p5 }
  0x3d   : > { %7058 = shalt.err (!%p7055_p10)
}
  0x3e   : > { %6380 = dma.hbm_to_vmem [thread:$0]  (!%p7309_p6), %s7673_s4, 320, %s7313_s10, [#allocation9]  }
  0x3f   : > { %s7059_s15 = scalar_lea.hbm %s7672_s3, 20480 }
  0x40   : > { %p7060_p11 = scmp.ne.s32.totalorder %s7672_s3, %s7059_s15  ;;  %p7066_p0 = scmp.lt.u32.totalorder %s7059_s15, %s7672_s3 }
  0x42   : > { %p7062_p12 = pnand %p7060_p11, %p7325_p8 }
  0x44   : > { %p7063_p13 = pneg %p7062_p12 }
  0x46   : > { %p7068_p2 = pnand %p7066_p0, %p7063_p13 }
  0x48   : > { %7071 = shalt.err (!%p7068_p2)
}
  0x49   : > { %s7072_s10 = scalar_lea.vmem %s7315_s13, 20480  ;;  %p7080_p4 = scmp.lt.s32.totalorder %s7315_s13, %s7315_s13 }
  0x4a   : > { %p7073_p5 = scmp.ne.s32.totalorder %s7315_s13, %s7072_s10  ;;  %p7081_p10 = scmp.lt.s32.totalorder %s7072_s10, %s7072_s10 }
  0x4c   : > { %p7075_p7 = pnand %p7073_p5, %p7325_p8  ;;  %p7082_p11 = por %p7081_p10, %p7080_p4 }
  0x4e   : > { %p7076_p9 = pneg %p7075_p7 }
  0x50   : > { %p7083_p12 = pnand %p7082_p11, %p7076_p9 }
  0x52   : > { %7086 = shalt.err (!%p7083_p12)
}
  0x53   : > { %s7226_s21 = smov 1280   ;;  %s7227_s29 = smov 80  }
  0x54   : > { %6377 = dma.hbm_to_vmem [thread:$0]  (!%p7309_p6), %s7672_s3, 20480, %s7315_s13, [#allocation6], %s7226_s21, %s7226_s21, %s7227_s29  }
  0x55   : > { %s7228_s12 = smov [#allocation10]   ;;  %s7087_s17 = scalar_lea.hbm %s7674_s5, 20480 }
  0x56   : > { %s260_s14 = sshll.u32 %s7228_s12, 4  ;;  %p7088_p13 = scmp.ne.s32.totalorder %s7674_s5, %s7087_s17  ;;  %s261_s14 = int_to_ptr.vmem [resolvable:$true] %s260_s14 }
  0x57   : > { %p7094_p5 = scmp.lt.u32.totalorder %s7087_s17, %s7674_s5 }
  0x58   : > { %p7090_p0 = pnand %p7088_p13, %p7325_p8 }
  0x5a   : > { %p7091_p2 = pneg %p7090_p0 }
  0x5c   : > { %p7096_p7 = pnand %p7094_p5, %p7091_p2 }
  0x5e   : > { %7099 = shalt.err (!%p7096_p7)
}
  0x5f   : > { %s7100_s13 = scalar_lea.vmem %s261_s14, 20480  ;;  %p7108_p11 = scmp.lt.s32.totalorder %s261_s14, %s261_s14 }
  0x60   : > { %p7101_p9 = scmp.ne.s32.totalorder %s261_s14, %s7100_s13  ;;  %p7109_p12 = scmp.lt.s32.totalorder %s7100_s13, %s7100_s13 }
  0x62   : > { %p7103_p4 = pnand %p7101_p9, %p7325_p8  ;;  %p7110_p1 = por %p7109_p12, %p7108_p11 }
  0x64   : > { %p7104_p10 = pneg %p7103_p4 }
  0x66   : > { %p7111_p3 = pnand %p7110_p1, %p7104_p10 }
  0x68   : > { %7114 = shalt.err (!%p7111_p3)
}
  0x69   : > { %s7686_s21 = smov 64   ;;  %s5408_s11 = sadd.s32 4294967294, %s7219_s27  }
  0x6a   : > { %6383 = dma.hbm_to_vmem [thread:$0]  (!%p7309_p6), %s7674_s5, 20480, %s261_s14, [#allocation9], %s7686_s21, %s7686_s21, %s7225_s28  }
  0x6b   : > { %s7418_s19 = sadd.s32 1, %s7219_s27   ;;  %s32_s9 = sadd.s32 1, %s7215_s26 }
  0x6c   : > { %s29_s22 = ssub.s32 %s7219_s27, %s7418_s19  ;;  %p39_p3 = scmp.ne.s32.totalorder %s7215_s26, %s7211_s25 }
  0x6d   : > { %p30_p1 = scmp.eq.s32.totalorder %s29_s22, 0  ;;  %p40_p8 = scmp.eq.s32.totalorder %s7219_s27, 0 }
  0x6e   : > { %p45_p13 = scmp.ne.s32.totalorder %s7211_s25, %s7207_s24  ;;  %p7687_p2 = scmp.eq.s32.totalorder %s7293_s30, 0 }
  0x6f   : > { %s7429_s12 = scalar_select %p30_p1, %s7215_s26, %s32_s9  }
  0x70   : > { %p41_p0 = por %p40_p8, %p39_p3  ;;  %p7433_p5 = por %p7687_p2, %p45_p13 }
  0x71   : > { %p195_p6 = scmp.eq.s32.totalorder %s7293_s30, 1  ;;  %p201_p7 = scmp.eq.s32.totalorder %s5408_s11, 1 }
  0x72   : > { %p6396_p9 = scmp.lt.s32.totalorder %s7219_s27, 2  ;;  %s277_s28 = sand.u32 1, %s7215_s26  }
  0x73   : > { %p7440_p4 = por %p195_p6, %p39_p3  ;;  %p7444_p10 = por %p201_p7, %p45_p13 }
  0x74   : > { %s6348_s17 = smul.u32 160, %s277_s28  ;;  %p7449_p11 = pnand %p6396_p9, %p41_p0 }
  0x75   : > { %s7689_s14 = scalar_select %p7440_p4, 1, 0 }
  0x76   : > { %s7690_s16 = scalar_select %p7444_p10, 1, 0 }
  0x77   : > { %s6349_s18 = smul.u32 2560, %s7219_s27  ;;  %s281_s23 = scalar_lea.vmem [#allocation2], %s6348_s17 }
  0x78   : > { %s289_s29 = sshll.u32 %s281_s23, 4  ;;  %s278_s11 = scalar_lea.sflag [#allocation3], %s277_s28  ;;  %s7458_s29 = int_to_ptr.vmem [resolvable:$true] %s289_s29 }
  0x79   : > { %s7456_s21 = scalar_lea.hbm %s7669_s0, %s6349_s18  ;;  %p7117_p1 = pneg %p7449_p11 }
  0x7a   : > { %s7115_s22 = scalar_lea.hbm %s7456_s21, 2560  ;;  %s7120_s10 = scalar_lea.hbm %s7669_s0, 5120 }
  0x7b   : > { %p7116_p12 = scmp.ne.s32.totalorder %s7456_s21, %s7115_s22  ;;  %p7121_p13 = scmp.lt.u32.totalorder %s7456_s21, %s7669_s0 }
  0x7c   : > { %p7122_p0 = scmp.lt.u32.totalorder %s7120_s10, %s7115_s22  ;;  %p7124_p6 = scmp.lt.u32.totalorder %s7115_s22, %s7456_s21 }
  0x7d   : > { %p7118_p3 = pnand %p7117_p1, %p7116_p12 }
  0x7e   : > { %p7123_p2 = por %p7122_p0, %p7121_p13 }
  0x7f   : > { %p7119_p8 = pneg %p7118_p3 }
  0x80   : > { %p7125_p7 = por %p7124_p6, %p7123_p2 }
  0x82   : > { %p7126_p9 = pnand %p7125_p7, %p7119_p8 }
  0x84   : > { %7129 = shalt.err (!%p7126_p9)
}
  0x85   : > { %s7130_s28 = scalar_lea.vmem %s7458_s29, 2560  ;;  %s7229_s17 = smov [#allocation2]  }
  0x86   : > { %p7131_p12 = scmp.ne.s32.totalorder %s7458_s29, %s7130_s28  ;;  %s7135_s23 = sshll.u32 %s7229_s17, 4  ;;  %s7136_s23 = int_to_ptr.vmem [resolvable:$false] %s7135_s23 }
  0x87   : > { %s7137_s1 = scalar_lea.vmem %s7136_s23, 5120  ;;  %p7138_p4 = scmp.lt.s32.totalorder %s7458_s29, %s7136_s23 }
  0x88   : > { %p7133_p3 = pnand %p7131_p12, %p7117_p1  ;;  %p7139_p13 = scmp.lt.s32.totalorder %s7137_s1, %s7130_s28 }
  0x8a   : > { %p7134_p10 = pneg %p7133_p3  ;;  %p7140_p0 = por %p7139_p13, %p7138_p4 }
  0x8c   : > { %p7141_p2 = pnand %p7140_p0, %p7134_p10 }
  0x8e   : > { %7144 = shalt.err (!%p7141_p2)
}
  0x8f   : > { %6387 = dma.hbm_to_vmem [thread:$0]  (!%p7449_p11), %s7456_s21, 2560, %s7458_s29, %s278_s11  }
  0x90   : > { %p7692_p8 = scmp.ne.s32.totalorder %s7682_s8, 0 }
  0x91   : > { %s7488_s22 = sand.u32 (!%p7692_p8), 1, %s7211_s25  }
  0x92   : > { %298 = sbr.rel (%p7692_p8) target bundleno = 1128 (0x468), region = 48  ;;  %s301_s18 = scalar_lea.sflag (!%p7692_p8), [#allocation3], %s7488_s22 }
  0x93   : > { %s6350_s9 = smul.u32 (!%p7692_p8), 160, %s7488_s22 }
  0x95   : > { %s7492_s10 = scalar_lea.vmem (!%p7692_p8), [#allocation2], %s6350_s9 }
  0x99   : > { %7190 = dma.done.wait (%p7433_p5), %s301_s18, 2560  }
  0x9a   : > { %7192 = vsyncadd (%p7433_p5), %s301_s18, 4294964736  ;;  %p7693_p4 = scmp.eq.s32.totalorder %s7293_s30, 0 }
  0x9c   : > { %7194 = dma.done.wait (%p7693_p4), [#allocation6], 40960   ;;  %p7694_p10 = pmov %p7693_p4 }
  0x9d   : > { %p7695_p11 = pmov %p7693_p4 }
  0x9e   : > { %7196 = vsyncadd (%p7694_p10), [#allocation6], 4294926336 }
  0x9f   : > { %7198 = dma.done.wait (%p7695_p11), [#allocation9], 20800   ;;  %p7696_p1 = pmov %p7693_p4 }
  0xa0   : > { %v6443_v0 = vld [vmem:[#allocation5 + $0x40] sm:$0xff]   ;;  %v6447_v4 = vld [vmem:[#allocation5 + $0x48] sm:$0xff]   ;;  %v6451_v8 = vld [vmem:[#allocation5 + $0x50] sm:$0xff]   ;;  %s5421_s29 = sshll.u32 %s7488_s22, 2  ;;  %s5905_s11 = sshll.u32 %s7293_s30, 6 }
  0xa1   : > { %7200 = vsyncadd (%p7696_p1), [#allocation9], 4294946496  ;;  %v6444_v1 = vld [vmem:[#allocation5 + $0xc0] sm:$0xff]   ;;  %5908 = vmatprep.subr.bf16.mxu0 %v6443_v0  ;;  %v6448_v5 = vld [vmem:[#allocation5 + $0xc8] sm:$0xff]   ;;  %s350_s13 = scalar_lea.vmem [#allocation11], %s5421_s29  ;;  %s7625_s1 = scalar_lea.hbm %s7676_s7, %s5905_s11 }
  0xa2   : > { %v6445_v2 = vld [vmem:[#allocation5] sm:$0xff]   ;;  %5930 = vmatprep.subr.bf16.mxu1 %v6444_v1  ;;  %v6449_v6 = vld [vmem:[#allocation5 + $0x8] sm:$0xff]   ;;  %v6452_v9 = vld [vmem:[#allocation5 + $0xd0] sm:$0xff]   ;;  %s5300_s28 = sshll.u32 %s350_s13, 4  ;;  %s5287_s9 = scalar_lea.sflag [#allocation4], %s7488_s22  ;;  %s7627_s28 = int_to_ptr.vmem [resolvable:$true] %s5300_s28 }
  0xa3   : > { %v6446_v3 = vld [vmem:[#allocation5 + $0x80] sm:$0xff]   ;;  %5909 = vmatpush3.bf16.msra.mxu0 %v6445_v2  ;;  %v6450_v7 = vld [vmem:[#allocation5 + $0x88] sm:$0xff]   ;;  %v6453_v10 = vld [vmem:[#allocation5 + $0x10] sm:$0xff]   ;;  %s7145_s18 = scalar_lea.vmem %s7627_s28, 64  ;;  %p7697_p6 = scmp.ne.s32.totalorder %s7689_s14, 0 }
  0xa4   : > { %5931 = vmatpush3.bf16.msra.mxu1 %v6446_v3  ;;  %5910 = vmatprep.subr.bf16.mxu0 %v6447_v4  ;;  %v6454_v11 = vld [vmem:[#allocation5 + $0x90] sm:$0xff]   ;;  %v6455_v12 = vld [vmem:[#allocation5 + $0x58] sm:$0xff]   ;;  %v6459_v16 = vld [vmem:[#allocation5 + $0x60] sm:$0xff]   ;;  %p7146_p5 = scmp.ne.s32.totalorder %s7627_s28, %s7145_s18  ;;  %s7231_s30 = smov [#allocation11]  }
  0xa5   : > { %5932 = vmatprep.subr.bf16.mxu1 %v6448_v5  ;;  %v6456_v13 = vld [vmem:[#allocation5 + $0xd8] sm:$0xff]   ;;  %v6460_v17 = vld [vmem:[#allocation5 + $0xe0] sm:$0xff]   ;;  %v6463_v20 = vld [vmem:[#allocation5 + $0x68] sm:$0xff]  }
  0xa6   : > { %v6457_v14 = vld [vmem:[#allocation5 + $0x18] sm:$0xff]   ;;  %v6461_v18 = vld [vmem:[#allocation5 + $0x20] sm:$0xff]   ;;  %v6464_v21 = vld [vmem:[#allocation5 + $0xe8] sm:$0xff]   ;;  %p7147_p7 = pnand %p7146_p5, %p7697_p6 }
  0xa7   : > { %5911 = vmatpush3.bf16.msra.mxu0 %v6449_v6  ;;  %v6458_v15 = vld [vmem:[#allocation5 + $0x98] sm:$0xff]   ;;  %v6462_v19 = vld [vmem:[#allocation5 + $0xa0] sm:$0xff]   ;;  %v6465_v22 = vld [vmem:[#allocation5 + $0x28] sm:$0xff]  }
  0xa8   : > { %5933 = vmatpush3.bf16.msra.mxu1 %v6450_v7  ;;  %5912 = vmatprep.subr.bf16.mxu0 %v6451_v8  ;;  %v6466_v23 = vld [vmem:[#allocation5 + $0xa8] sm:$0xff]   ;;  %v6467_v24 = vld [vmem:[#allocation5 + $0x70] sm:$0xff]   ;;  %v6471_v28 = vld [vmem:[#allocation5 + $0x78] sm:$0xff]   ;;  %p7148_p9 = pneg %p7147_p7 }
  0xa9   : > { %5934 = vmatprep.subr.bf16.mxu1 %v6452_v9  ;;  %v6468_v25 = vld [vmem:[#allocation5 + $0xf0] sm:$0xff]   ;;  %v6472_v29 = vld [vmem:[#allocation5 + $0xf8] sm:$0xff]   ;;  %v353_v32 = vld [vmem:[%s7492_s10 + $0x8] sm:$0xff] }
  0xaa   : > { %v6469_v26 = vld [vmem:[#allocation5 + $0x30] sm:$0xff]   ;;  %v6473_v30 = vld [vmem:[#allocation5 + $0x38] sm:$0xff]   ;;  %v352_v34 = vld [vmem:[%s7492_s10] sm:$0xff]  ;;  %v373_v35 = vpack.c.bf16 %v353_v32, %v353_v32 }
  0xab   : > { %5913 = vmatpush3.bf16.msra.mxu0 %v6453_v10  ;;  %v6470_v27 = vld [vmem:[#allocation5 + $0xb0] sm:$0xff]   ;;  %v6474_v31 = vld [vmem:[#allocation5 + $0xb8] sm:$0xff]   ;;  %v372_v37 = vpack.c.bf16 %v352_v34, %v352_v34  ;;  %v6475_v40 = vld [vmem:[#allocation5 + $0x140] sm:$0xff]  }
  0xac   : > { %5935 = vmatpush3.bf16.msra.mxu1 %v6454_v11  ;;  %5914 = vmatprep.subr.bf16.mxu0 %v6455_v12  ;;  %v355_v33 = vld [vmem:[%s7492_s10 + $0x18] sm:$0xff]  ;;  %v354_v38 = vld [vmem:[%s7492_s10 + $0x10] sm:$0xff]  ;;  %v6476_v41 = vld [vmem:[#allocation5 + $0x1c0] sm:$0xff]  }
  0xad   : > { %5936 = vmatprep.subr.bf16.mxu1 %v6456_v13  ;;  %v375_v36 = vpack.c.bf16 %v355_v33, %v355_v33  ;;  %v374_v39 = vpack.c.bf16 %v354_v38, %v354_v38  ;;  %1711 = vmatprep.mubr.bf16.mxu0 %v373_v35  ;;  %v6477_v42 = vld [vmem:[#allocation5 + $0x100] sm:$0xff]   ;;  %v6479_v44 = vld [vmem:[#allocation5 + $0x148] sm:$0xff]   ;;  %v6483_v48 = vld [vmem:[#allocation5 + $0x150] sm:$0xff]  }
  0xae   : > { %v6478_v43 = vld [vmem:[#allocation5 + $0x180] sm:$0xff]   ;;  %v6480_v45 = vld [vmem:[#allocation5 + $0x1c8] sm:$0xff]   ;;  %v6484_v49 = vld [vmem:[#allocation5 + $0x1d0] sm:$0xff]  }
  0xaf   : > { %5915 = vmatpush3.bf16.msra.mxu0 %v6457_v14  ;;  %1751 = vmatprep.mubr.bf16.mxu1 %v375_v36  ;;  %v6481_v46 = vld [vmem:[#allocation5 + $0x108] sm:$0xff]   ;;  %v6485_v50 = vld [vmem:[#allocation5 + $0x110] sm:$0xff]   ;;  %v6487_v52 = vld [vmem:[#allocation5 + $0x158] sm:$0xff]  }
  0xb0   : > { %5937 = vmatpush3.bf16.msra.mxu1 %v6458_v15  ;;  %5916 = vmatprep.subr.bf16.mxu0 %v6459_v16  ;;  %v6482_v47 = vld [vmem:[#allocation5 + $0x188] sm:$0xff]   ;;  %v6486_v51 = vld [vmem:[#allocation5 + $0x190] sm:$0xff]   ;;  %v6488_v53 = vld [vmem:[#allocation5 + $0x1d8] sm:$0xff]  }
  0xb1   : > { %5938 = vmatprep.subr.bf16.mxu1 %v6460_v17  ;;  %v6489_v54 = vld [vmem:[#allocation5 + $0x118] sm:$0xff]   ;;  %v6491_v56 = vld [vmem:[#allocation5 + $0x160] sm:$0xff]   ;;  %v6495_v60 = vld [vmem:[#allocation5 + $0x168] sm:$0xff]  }
  0xb2   : > { %v6490_v55 = vld [vmem:[#allocation5 + $0x198] sm:$0xff]   ;;  %v6492_v57 = vld [vmem:[#allocation5 + $0x1e0] sm:$0xff]   ;;  %v6496_v61 = vld [vmem:[#allocation5 + $0x1e8] sm:$0xff]  }
  0xb3   : > { %5917 = vmatpush3.bf16.msra.mxu0 %v6461_v18  ;;  %v6493_v58 = vld [vmem:[#allocation5 + $0x120] sm:$0xff]   ;;  %v6497_v62 = vld [vmem:[#allocation5 + $0x128] sm:$0xff]   ;;  %v6499_v0 = vld [vmem:[#allocation5 + $0x170] sm:$0xff]  }
  0xb4   : > { %5939 = vmatpush3.bf16.msra.mxu1 %v6462_v19  ;;  %5918 = vmatprep.subr.bf16.mxu0 %v6463_v20  ;;  %v6494_v59 = vld [vmem:[#allocation5 + $0x1a0] sm:$0xff]   ;;  %v6498_v63 = vld [vmem:[#allocation5 + $0x1a8] sm:$0xff]   ;;  %v6500_v1 = vld [vmem:[#allocation5 + $0x1f0] sm:$0xff]  }
  0xb5   : > { %5940 = vmatprep.subr.bf16.mxu1 %v6464_v21  ;;  %v6501_v2 = vld [vmem:[#allocation5 + $0x130] sm:$0xff]   ;;  %v6503_v4 = vld [vmem:[#allocation5 + $0x178] sm:$0xff]   ;;  %v357_v8 = vld [vmem:[%s7492_s10 + $0x28] sm:$0xff] }
  0xb6   : > { %v6502_v3 = vld [vmem:[#allocation5 + $0x1b0] sm:$0xff]   ;;  %v6504_v5 = vld [vmem:[#allocation5 + $0x1f8] sm:$0xff]   ;;  %v377_v10 = vpack.c.bf16 %v357_v8, %v357_v8  ;;  %v356_v12 = vld [vmem:[%s7492_s10 + $0x20] sm:$0xff] }
  0xb7   : > { %5919 = vmatpush3.bf16.msra.mxu0 %v6465_v22  ;;  %v6505_v6 = vld [vmem:[#allocation5 + $0x138] sm:$0xff]   ;;  %v358_v13 = vld [vmem:[%s7492_s10 + $0x30] sm:$0xff]  ;;  %v376_v14 = vpack.c.bf16 %v356_v12, %v356_v12  ;;  %v6507_v16 = vld [vmem:[#allocation5 + $0x240] sm:$0xff]  }
  0xb8   : > { %5941 = vmatpush3.bf16.msra.mxu1 %v6466_v23  ;;  %5920 = vmatprep.subr.bf16.mxu0 %v6467_v24  ;;  %v6506_v7 = vld [vmem:[#allocation5 + $0x1b8] sm:$0xff]   ;;  %v378_v15 = vpack.c.bf16 %v358_v13, %v358_v13  ;;  %v6508_v17 = vld [vmem:[#allocation5 + $0x2c0] sm:$0xff]   ;;  %v6511_v20 = vld [vmem:[#allocation5 + $0x248] sm:$0xff]  }
  0xb9   : > { %5942 = vmatprep.subr.bf16.mxu1 %v6468_v25  ;;  %v359_v9 = vld [vmem:[%s7492_s10 + $0x38] sm:$0xff]  ;;  %v6509_v18 = vld [vmem:[#allocation5 + $0x200] sm:$0xff]   ;;  %v6512_v21 = vld [vmem:[#allocation5 + $0x2c8] sm:$0xff]  }
  0xba   : > { %v379_v11 = vpack.c.bf16 %v359_v9, %v359_v9  ;;  %v6510_v19 = vld [vmem:[#allocation5 + $0x280] sm:$0xff]   ;;  %v6513_v22 = vld [vmem:[#allocation5 + $0x208] sm:$0xff]   ;;  %v6515_v24 = vld [vmem:[#allocation5 + $0x250] sm:$0xff]  }
  0xbb   : > { %5921 = vmatpush3.bf16.msra.mxu0 %v6469_v26  ;;  %v6514_v23 = vld [vmem:[#allocation5 + $0x288] sm:$0xff]   ;;  %v6516_v25 = vld [vmem:[#allocation5 + $0x2d0] sm:$0xff]   ;;  %v6523_v32 = vld [vmem:[#allocation5 + $0x260] sm:$0xff]  }
  0xbc   : > { %5943 = vmatpush3.bf16.msra.mxu1 %v6470_v27  ;;  %5922 = vmatprep.subr.bf16.mxu0 %v6471_v28  ;;  %v6517_v26 = vld [vmem:[#allocation5 + $0x210] sm:$0xff]   ;;  %v6519_v28 = vld [vmem:[#allocation5 + $0x258] sm:$0xff]   ;;  %v6524_v33 = vld [vmem:[#allocation5 + $0x2e0] sm:$0xff]  }
  0xbd   : > { %5944 = vmatprep.subr.bf16.mxu1 %v6472_v29  ;;  %v6518_v27 = vld [vmem:[#allocation5 + $0x290] sm:$0xff]   ;;  %v6520_v29 = vld [vmem:[#allocation5 + $0x2d8] sm:$0xff]   ;;  %v6525_v34 = vld [vmem:[#allocation5 + $0x220] sm:$0xff]  }
  0xbe   : > { %v6526_v35 = vld [vmem:[#allocation5 + $0x2a0] sm:$0xff]   ;;  %v6527_v36 = vld [vmem:[#allocation5 + $0x268] sm:$0xff]  }
  0xbf   : > { %5923 = vmatpush3.bf16.msra.mxu0 %v6473_v30  ;;  %v6521_v30 = vld [vmem:[#allocation5 + $0x218] sm:$0xff]   ;;  %v6529_v38 = vld [vmem:[#allocation5 + $0x228] sm:$0xff]   ;;  %v6555_v8 = vld [vmem:[#allocation5 + $0x360] sm:$0xff]  }
  0xc0   : > { %5945 = vmatpush3.bf16.msra.mxu1 %v6474_v31  ;;  %5952 = vmatprep.subr.bf16.mxu0 %v6475_v40  ;;  %v6522_v31 = vld [vmem:[#allocation5 + $0x298] sm:$0xff]   ;;  %v6531_v40 = vld [vmem:[#allocation5 + $0x270] sm:$0xff]   ;;  %v6556_v9 = vld [vmem:[#allocation5 + $0x3e0] sm:$0xff]  }
  0xc1   : > { %5974 = vmatprep.subr.bf16.mxu1 %v6476_v41  ;;  %v6532_v41 = vld [vmem:[#allocation5 + $0x2f0] sm:$0xff]   ;;  %v6559_v12 = vld [vmem:[#allocation5 + $0x368] sm:$0xff]  }
  0xc2   : > { %1712 = vmatmul.mubr.bf16.vlgmr.msra.gmra.mrb[0].mxu0 %v372_v37  ;;  %v6528_v37 = vld [vmem:[#allocation5 + $0x2e8] sm:$0xff]  }
  0xc3   : > { %1752 = vmatmul.mubr.bf16.vlgmr.msra.gmra.mrb[0].mxu1 %v374_v39  ;;  %5953 = vmatpush3.bf16.msra.mxu0 %v6477_v42  ;;  %v6530_v39 = vld [vmem:[#allocation5 + $0x2a8] sm:$0xff]   ;;  %v6533_v42 = vld [vmem:[#allocation5 + $0x230] sm:$0xff]  }
  0xc4   : > { %5975 = vmatpush3.bf16.msra.mxu1 %v6478_v43  ;;  %5954 = vmatprep.subr.bf16.mxu0 %v6479_v44  ;;  %v6534_v43 = vld [vmem:[#allocation5 + $0x2b0] sm:$0xff]   ;;  %v6535_v44 = vld [vmem:[#allocation5 + $0x278] sm:$0xff]   ;;  %v6560_v13 = vld [vmem:[#allocation5 + $0x3e8] sm:$0xff]  }
  0xc5   : > { %5976 = vmatprep.subr.bf16.mxu1 %v6480_v45  ;;  %1791 = vmatprep.mubr.bf16.mxu0 %v377_v10  ;;  %v6536_v45 = vld [vmem:[#allocation5 + $0x2f8] sm:$0xff]   ;;  %v6557_v10 = vld [vmem:[#allocation5 + $0x320] sm:$0xff]  }
  0xc6   : > { %1831 = vmatprep.mubr.bf16.mxu1 %v379_v11  ;;  %v6558_v11 = vld [vmem:[#allocation5 + $0x3a0] sm:$0xff]  }
  0xc7   : > { %5955 = vmatpush3.bf16.msra.mxu0 %v6481_v46  ;;  %v6537_v46 = vld [vmem:[#allocation5 + $0x238] sm:$0xff]  }
  0xc8   : > { %5977 = vmatpush3.bf16.msra.mxu1 %v6482_v47  ;;  %5956 = vmatprep.subr.bf16.mxu0 %v6483_v48  ;;  %v6538_v47 = vld [vmem:[#allocation5 + $0x2b8] sm:$0xff]   ;;  %v361_v48 = vld [vmem:[%s7492_s10 + $0x48] sm:$0xff] }
  0xc9   : > { %5978 = vmatprep.subr.bf16.mxu1 %v6484_v49  ;;  %v381_v49 = vpack.c.bf16 %v361_v48, %v361_v48  ;;  %v6587_v48 = vld [vmem:[#allocation5 + $0x460] sm:$0xff]  }
  0xcb   : > { %5957 = vmatpush3.bf16.msra.mxu0 %v6485_v50  ;;  %v363_v50 = vld [vmem:[%s7492_s10 + $0x58] sm:$0xff] }
  0xcc   : > { %5979 = vmatpush3.bf16.msra.mxu1 %v6486_v51  ;;  %5958 = vmatprep.subr.bf16.mxu0 %v6487_v52  ;;  %v360_v51 = vld [vmem:[%s7492_s10 + $0x40] sm:$0xff]  ;;  %v362_v52 = vld [vmem:[%s7492_s10 + $0x50] sm:$0xff] }
  0xcd   : > { %5980 = vmatprep.subr.bf16.mxu1 %v6488_v53  ;;  %v383_v53 = vpack.c.bf16 %v363_v50, %v363_v50  ;;  %v6589_v50 = vld [vmem:[#allocation5 + $0x420] sm:$0xff]  }
  0xcf   : > { %5959 = vmatpush3.bf16.msra.mxu0 %v6489_v54  ;;  %v380_v54 = vpack.c.bf16 %v360_v51, %v360_v51  ;;  %v6590_v51 = vld [vmem:[#allocation5 + $0x4a0] sm:$0xff]  }
  0xd0   : > { %5981 = vmatpush3.bf16.msra.mxu1 %v6490_v55  ;;  %5960 = vmatprep.subr.bf16.mxu0 %v6491_v56  ;;  %v382_v55 = vpack.c.bf16 %v362_v52, %v362_v52  ;;  %v6539_v56 = vld [vmem:[#allocation5 + $0x340] sm:$0xff]   ;;  %v6591_v52 = vld [vmem:[#allocation5 + $0x468] sm:$0xff]  }
  0xd1   : > { %5982 = vmatprep.subr.bf16.mxu1 %v6492_v57  ;;  %v6540_v57 = vld [vmem:[#allocation5 + $0x3c0] sm:$0xff]  }
  0xd3   : > { %5961 = vmatpush3.bf16.msra.mxu0 %v6493_v58  ;;  %v6541_v58 = vld [vmem:[#allocation5 + $0x300] sm:$0xff]  }
  0xd4   : > { %5983 = vmatpush3.bf16.msra.mxu1 %v6494_v59  ;;  %5962 = vmatprep.subr.bf16.mxu0 %v6495_v60  ;;  %v6542_v59 = vld [vmem:[#allocation5 + $0x380] sm:$0xff]   ;;  %v6543_v60 = vld [vmem:[#allocation5 + $0x348] sm:$0xff]  }
  0xd5   : > { %5984 = vmatprep.subr.bf16.mxu1 %v6496_v61  ;;  %v6544_v61 = vld [vmem:[#allocation5 + $0x3c8] sm:$0xff]  }
  0xd7   : > { %5963 = vmatpush3.bf16.msra.mxu0 %v6497_v62  ;;  %v6545_v62 = vld [vmem:[#allocation5 + $0x308] sm:$0xff]  }
  0xd8   : > { %5985 = vmatpush3.bf16.msra.mxu1 %v6498_v63  ;;  %5964 = vmatprep.subr.bf16.mxu0 %v6499_v0  ;;  %v6546_v63 = vld [vmem:[#allocation5 + $0x388] sm:$0xff]   ;;  %v6547_v0 = vld [vmem:[#allocation5 + $0x350] sm:$0xff]  }
  0xd9   : > { %5986 = vmatprep.subr.bf16.mxu1 %v6500_v1  ;;  %v6548_v1 = vld [vmem:[#allocation5 + $0x3d0] sm:$0xff]  }
  0xdb   : > { %5965 = vmatpush3.bf16.msra.mxu0 %v6501_v2  ;;  %v6549_v2 = vld [vmem:[#allocation5 + $0x310] sm:$0xff]  }
  0xdc   : > { %5987 = vmatpush3.bf16.msra.mxu1 %v6502_v3  ;;  %5966 = vmatprep.subr.bf16.mxu0 %v6503_v4  ;;  %v6550_v3 = vld [vmem:[#allocation5 + $0x390] sm:$0xff]   ;;  %v6551_v4 = vld [vmem:[#allocation5 + $0x358] sm:$0xff]  }
  0xdd   : > { %5988 = vmatprep.subr.bf16.mxu1 %v6504_v5  ;;  %v6552_v5 = vld [vmem:[#allocation5 + $0x3d8] sm:$0xff]  }
  0xdf   : > { %5967 = vmatpush3.bf16.msra.mxu0 %v6505_v6  ;;  %v6553_v6 = vld [vmem:[#allocation5 + $0x318] sm:$0xff]  }
  0xe0   : > { %5989 = vmatpush3.bf16.msra.mxu1 %v6506_v7  ;;  %5996 = vmatprep.subr.bf16.mxu0 %v6507_v16  ;;  %v6554_v7 = vld [vmem:[#allocation5 + $0x398] sm:$0xff]   ;;  %v6563_v16 = vld [vmem:[#allocation5 + $0x370] sm:$0xff]  }
  0xe1   : > { %6018 = vmatprep.subr.bf16.mxu1 %v6508_v17  ;;  %v6564_v17 = vld [vmem:[#allocation5 + $0x3f0] sm:$0xff]  }
  0xe2   : > { %1792 = vmatmul.mubr.bf16.vlgmr.msra.gmra.mrb[4].mxu0 %v376_v14  ;;  %v6561_v14 = vld [vmem:[#allocation5 + $0x328] sm:$0xff]  }
  0xe3   : > { %1832 = vmatmul.mubr.bf16.vlgmr.msra.gmra.mrb[4].mxu1 %v378_v15  ;;  %5997 = vmatpush3.bf16.msra.mxu0 %v6509_v18  ;;  %v6562_v15 = vld [vmem:[#allocation5 + $0x3a8] sm:$0xff]   ;;  %v6565_v18 = vld [vmem:[#allocation5 + $0x330] sm:$0xff]  }
  0xe4   : > { %6019 = vmatpush3.bf16.msra.mxu1 %v6510_v19  ;;  %5998 = vmatprep.subr.bf16.mxu0 %v6511_v20  ;;  %v6566_v19 = vld [vmem:[#allocation5 + $0x3b0] sm:$0xff]   ;;  %v6567_v20 = vld [vmem:[#allocation5 + $0x378] sm:$0xff]  }
  0xe5   : > { %6020 = vmatprep.subr.bf16.mxu1 %v6512_v21  ;;  %1871 = vmatprep.mubr.bf16.mxu0 %v381_v49  ;;  %v6568_v21 = vld [vmem:[#allocation5 + $0x3f8] sm:$0xff]   ;;  %v6588_v49 = vld [vmem:[#allocation5 + $0x4e0] sm:$0xff]  }
  0xe6   : > { %1911 = vmatprep.mubr.bf16.mxu1 %v383_v53  ;;  %v6592_v53 = vld [vmem:[#allocation5 + $0x4e8] sm:$0xff]  }
  0xe7   : > { %5999 = vmatpush3.bf16.msra.mxu0 %v6513_v22  ;;  %v6569_v22 = vld [vmem:[#allocation5 + $0x338] sm:$0xff]  }
  0xe8   : > { %6021 = vmatpush3.bf16.msra.mxu1 %v6514_v23  ;;  %6000 = vmatprep.subr.bf16.mxu0 %v6515_v24  ;;  %v6570_v23 = vld [vmem:[#allocation5 + $0x3b8] sm:$0xff]   ;;  %v365_v24 = vld [vmem:[%s7492_s10 + $0x68] sm:$0xff] }
  0xe9   : > { %6022 = vmatprep.subr.bf16.mxu1 %v6516_v25  ;;  %v367_v25 = vld [vmem:[%s7492_s10 + $0x78] sm:$0xff] }
  0xeb   : > { %6001 = vmatpush3.bf16.msra.mxu0 %v6517_v26  ;;  %v364_v26 = vld [vmem:[%s7492_s10 + $0x60] sm:$0xff] }
  0xec   : > { %6023 = vmatpush3.bf16.msra.mxu1 %v6518_v27  ;;  %6002 = vmatprep.subr.bf16.mxu0 %v6519_v28  ;;  %v385_v27 = vpack.c.bf16 %v365_v24, %v365_v24  ;;  %v387_v28 = vpack.c.bf16 %v367_v25, %v367_v25  ;;  %v6629_v24 = vld [vmem:[#allocation7 + $0x284] ss:$80 sps:$4 sm:$0xff]   ;;  %v6632_v25 = vld [vmem:[#allocation7 + $0x28c] ss:$80 sps:$4 sm:$0xff]  }
  0xed   : > { %6024 = vmatprep.subr.bf16.mxu1 %v6520_v29  ;;  %v384_v29 = vpack.c.bf16 %v364_v26, %v364_v26  ;;  %v6627_v26 = vld [vmem:[#allocation7 + $0x280] ss:$80 sps:$4 sm:$0xff]  }
  0xef   : > { %6003 = vmatpush3.bf16.msra.mxu0 %v6521_v30  ;;  %v366_v30 = vld [vmem:[%s7492_s10 + $0x70] sm:$0xff] }
  0xf0   : > { %6025 = vmatpush3.bf16.msra.mxu1 %v6522_v31  ;;  %6004 = vmatprep.subr.bf16.mxu0 %v6523_v32  ;;  %v386_v31 = vpack.c.bf16 %v366_v30, %v366_v30  ;;  %v6571_v32 = vld [vmem:[#allocation5 + $0x440] sm:$0xff]  }
  0xf1   : > { %6026 = vmatprep.subr.bf16.mxu1 %v6524_v33  ;;  %v6572_v33 = vld [vmem:[#allocation5 + $0x4c0] sm:$0xff]  }
  0xf2   : > { %v6633_v30 = vld [vmem:[#allocation7 + $0x320] ss:$80 sps:$4 sm:$0xff]  }
  0xf3   : > { %6005 = vmatpush3.bf16.msra.mxu0 %v6525_v34  ;;  %v6573_v34 = vld [vmem:[#allocation5 + $0x400] sm:$0xff]  }
  0xf4   : > { %6027 = vmatpush3.bf16.msra.mxu1 %v6526_v35  ;;  %6006 = vmatprep.subr.bf16.mxu0 %v6527_v36  ;;  %v6574_v35 = vld [vmem:[#allocation5 + $0x480] sm:$0xff]   ;;  %v6575_v36 = vld [vmem:[#allocation5 + $0x448] sm:$0xff]  }
  0xf5   : > { %6028 = vmatprep.subr.bf16.mxu1 %v6528_v37  ;;  %v6576_v37 = vld [vmem:[#allocation5 + $0x4c8] sm:$0xff]  }
  0xf7   : > { %6007 = vmatpush3.bf16.msra.mxu0 %v6529_v38  ;;  %v6577_v38 = vld [vmem:[#allocation5 + $0x408] sm:$0xff]  }
  0xf8   : > { %6029 = vmatpush3.bf16.msra.mxu1 %v6530_v39  ;;  %6008 = vmatprep.subr.bf16.mxu0 %v6531_v40  ;;  %v6578_v39 = vld [vmem:[#allocation5 + $0x488] sm:$0xff]   ;;  %v6579_v40 = vld [vmem:[#allocation5 + $0x450] sm:$0xff]  }
  0xf9   : > { %6030 = vmatprep.subr.bf16.mxu1 %v6532_v41  ;;  %v6580_v41 = vld [vmem:[#allocation5 + $0x4d0] sm:$0xff]  }
  0xfb   : > { %6009 = vmatpush3.bf16.msra.mxu0 %v6533_v42  ;;  %v6581_v42 = vld [vmem:[#allocation5 + $0x410] sm:$0xff]  }
  0xfc   : > { %6031 = vmatpush3.bf16.msra.mxu1 %v6534_v43  ;;  %6010 = vmatprep.subr.bf16.mxu0 %v6535_v44  ;;  %v6582_v43 = vld [vmem:[#allocation5 + $0x490] sm:$0xff]   ;;  %v6583_v44 = vld [vmem:[#allocation5 + $0x458] sm:$0xff]  }
  0xfd   : > { %6032 = vmatprep.subr.bf16.mxu1 %v6536_v45  ;;  %v6584_v45 = vld [vmem:[#allocation5 + $0x4d8] sm:$0xff]  }
  0xff   : > { %6011 = vmatpush3.bf16.msra.mxu0 %v6537_v46  ;;  %v6585_v46 = vld [vmem:[#allocation5 + $0x418] sm:$0xff]  }
 0x100   : > { %6033 = vmatpush3.bf16.msra.mxu1 %v6538_v47  ;;  %6040 = vmatprep.subr.bf16.mxu0 %v6539_v56  ;;  %v6586_v47 = vld [vmem:[#allocation5 + $0x498] sm:$0xff]   ;;  %v6595_v56 = vld [vmem:[#allocation5 + $0x470] sm:$0xff]  }
 0x101   : > { %6062 = vmatprep.subr.bf16.mxu1 %v6540_v57  ;;  %v6596_v57 = vld [vmem:[#allocation5 + $0x4f0] sm:$0xff]  }
 0x102   : > { %1872 = vmatmul.mubr.bf16.vlgmr.msra.gmra.mrb[8].mxu0 %v380_v54  ;;  %v6593_v54 = vld [vmem:[#allocation5 + $0x428] sm:$0xff]  }
 0x103   : > { %1912 = vmatmul.mubr.bf16.vlgmr.msra.gmra.mrb[8].mxu1 %v382_v55  ;;  %6041 = vmatpush3.bf16.msra.mxu0 %v6541_v58  ;;  %v6594_v55 = vld [vmem:[#allocation5 + $0x4a8] sm:$0xff]   ;;  %v6597_v58 = vld [vmem:[#allocation5 + $0x430] sm:$0xff]  }
 0x104   : > { %6063 = vmatpush3.bf16.msra.mxu1 %v6542_v59  ;;  %6042 = vmatprep.subr.bf16.mxu0 %v6543_v60  ;;  %v6598_v59 = vld [vmem:[#allocation5 + $0x4b0] sm:$0xff]   ;;  %v6599_v60 = vld [vmem:[#allocation5 + $0x478] sm:$0xff]  }
 0x105   : > { %6064 = vmatprep.subr.bf16.mxu1 %v6544_v61  ;;  %1951 = vmatprep.mubr.bf16.mxu0 %v385_v27  ;;  %v6600_v61 = vld [vmem:[#allocation5 + $0x4f8] sm:$0xff]  }
 0x106   : > { %1991 = vmatprep.mubr.bf16.mxu1 %v387_v28  ;;  %v6630_v27 = vld [vmem:[#allocation7 + $0x288] ss:$80 sps:$4 sm:$0xff]   ;;  %v6635_v28 = vld [vmem:[#allocation7 + $0x324] ss:$80 sps:$4 sm:$0xff]  }
 0x107   : > { %6043 = vmatpush3.bf16.msra.mxu0 %v6545_v62  ;;  %v6601_v62 = vld [vmem:[#allocation5 + $0x438] sm:$0xff]  }
 0x108   : > { %6065 = vmatpush3.bf16.msra.mxu1 %v6546_v63  ;;  %6044 = vmatprep.subr.bf16.mxu0 %v6547_v0  ;;  %v6602_v63 = vld [vmem:[#allocation5 + $0x4b8] sm:$0xff]   ;;  %v369_v0 = vld [vmem:[%s7492_s10 + $0x88] sm:$0xff] }
 0x109   : > { %6066 = vmatprep.subr.bf16.mxu1 %v6548_v1  ;;  %v371_v1 = vld [vmem:[%s7492_s10 + $0x98] sm:$0xff] }
 0x10b   : > { %6045 = vmatpush3.bf16.msra.mxu0 %v6549_v2  ;;  %v389_v2 = vpack.c.bf16 %v369_v0, %v369_v0 }
 0x10c   : > { %6067 = vmatpush3.bf16.msra.mxu1 %v6550_v3  ;;  %6046 = vmatprep.subr.bf16.mxu0 %v6551_v4  ;;  %v391_v3 = vpack.c.bf16 %v371_v1, %v371_v1  ;;  %v368_v4 = vld [vmem:[%s7492_s10 + $0x80] sm:$0xff] }
 0x10d   : > { %6068 = vmatprep.subr.bf16.mxu1 %v6552_v5  ;;  %v370_v5 = vld [vmem:[%s7492_s10 + $0x90] sm:$0xff]  ;;  %s7149_s10 = sshll.u32 %s7231_s30, 4  ;;  %s7150_s10 = int_to_ptr.vmem [resolvable:$false] %s7149_s10 }
 0x10e   : > { %s7151_s8 = scalar_lea.vmem %s7150_s10, 128  ;;  %p7152_p12 = scmp.lt.s32.totalorder %s7627_s28, %s7150_s10 }
 0x10f   : > { %6047 = vmatpush3.bf16.msra.mxu0 %v6553_v6  ;;  %v388_v6 = vpack.c.bf16 %v368_v4, %v368_v4  ;;  %p7153_p3 = scmp.lt.s32.totalorder %s7151_s8, %s7145_s18 }
 0x110   : > { %6069 = vmatpush3.bf16.msra.mxu1 %v6554_v7  ;;  %6048 = vmatprep.subr.bf16.mxu0 %v6555_v8  ;;  %v390_v7 = vpack.c.bf16 %v370_v5, %v370_v5  ;;  %v6603_v8 = vld [vmem:[#allocation7] ss:$80 sps:$4 sm:$0xff]  }
 0x111   : > { %6070 = vmatprep.subr.bf16.mxu1 %v6556_v9  ;;  %v6605_v9 = vld [vmem:[#allocation7 + $0x4] ss:$80 sps:$4 sm:$0xff]   ;;  %p7154_p13 = por %p7153_p3, %p7152_p12 }
 0x113   : > { %6049 = vmatpush3.bf16.msra.mxu0 %v6557_v10  ;;  %v6606_v10 = vld [vmem:[#allocation7 + $0x8] ss:$80 sps:$4 sm:$0xff]   ;;  %p7155_p0 = pnand %p7154_p13, %p7148_p9 }
 0x114   : > { %6071 = vmatpush3.bf16.msra.mxu1 %v6558_v11  ;;  %6050 = vmatprep.subr.bf16.mxu0 %v6559_v12  ;;  %v6608_v11 = vld [vmem:[#allocation7 + $0xc] ss:$80 sps:$4 sm:$0xff]   ;;  %v6611_v12 = vld [vmem:[#allocation7 + $0xa4] ss:$80 sps:$4 sm:$0xff]  }
 0x115   : > { %6072 = vmatprep.subr.bf16.mxu1 %v6560_v13  ;;  %v6614_v13 = vld [vmem:[#allocation7 + $0xac] ss:$80 sps:$4 sm:$0xff]  }
 0x117   : > { %6051 = vmatpush3.bf16.msra.mxu0 %v6561_v14  ;;  %v6609_v14 = vld [vmem:[#allocation7 + $0xa0] ss:$80 sps:$4 sm:$0xff]  }
 0x118   : > { %6073 = vmatpush3.bf16.msra.mxu1 %v6562_v15  ;;  %6052 = vmatprep.subr.bf16.mxu0 %v6563_v16  ;;  %v6612_v15 = vld [vmem:[#allocation7 + $0xa8] ss:$80 sps:$4 sm:$0xff]   ;;  %v6617_v16 = vld [vmem:[#allocation7 + $0x144] ss:$80 sps:$4 sm:$0xff]  }
 0x119   : > { %6074 = vmatprep.subr.bf16.mxu1 %v6564_v17  ;;  %v6620_v17 = vld [vmem:[#allocation7 + $0x14c] ss:$80 sps:$4 sm:$0xff]  }
 0x11b   : > { %6053 = vmatpush3.bf16.msra.mxu0 %v6565_v18  ;;  %v6615_v18 = vld [vmem:[#allocation7 + $0x140] ss:$80 sps:$4 sm:$0xff]  }
 0x11c   : > { %6075 = vmatpush3.bf16.msra.mxu1 %v6566_v19  ;;  %6054 = vmatprep.subr.bf16.mxu0 %v6567_v20  ;;  %v6618_v19 = vld [vmem:[#allocation7 + $0x148] ss:$80 sps:$4 sm:$0xff]   ;;  %v6623_v20 = vld [vmem:[#allocation7 + $0x1e4] ss:$80 sps:$4 sm:$0xff]  }
 0x11d   : > { %6076 = vmatprep.subr.bf16.mxu1 %v6568_v21  ;;  %v6626_v21 = vld [vmem:[#allocation7 + $0x1ec] ss:$80 sps:$4 sm:$0xff]  }
 0x11f   : > { %6055 = vmatpush3.bf16.msra.mxu0 %v6569_v22  ;;  %v6621_v22 = vld [vmem:[#allocation7 + $0x1e0] ss:$80 sps:$4 sm:$0xff]  }
 0x120   : > { %6077 = vmatpush3.bf16.msra.mxu1 %v6570_v23  ;;  %6084 = vmatprep.subr.bf16.mxu0 %v6571_v32  ;;  %v6624_v23 = vld [vmem:[#allocation7 + $0x1e8] ss:$80 sps:$4 sm:$0xff]   ;;  %v5422_v32 = vld [vmem:[%s7671_s2] ss:$0 sm:$0xff] }
 0x121   : > { %6106 = vmatprep.subr.bf16.mxu1 %v6572_v33 }
 0x122   : > { %1952 = vmatmul.mubr.bf16.vlgmr.msra.gmra.mrb[12].mxu0 %v384_v29  ;;  %v6638_v29 = vld [vmem:[#allocation7 + $0x32c] ss:$80 sps:$4 sm:$0xff]  }
 0x123   : > { %1992 = vmatmul.mubr.bf16.vlgmr.msra.gmra.mrb[12].mxu1 %v386_v31  ;;  %6085 = vmatpush3.bf16.msra.mxu0 %v6573_v34  ;;  %v6636_v31 = vld [vmem:[#allocation7 + $0x328] ss:$80 sps:$4 sm:$0xff]  }
 0x124   : > { %6107 = vmatpush3.bf16.msra.mxu1 %v6574_v35  ;;  %6086 = vmatprep.subr.bf16.mxu0 %v6575_v36 }
 0x125   : > { %6108 = vmatprep.subr.bf16.mxu1 %v6576_v37  ;;  %2031 = vmatprep.mubr.bf16.mxu0 %v389_v2 }
 0x126   : > { %2071 = vmatprep.mubr.bf16.mxu1 %v391_v3 }
 0x127   : > { %6087 = vmatpush3.bf16.msra.mxu0 %v6577_v38 }
 0x128   : > { %6109 = vmatpush3.bf16.msra.mxu1 %v6578_v39  ;;  %6088 = vmatprep.subr.bf16.mxu0 %v6579_v40 }
 0x129   : > { %6110 = vmatprep.subr.bf16.mxu1 %v6580_v41 }
 0x12b   : > { %6089 = vmatpush3.bf16.msra.mxu0 %v6581_v42 }
 0x12c   : > { %6111 = vmatpush3.bf16.msra.mxu1 %v6582_v43  ;;  %6090 = vmatprep.subr.bf16.mxu0 %v6583_v44 }
 0x12d   : > { %6112 = vmatprep.subr.bf16.mxu1 %v6584_v45  ;;  %v6641_v45 = vld [vmem:[#allocation7 + $0x3c4] ss:$80 sps:$4 sm:$0xff]  }
 0x12f   : > { %6091 = vmatpush3.bf16.msra.mxu0 %v6585_v46  ;;  %v6644_v46 = vld [vmem:[#allocation7 + $0x3cc] ss:$80 sps:$4 sm:$0xff]  }
 0x130   : > { %6113 = vmatpush3.bf16.msra.mxu1 %v6586_v47  ;;  %6092 = vmatprep.subr.bf16.mxu0 %v6587_v48  ;;  %v6639_v47 = vld [vmem:[#allocation7 + $0x3c0] ss:$80 sps:$4 sm:$0xff]   ;;  %v6642_v48 = vld [vmem:[#allocation7 + $0x3c8] ss:$80 sps:$4 sm:$0xff]  }
 0x131   : > { %6114 = vmatprep.subr.bf16.mxu1 %v6588_v49  ;;  %v6647_v49 = vld [vmem:[#allocation7 + $0x464] ss:$80 sps:$4 sm:$0xff]  }
 0x133   : > { %6093 = vmatpush3.bf16.msra.mxu0 %v6589_v50  ;;  %v6650_v50 = vld [vmem:[#allocation7 + $0x46c] ss:$80 sps:$4 sm:$0xff]  }
 0x134   : > { %6115 = vmatpush3.bf16.msra.mxu1 %v6590_v51  ;;  %6094 = vmatprep.subr.bf16.mxu0 %v6591_v52  ;;  %v6645_v51 = vld [vmem:[#allocation7 + $0x460] ss:$80 sps:$4 sm:$0xff]   ;;  %v6648_v52 = vld [vmem:[#allocation7 + $0x468] ss:$80 sps:$4 sm:$0xff]  }
 0x135   : > { %6116 = vmatprep.subr.bf16.mxu1 %v6592_v53  ;;  %v6653_v53 = vld [vmem:[#allocation7 + $0x14] ss:$80 sps:$4 sm:$0xff]  }
 0x137   : > { %6095 = vmatpush3.bf16.msra.mxu0 %v6593_v54  ;;  %v7230_v54 = vmov 0  }
 0x138   : > { %6117 = vmatpush3.bf16.msra.mxu1 %v6594_v55  ;;  %6096 = vmatprep.subr.bf16.mxu0 %v6595_v56  ;;  %v6656_v55 = vld [vmem:[#allocation7 + $0x1c] ss:$80 sps:$4 sm:$0xff]  }
 0x139   : > { %6118 = vmatprep.subr.bf16.mxu1 %v6596_v57 }
 0x13b   : > { %6097 = vmatpush3.bf16.msra.mxu0 %v6597_v58 }
 0x13c   : > { %6119 = vmatpush3.bf16.msra.mxu1 %v6598_v59  ;;  %6098 = vmatprep.subr.bf16.mxu0 %v6599_v60 }
 0x13d   : > { %6120 = vmatprep.subr.bf16.mxu1 %v6600_v61 }
 0x13f   : > { %6099 = vmatpush3.bf16.msra.mxu0 %v6601_v62 }
 0x140   : > { %6121 = vmatpush3.bf16.msra.mxu1 %v6602_v63  ;;  %3147 = vmatprep.subr.bf16.mxu0 %v6605_v9 }
 0x141   : > { %3188 = vmatprep.subr.bf16.mxu1 %v6608_v11 }
 0x142   : > { %2032 = vmatmul.mubr.bf16.vlgmr.msra.gmra.mrb[16].mxu0 %v388_v6 }
 0x143   : > { %2072 = vmatmul.mubr.bf16.vlgmr.msra.gmra.mrb[16].mxu1 %v390_v7  ;;  %3148 = vmatpush1.bf16.msra.mxu0 %v6603_v8 }
 0x144   : > { %3189 = vmatpush1.bf16.msra.mxu1 %v6606_v10  ;;  %3149 = vmatprep.subr.bf16.mxu0 %v6611_v12 }
 0x145   : > { %3190 = vmatprep.subr.bf16.mxu1 %v6614_v13  ;;  %3179 = vmatprep.mubr.bf16.mxu0 %v7230_v54 }
 0x146   : > { %3220 = vmatprep.mubr.bf16.mxu1 %v7230_v54 }
 0x147   : > { %3150 = vmatpush1.bf16.msra.mxu0 %v6609_v14 }
 0x148   : > { %3191 = vmatpush1.bf16.msra.mxu1 %v6612_v15  ;;  %3151 = vmatprep.subr.bf16.mxu0 %v6617_v16 }
 0x149   : > { %3192 = vmatprep.subr.bf16.mxu1 %v6620_v17 }
 0x14b   : > { %3152 = vmatpush1.bf16.msra.mxu0 %v6615_v18 }
 0x14c   : > { %3193 = vmatpush1.bf16.msra.mxu1 %v6618_v19  ;;  %3153 = vmatprep.subr.bf16.mxu0 %v6623_v20 }
 0x14d   : > { %3194 = vmatprep.subr.bf16.mxu1 %v6626_v21 }
 0x14f   : > { %3154 = vmatpush1.bf16.msra.mxu0 %v6621_v22 }
 0x150   : > { %3195 = vmatpush1.bf16.msra.mxu1 %v6624_v23  ;;  %3155 = vmatprep.subr.bf16.mxu0 %v6629_v24 }
 0x151   : > { %3196 = vmatprep.subr.bf16.mxu1 %v6632_v25 }
 0x153   : > { %3156 = vmatpush1.bf16.msra.mxu0 %v6627_v26 }
 0x154   : > { %3197 = vmatpush1.bf16.msra.mxu1 %v6630_v27  ;;  %3157 = vmatprep.subr.bf16.mxu0 %v6635_v28 }
 0x155   : > { %3198 = vmatprep.subr.bf16.mxu1 %v6638_v29 }
 0x157   : > { %3158 = vmatpush1.bf16.msra.mxu0 %v6633_v30 }
 0x158   : > { %3199 = vmatpush1.bf16.msra.mxu1 %v6636_v31  ;;  %3159 = vmatprep.subr.bf16.mxu0 %v6641_v45  ;;  %v6662_v45 = vld [vmem:[#allocation7 + $0xbc] ss:$80 sps:$4 sm:$0xff]  }
 0x159   : > { %3200 = vmatprep.subr.bf16.mxu1 %v6644_v46  ;;  %v6657_v46 = vld [vmem:[#allocation7 + $0xb0] ss:$80 sps:$4 sm:$0xff]  }
 0x15b   : > { %3160 = vmatpush1.bf16.msra.mxu0 %v6639_v47  ;;  %v6660_v47 = vld [vmem:[#allocation7 + $0xb8] ss:$80 sps:$4 sm:$0xff]  }
 0x15c   : > { %3201 = vmatpush1.bf16.msra.mxu1 %v6642_v48  ;;  %3161 = vmatprep.subr.bf16.mxu0 %v6647_v49  ;;  %v6665_v48 = vld [vmem:[#allocation7 + $0x154] ss:$80 sps:$4 sm:$0xff]   ;;  %v6668_v49 = vld [vmem:[#allocation7 + $0x15c] ss:$80 sps:$4 sm:$0xff]  }
 0x15d   : > { %3202 = vmatprep.subr.bf16.mxu1 %v6650_v50  ;;  %v6663_v50 = vld [vmem:[#allocation7 + $0x150] ss:$80 sps:$4 sm:$0xff]  }
 0x15f   : > { %3162 = vmatpush1.bf16.msra.mxu0 %v6645_v51  ;;  %v6666_v51 = vld [vmem:[#allocation7 + $0x158] ss:$80 sps:$4 sm:$0xff]  }
 0x160   : > { %3203 = vmatpush1.bf16.msra.mxu1 %v6648_v52  ;;  %3229 = vmatprep.subr.bf16.mxu0 %v6653_v53  ;;  %v6671_v52 = vld [vmem:[#allocation7 + $0x1f4] ss:$80 sps:$4 sm:$0xff]   ;;  %v6674_v53 = vld [vmem:[#allocation7 + $0x1fc] ss:$80 sps:$4 sm:$0xff]  }
 0x161   : > { %3270 = vmatprep.subr.bf16.mxu1 %v6656_v55  ;;  %v6669_v55 = vld [vmem:[#allocation7 + $0x1f0] ss:$80 sps:$4 sm:$0xff]  }
 0x195   : > { %v5924_v33 = vpop.f32.mrb[0].mxu0 }
 0x196   : > { %v5946_v34 = vpop.f32.mrb[0].mxu1  ;;  %v5925_v35 = vpop.f32.mrb[1].mxu0 }
 0x197   : > { %v5947_v36 = vpop.f32.mrb[1].mxu1  ;;  %v5926_v37 = vadd.f32 %v5925_v35, %v5924_v33  ;;  %v5927_v39 = vpop.f32.mrb[2].mxu0 }
 0x198   : > { %v5948_v38 = vadd.f32 %v5947_v36, %v5946_v34  ;;  %v5949_v40 = vpop.f32.mrb[2].mxu1  ;;  %v5928_v41 = vpop.f32.mrb[3].mxu0 }
 0x199   : > { %v5950_v42 = vpop.f32.mrb[3].mxu1  ;;  %v1714_v43 = vadd.f32 %v5926_v37, %v5422_v32  ;;  %v6651_v41 = vld [vmem:[#allocation7 + $0x10] ss:$80 sps:$4 sm:$0xff]  }
 0x19a   : > { %v6654_v42 = vld [vmem:[#allocation7 + $0x18] ss:$80 sps:$4 sm:$0xff]  }
 0x19b   : > { %v1754_v44 = vadd.f32 %v5948_v38, %v1714_v43 }
 0x1b5   : > { %v5968_v56 = vpop.f32.mrb[4].mxu0 }
 0x1b6   : > { %v5990_v57 = vpop.f32.mrb[4].mxu1  ;;  %v5969_v58 = vpop.f32.mrb[5].mxu0 }
 0x1b7   : > { %v5970_v59 = vadd.f32 %v5969_v58, %v5968_v56  ;;  %v5991_v60 = vpop.f32.mrb[5].mxu1  ;;  %v5971_v61 = vpop.f32.mrb[6].mxu0  ;;  %v6672_v56 = vld [vmem:[#allocation7 + $0x1f8] ss:$80 sps:$4 sm:$0xff]   ;;  %v6680_v58 = vld [vmem:[#allocation7 + $0x29c] ss:$80 sps:$4 sm:$0xff]  }
 0x1b8   : > { %v5992_v62 = vadd.f32 %v5991_v60, %v5990_v57  ;;  %v5993_v63 = vpop.f32.mrb[6].mxu1  ;;  %v5972_v0 = vpop.f32.mrb[7].mxu0  ;;  %v6677_v57 = vld [vmem:[#allocation7 + $0x294] ss:$80 sps:$4 sm:$0xff]   ;;  %v6678_v60 = vld [vmem:[#allocation7 + $0x298] ss:$80 sps:$4 sm:$0xff]  }
 0x1b9   : > { %v1794_v1 = vadd.f32 %v5970_v59, %v1754_v44  ;;  %v5994_v2 = vpop.f32.mrb[7].mxu1  ;;  %v6659_v44 = vld [vmem:[#allocation7 + $0xb4] ss:$80 sps:$4 sm:$0xff]   ;;  %v6675_v59 = vld [vmem:[#allocation7 + $0x290] ss:$80 sps:$4 sm:$0xff]  }
 0x1ba   : > { %v6683_v61 = vld [vmem:[#allocation7 + $0x334] ss:$80 sps:$4 sm:$0xff]   ;;  %v6681_v63 = vld [vmem:[#allocation7 + $0x330] ss:$80 sps:$4 sm:$0xff]   ;;  %v6684_v0 = vld [vmem:[#allocation7 + $0x338] ss:$80 sps:$4 sm:$0xff]  }
 0x1bb   : > { %v1834_v3 = vadd.f32 %v5992_v62, %v1794_v1  ;;  %v6686_v62 = vld [vmem:[#allocation7 + $0x33c] ss:$80 sps:$4 sm:$0xff]   ;;  %v6689_v1 = vld [vmem:[#allocation7 + $0x3d4] ss:$80 sps:$4 sm:$0xff]  }
 0x1bc   : > { %v6692_v2 = vld [vmem:[#allocation7 + $0x3dc] ss:$80 sps:$4 sm:$0xff]  }
 0x1d5   : > { %v6012_v4 = vpop.f32.mrb[8].mxu0 }
 0x1d6   : > { %v6034_v5 = vpop.f32.mrb[8].mxu1  ;;  %v6013_v6 = vpop.f32.mrb[9].mxu0 }
 0x1d7   : > { %v6014_v7 = vadd.f32 %v6013_v6, %v6012_v4  ;;  %v6035_v8 = vpop.f32.mrb[9].mxu1  ;;  %v6015_v9 = vpop.f32.mrb[10].mxu0  ;;  %v6690_v4 = vld [vmem:[#allocation7 + $0x3d8] ss:$80 sps:$4 sm:$0xff]   ;;  %v6698_v6 = vld [vmem:[#allocation7 + $0x47c] ss:$80 sps:$4 sm:$0xff]  }
 0x1d8   : > { %v6036_v10 = vadd.f32 %v6035_v8, %v6034_v5  ;;  %v6037_v11 = vpop.f32.mrb[10].mxu1  ;;  %v6016_v12 = vpop.f32.mrb[11].mxu0  ;;  %v6695_v5 = vld [vmem:[#allocation7 + $0x474] ss:$80 sps:$4 sm:$0xff]   ;;  %v6696_v8 = vld [vmem:[#allocation7 + $0x478] ss:$80 sps:$4 sm:$0xff]  }
 0x1d9   : > { %v1874_v13 = vadd.f32 %v6014_v7, %v1834_v3  ;;  %v6038_v14 = vpop.f32.mrb[11].mxu1  ;;  %v6687_v3 = vld [vmem:[#allocation7 + $0x3d0] ss:$80 sps:$4 sm:$0xff]   ;;  %v6701_v9 = vld [vmem:[#allocation7 + $0x24] ss:$80 sps:$4 sm:$0xff]  }
 0x1da   : > { %v6693_v7 = vld [vmem:[#allocation7 + $0x470] ss:$80 sps:$4 sm:$0xff]   ;;  %v6702_v12 = vld [vmem:[#allocation7 + $0x28] ss:$80 sps:$4 sm:$0xff]   ;;  %v6710_v14 = vld [vmem:[#allocation7 + $0xcc] ss:$80 sps:$4 sm:$0xff]  }
 0x1db   : > { %v1914_v15 = vadd.f32 %v6036_v10, %v1874_v13  ;;  %v6704_v10 = vld [vmem:[#allocation7 + $0x2c] ss:$80 sps:$4 sm:$0xff]   ;;  %v6699_v11 = vld [vmem:[#allocation7 + $0x20] ss:$80 sps:$4 sm:$0xff]   ;;  %v6707_v13 = vld [vmem:[#allocation7 + $0xc4] ss:$80 sps:$4 sm:$0xff]  }
 0x1f5   : > { %v6056_v16 = vpop.f32.mrb[12].mxu0 }
 0x1f6   : > { %v6078_v17 = vpop.f32.mrb[12].mxu1  ;;  %v6057_v18 = vpop.f32.mrb[13].mxu0 }
 0x1f7   : > { %v6079_v19 = vpop.f32.mrb[13].mxu1  ;;  %v6058_v20 = vadd.f32 %v6057_v18, %v6056_v16  ;;  %v6059_v22 = vpop.f32.mrb[14].mxu0  ;;  %v6708_v16 = vld [vmem:[#allocation7 + $0xc8] ss:$80 sps:$4 sm:$0xff]   ;;  %v6716_v18 = vld [vmem:[#allocation7 + $0x16c] ss:$80 sps:$4 sm:$0xff]  }
 0x1f8   : > { %v6080_v21 = vadd.f32 %v6079_v19, %v6078_v17  ;;  %v6081_v23 = vpop.f32.mrb[14].mxu1  ;;  %v6060_v24 = vpop.f32.mrb[15].mxu0  ;;  %v6713_v17 = vld [vmem:[#allocation7 + $0x164] ss:$80 sps:$4 sm:$0xff]   ;;  %v6711_v19 = vld [vmem:[#allocation7 + $0x160] ss:$80 sps:$4 sm:$0xff]  }
 0x1f9   : > { %v6082_v25 = vpop.f32.mrb[15].mxu1  ;;  %v1954_v26 = vadd.f32 %v6058_v20, %v1914_v15  ;;  %v6705_v15 = vld [vmem:[#allocation7 + $0xc0] ss:$80 sps:$4 sm:$0xff]   ;;  %v6714_v20 = vld [vmem:[#allocation7 + $0x168] ss:$80 sps:$4 sm:$0xff]  }
 0x1fa   : > { %v6722_v22 = vld [vmem:[#allocation7 + $0x20c] ss:$80 sps:$4 sm:$0xff]   ;;  %v6717_v23 = vld [vmem:[#allocation7 + $0x200] ss:$80 sps:$4 sm:$0xff]   ;;  %v6720_v24 = vld [vmem:[#allocation7 + $0x208] ss:$80 sps:$4 sm:$0xff]  }
 0x1fb   : > { %v1994_v27 = vadd.f32 %v6080_v21, %v1954_v26  ;;  %v6719_v21 = vld [vmem:[#allocation7 + $0x204] ss:$80 sps:$4 sm:$0xff]   ;;  %v6728_v26 = vld [vmem:[#allocation7 + $0x2ac] ss:$80 sps:$4 sm:$0xff]  }
 0x1fc   : > { %v6725_v25 = vld [vmem:[#allocation7 + $0x2a4] ss:$80 sps:$4 sm:$0xff]  }
 0x215   : > { %v6100_v28 = vpop.f32.mrb[16].mxu0 }
 0x216   : > { %v6122_v29 = vpop.f32.mrb[16].mxu1  ;;  %v6101_v30 = vpop.f32.mrb[17].mxu0 }
 0x217   : > { %v6102_v31 = vadd.f32 %v6101_v30, %v6100_v28  ;;  %v6123_v32 = vpop.f32.mrb[17].mxu1  ;;  %v6103_v33 = vpop.f32.mrb[18].mxu0  ;;  %v6726_v28 = vld [vmem:[#allocation7 + $0x2a8] ss:$80 sps:$4 sm:$0xff]   ;;  %v6734_v30 = vld [vmem:[#allocation7 + $0x34c] ss:$80 sps:$4 sm:$0xff]  }
 0x218   : > { %v6124_v34 = vadd.f32 %v6123_v32, %v6122_v29  ;;  %v6125_v35 = vpop.f32.mrb[18].mxu1  ;;  %v6104_v36 = vpop.f32.mrb[19].mxu0  ;;  %v6731_v29 = vld [vmem:[#allocation7 + $0x344] ss:$80 sps:$4 sm:$0xff]   ;;  %v6732_v32 = vld [vmem:[#allocation7 + $0x348] ss:$80 sps:$4 sm:$0xff]  }
 0x219   : > { %v2034_v37 = vadd.f32 %v6102_v31, %v1994_v27  ;;  %v6126_v38 = vpop.f32.mrb[19].mxu1  ;;  %v6723_v27 = vld [vmem:[#allocation7 + $0x2a0] ss:$80 sps:$4 sm:$0xff]   ;;  %v6737_v33 = vld [vmem:[#allocation7 + $0x3e4] ss:$80 sps:$4 sm:$0xff]  }
 0x21a   : > { %v6729_v31 = vld [vmem:[#allocation7 + $0x340] ss:$80 sps:$4 sm:$0xff]   ;;  %v6738_v36 = vld [vmem:[#allocation7 + $0x3e8] ss:$80 sps:$4 sm:$0xff]   ;;  %v6746_v38 = vld [vmem:[#allocation7 + $0x48c] ss:$80 sps:$4 sm:$0xff]  }
 0x21b   : > { %v2074_v39 = vadd.f32 %v6124_v34, %v2034_v37  ;;  %v6740_v34 = vld [vmem:[#allocation7 + $0x3ec] ss:$80 sps:$4 sm:$0xff]   ;;  %v6735_v35 = vld [vmem:[#allocation7 + $0x3e0] ss:$80 sps:$4 sm:$0xff]   ;;  %v6743_v37 = vld [vmem:[#allocation7 + $0x484] ss:$80 sps:$4 sm:$0xff]  }
 0x21d   : > { %v2079_v40 = vmax.f32 %v2074_v39, 0.0  ;;  %v6741_v39 = vld [vmem:[#allocation7 + $0x480] ss:$80 sps:$4 sm:$0xff]  }
 0x21f   : > { %v7531_v43 = vpack.c.bf16 %v2079_v40, %v2079_v40  ;;  %v6744_v40 = vld [vmem:[#allocation7 + $0x488] ss:$80 sps:$4 sm:$0xff]  }
 0x221   : > { %3180 = vmatmul.mubr.bf16.vlgmr.msra.gmra.mrb[20].mxu0 %v7531_v43  ;;  %3221 = vmatmul.mubr.bf16.vlgmr.msra.gmra.mrb[20].mxu1 %v7531_v43 }
 0x222   : > { %3230 = vmatpush1.bf16.msra.mxu0 %v6651_v41  ;;  %3271 = vmatpush1.bf16.msra.mxu1 %v6654_v42  ;;  %v6749_v41 = vld [vmem:[#allocation7 + $0x34] ss:$80 sps:$4 sm:$0xff]   ;;  %v6752_v42 = vld [vmem:[#allocation7 + $0x3c] ss:$80 sps:$4 sm:$0xff]  }
 0x223   : > { %3231 = vmatprep.subr.bf16.mxu0 %v6659_v44  ;;  %3272 = vmatprep.subr.bf16.mxu1 %v6662_v45  ;;  %v6747_v44 = vld [vmem:[#allocation7 + $0x30] ss:$80 sps:$4 sm:$0xff]   ;;  %v6750_v45 = vld [vmem:[#allocation7 + $0x38] ss:$80 sps:$4 sm:$0xff]  }
 0x224   : > { %3261 = vmatprep.mubr.bf16.mxu0 %v7230_v54  ;;  %3302 = vmatprep.mubr.bf16.mxu1 %v7230_v54 }
 0x226   : > { %3232 = vmatpush1.bf16.msra.mxu0 %v6657_v46  ;;  %3273 = vmatpush1.bf16.msra.mxu1 %v6660_v47  ;;  %v6755_v46 = vld [vmem:[#allocation7 + $0xd4] ss:$80 sps:$4 sm:$0xff]   ;;  %v6758_v47 = vld [vmem:[#allocation7 + $0xdc] ss:$80 sps:$4 sm:$0xff]  }
 0x227   : > { %3233 = vmatprep.subr.bf16.mxu0 %v6665_v48  ;;  %3274 = vmatprep.subr.bf16.mxu1 %v6668_v49  ;;  %v6753_v48 = vld [vmem:[#allocation7 + $0xd0] ss:$80 sps:$4 sm:$0xff]   ;;  %v6756_v49 = vld [vmem:[#allocation7 + $0xd8] ss:$80 sps:$4 sm:$0xff]  }
 0x22a   : > { %3234 = vmatpush1.bf16.msra.mxu0 %v6663_v50  ;;  %3275 = vmatpush1.bf16.msra.mxu1 %v6666_v51  ;;  %v6761_v50 = vld [vmem:[#allocation7 + $0x174] ss:$80 sps:$4 sm:$0xff]   ;;  %v6764_v51 = vld [vmem:[#allocation7 + $0x17c] ss:$80 sps:$4 sm:$0xff]  }
 0x22b   : > { %3235 = vmatprep.subr.bf16.mxu0 %v6671_v52  ;;  %3276 = vmatprep.subr.bf16.mxu1 %v6674_v53  ;;  %v6759_v52 = vld [vmem:[#allocation7 + $0x170] ss:$80 sps:$4 sm:$0xff]   ;;  %v6762_v53 = vld [vmem:[#allocation7 + $0x178] ss:$80 sps:$4 sm:$0xff]  }
 0x22e   : > { %3236 = vmatpush1.bf16.msra.mxu0 %v6669_v55  ;;  %3277 = vmatpush1.bf16.msra.mxu1 %v6672_v56  ;;  %v6767_v55 = vld [vmem:[#allocation7 + $0x214] ss:$80 sps:$4 sm:$0xff]   ;;  %v6770_v56 = vld [vmem:[#allocation7 + $0x21c] ss:$80 sps:$4 sm:$0xff]  }
 0x22f   : > { %3237 = vmatprep.subr.bf16.mxu0 %v6677_v57  ;;  %3278 = vmatprep.subr.bf16.mxu1 %v6680_v58  ;;  %v6765_v57 = vld [vmem:[#allocation7 + $0x210] ss:$80 sps:$4 sm:$0xff]   ;;  %v6768_v58 = vld [vmem:[#allocation7 + $0x218] ss:$80 sps:$4 sm:$0xff]  }
 0x232   : > { %3238 = vmatpush1.bf16.msra.mxu0 %v6675_v59  ;;  %3279 = vmatpush1.bf16.msra.mxu1 %v6678_v60  ;;  %v6773_v59 = vld [vmem:[#allocation7 + $0x2b4] ss:$80 sps:$4 sm:$0xff]   ;;  %v6776_v60 = vld [vmem:[#allocation7 + $0x2bc] ss:$80 sps:$4 sm:$0xff]  }
 0x233   : > { %3239 = vmatprep.subr.bf16.mxu0 %v6683_v61  ;;  %3280 = vmatprep.subr.bf16.mxu1 %v6686_v62  ;;  %v6771_v61 = vld [vmem:[#allocation7 + $0x2b0] ss:$80 sps:$4 sm:$0xff]   ;;  %v6774_v62 = vld [vmem:[#allocation7 + $0x2b8] ss:$80 sps:$4 sm:$0xff]  }
 0x236   : > { %3240 = vmatpush1.bf16.msra.mxu0 %v6681_v63  ;;  %3281 = vmatpush1.bf16.msra.mxu1 %v6684_v0  ;;  %v6779_v63 = vld [vmem:[#allocation7 + $0x354] ss:$80 sps:$4 sm:$0xff]   ;;  %v6782_v0 = vld [vmem:[#allocation7 + $0x35c] ss:$80 sps:$4 sm:$0xff]  }
 0x237   : > { %3241 = vmatprep.subr.bf16.mxu0 %v6689_v1  ;;  %3282 = vmatprep.subr.bf16.mxu1 %v6692_v2  ;;  %v6777_v1 = vld [vmem:[#allocation7 + $0x350] ss:$80 sps:$4 sm:$0xff]   ;;  %v6780_v2 = vld [vmem:[#allocation7 + $0x358] ss:$80 sps:$4 sm:$0xff]  }
 0x23a   : > { %3242 = vmatpush1.bf16.msra.mxu0 %v6687_v3  ;;  %3283 = vmatpush1.bf16.msra.mxu1 %v6690_v4  ;;  %v6785_v3 = vld [vmem:[#allocation7 + $0x3f4] ss:$80 sps:$4 sm:$0xff]   ;;  %v6788_v4 = vld [vmem:[#allocation7 + $0x3fc] ss:$80 sps:$4 sm:$0xff]  }
 0x23b   : > { %3243 = vmatprep.subr.bf16.mxu0 %v6695_v5  ;;  %3284 = vmatprep.subr.bf16.mxu1 %v6698_v6  ;;  %v6783_v5 = vld [vmem:[#allocation7 + $0x3f0] ss:$80 sps:$4 sm:$0xff]   ;;  %v6786_v6 = vld [vmem:[#allocation7 + $0x3f8] ss:$80 sps:$4 sm:$0xff]  }
 0x23e   : > { %3244 = vmatpush1.bf16.msra.mxu0 %v6693_v7  ;;  %3285 = vmatpush1.bf16.msra.mxu1 %v6696_v8  ;;  %v6791_v7 = vld [vmem:[#allocation7 + $0x494] ss:$80 sps:$4 sm:$0xff]   ;;  %v6794_v8 = vld [vmem:[#allocation7 + $0x49c] ss:$80 sps:$4 sm:$0xff]  }
 0x23f   : > { %3311 = vmatprep.subr.bf16.mxu0 %v6701_v9  ;;  %3352 = vmatprep.subr.bf16.mxu1 %v6704_v10  ;;  %v6789_v9 = vld [vmem:[#allocation7 + $0x490] ss:$80 sps:$4 sm:$0xff]   ;;  %v6792_v10 = vld [vmem:[#allocation7 + $0x498] ss:$80 sps:$4 sm:$0xff]  }
 0x241   : > { %3262 = vmatmul.mubr.bf16.vlgmr.msra.gmra.mrb[24].mxu0 %v7531_v43  ;;  %3303 = vmatmul.mubr.bf16.vlgmr.msra.gmra.mrb[24].mxu1 %v7531_v43 }
 0x242   : > { %3312 = vmatpush1.bf16.msra.mxu0 %v6699_v11  ;;  %3353 = vmatpush1.bf16.msra.mxu1 %v6702_v12  ;;  %v6797_v11 = vld [vmem:[#allocation7 + $0x44] ss:$80 sps:$4 sm:$0xff]   ;;  %v6800_v12 = vld [vmem:[#allocation7 + $0x4c] ss:$80 sps:$4 sm:$0xff]  }
 0x243   : > { %3313 = vmatprep.subr.bf16.mxu0 %v6707_v13  ;;  %3354 = vmatprep.subr.bf16.mxu1 %v6710_v14  ;;  %v6795_v13 = vld [vmem:[#allocation7 + $0x40] ss:$80 sps:$4 sm:$0xff]   ;;  %v6798_v14 = vld [vmem:[#allocation7 + $0x48] ss:$80 sps:$4 sm:$0xff]  }
 0x244   : > { %3343 = vmatprep.mubr.bf16.mxu0 %v7230_v54  ;;  %3384 = vmatprep.mubr.bf16.mxu1 %v7230_v54 }
 0x246   : > { %3314 = vmatpush1.bf16.msra.mxu0 %v6705_v15  ;;  %3355 = vmatpush1.bf16.msra.mxu1 %v6708_v16  ;;  %v6803_v15 = vld [vmem:[#allocation7 + $0xe4] ss:$80 sps:$4 sm:$0xff]   ;;  %v6806_v16 = vld [vmem:[#allocation7 + $0xec] ss:$80 sps:$4 sm:$0xff]  }
 0x247   : > { %3315 = vmatprep.subr.bf16.mxu0 %v6713_v17  ;;  %3356 = vmatprep.subr.bf16.mxu1 %v6716_v18  ;;  %v6801_v17 = vld [vmem:[#allocation7 + $0xe0] ss:$80 sps:$4 sm:$0xff]   ;;  %v6804_v18 = vld [vmem:[#allocation7 + $0xe8] ss:$80 sps:$4 sm:$0xff]  }
 0x24a   : > { %3316 = vmatpush1.bf16.msra.mxu0 %v6711_v19  ;;  %3357 = vmatpush1.bf16.msra.mxu1 %v6714_v20  ;;  %v6809_v19 = vld [vmem:[#allocation7 + $0x184] ss:$80 sps:$4 sm:$0xff]   ;;  %v6812_v20 = vld [vmem:[#allocation7 + $0x18c] ss:$80 sps:$4 sm:$0xff]  }
 0x24b   : > { %3317 = vmatprep.subr.bf16.mxu0 %v6719_v21  ;;  %3358 = vmatprep.subr.bf16.mxu1 %v6722_v22  ;;  %v6807_v21 = vld [vmem:[#allocation7 + $0x180] ss:$80 sps:$4 sm:$0xff]   ;;  %v6810_v22 = vld [vmem:[#allocation7 + $0x188] ss:$80 sps:$4 sm:$0xff]  }
 0x24e   : > { %3318 = vmatpush1.bf16.msra.mxu0 %v6717_v23  ;;  %3359 = vmatpush1.bf16.msra.mxu1 %v6720_v24  ;;  %v6815_v23 = vld [vmem:[#allocation7 + $0x224] ss:$80 sps:$4 sm:$0xff]   ;;  %v6818_v24 = vld [vmem:[#allocation7 + $0x22c] ss:$80 sps:$4 sm:$0xff]  }
 0x24f   : > { %3319 = vmatprep.subr.bf16.mxu0 %v6725_v25  ;;  %3360 = vmatprep.subr.bf16.mxu1 %v6728_v26  ;;  %v6813_v25 = vld [vmem:[#allocation7 + $0x220] ss:$80 sps:$4 sm:$0xff]   ;;  %v6816_v26 = vld [vmem:[#allocation7 + $0x228] ss:$80 sps:$4 sm:$0xff]  }
 0x252   : > { %3320 = vmatpush1.bf16.msra.mxu0 %v6723_v27  ;;  %3361 = vmatpush1.bf16.msra.mxu1 %v6726_v28  ;;  %v6821_v27 = vld [vmem:[#allocation7 + $0x2c4] ss:$80 sps:$4 sm:$0xff]   ;;  %v6824_v28 = vld [vmem:[#allocation7 + $0x2cc] ss:$80 sps:$4 sm:$0xff]  }
 0x253   : > { %3321 = vmatprep.subr.bf16.mxu0 %v6731_v29  ;;  %3362 = vmatprep.subr.bf16.mxu1 %v6734_v30  ;;  %v6819_v29 = vld [vmem:[#allocation7 + $0x2c0] ss:$80 sps:$4 sm:$0xff]   ;;  %v6827_v30 = vld [vmem:[#allocation7 + $0x364] ss:$80 sps:$4 sm:$0xff]  }
 0x256   : > { %3322 = vmatpush1.bf16.msra.mxu0 %v6729_v31  ;;  %3363 = vmatpush1.bf16.msra.mxu1 %v6732_v32  ;;  %v6830_v31 = vld [vmem:[#allocation7 + $0x36c] ss:$80 sps:$4 sm:$0xff]   ;;  %v6825_v32 = vld [vmem:[#allocation7 + $0x360] ss:$80 sps:$4 sm:$0xff]  }
 0x257   : > { %3323 = vmatprep.subr.bf16.mxu0 %v6737_v33  ;;  %3364 = vmatprep.subr.bf16.mxu1 %v6740_v34  ;;  %v6828_v33 = vld [vmem:[#allocation7 + $0x368] ss:$80 sps:$4 sm:$0xff]   ;;  %v6833_v34 = vld [vmem:[#allocation7 + $0x404] ss:$80 sps:$4 sm:$0xff]  }
 0x25a   : > { %3324 = vmatpush1.bf16.msra.mxu0 %v6735_v35  ;;  %3365 = vmatpush1.bf16.msra.mxu1 %v6738_v36  ;;  %v6836_v35 = vld [vmem:[#allocation7 + $0x40c] ss:$80 sps:$4 sm:$0xff]   ;;  %v6831_v36 = vld [vmem:[#allocation7 + $0x400] ss:$80 sps:$4 sm:$0xff]  }
 0x25b   : > { %3325 = vmatprep.subr.bf16.mxu0 %v6743_v37  ;;  %3366 = vmatprep.subr.bf16.mxu1 %v6746_v38  ;;  %v6834_v37 = vld [vmem:[#allocation7 + $0x408] ss:$80 sps:$4 sm:$0xff]   ;;  %v6839_v38 = vld [vmem:[#allocation7 + $0x4a4] ss:$80 sps:$4 sm:$0xff]  }
 0x25e   : > { %3326 = vmatpush1.bf16.msra.mxu0 %v6741_v39  ;;  %3367 = vmatpush1.bf16.msra.mxu1 %v6744_v40  ;;  %v6842_v39 = vld [vmem:[#allocation7 + $0x4ac] ss:$80 sps:$4 sm:$0xff]   ;;  %v6837_v40 = vld [vmem:[#allocation7 + $0x4a0] ss:$80 sps:$4 sm:$0xff]  }
 0x25f   : > { %3393 = vmatprep.subr.bf16.mxu0 %v6749_v41  ;;  %3434 = vmatprep.subr.bf16.mxu1 %v6752_v42  ;;  %v6840_v41 = vld [vmem:[#allocation7 + $0x4a8] ss:$80 sps:$4 sm:$0xff]  }
 0x260   : > { %v6843_v42 = vld [vmem:[#allocation10 + $0x40] sm:$0xff]  }
 0x261   : > { %3344 = vmatmul.mubr.bf16.vlgmr.msra.gmra.mrb[28].mxu0 %v7531_v43  ;;  %3385 = vmatmul.mubr.bf16.vlgmr.msra.gmra.mrb[28].mxu1 %v7531_v43 }
 0x262   : > { %3394 = vmatpush1.bf16.msra.mxu0 %v6747_v44  ;;  %3435 = vmatpush1.bf16.msra.mxu1 %v6750_v45  ;;  %v6844_v44 = vld [vmem:[#allocation10 + $0xc0] sm:$0xff]  }
 0x263   : > { %3395 = vmatprep.subr.bf16.mxu0 %v6755_v46  ;;  %3436 = vmatprep.subr.bf16.mxu1 %v6758_v47  ;;  %v6845_v45 = vld [vmem:[#allocation10] sm:$0xff]   ;;  %v6847_v47 = vld [vmem:[#allocation10 + $0x48] sm:$0xff]  }
 0x264   : > { %3425 = vmatprep.mubr.bf16.mxu0 %v7230_v54  ;;  %3466 = vmatprep.mubr.bf16.mxu1 %v7230_v54  ;;  %v6846_v46 = vld [vmem:[#allocation10 + $0x80] sm:$0xff]  }
 0x266   : > { %3396 = vmatpush1.bf16.msra.mxu0 %v6753_v48  ;;  %3437 = vmatpush1.bf16.msra.mxu1 %v6756_v49  ;;  %v6848_v48 = vld [vmem:[#allocation10 + $0xc8] sm:$0xff]  }
 0x267   : > { %3397 = vmatprep.subr.bf16.mxu0 %v6761_v50  ;;  %3438 = vmatprep.subr.bf16.mxu1 %v6764_v51  ;;  %v6849_v49 = vld [vmem:[#allocation10 + $0x8] sm:$0xff]   ;;  %v6851_v51 = vld [vmem:[#allocation10 + $0x50] sm:$0xff]  }
 0x268   : > { %v6850_v50 = vld [vmem:[#allocation10 + $0x88] sm:$0xff]  }
 0x26a   : > { %3398 = vmatpush1.bf16.msra.mxu0 %v6759_v52  ;;  %3439 = vmatpush1.bf16.msra.mxu1 %v6762_v53  ;;  %v6852_v52 = vld [vmem:[#allocation10 + $0xd0] sm:$0xff]  }
 0x26b   : > { %3399 = vmatprep.subr.bf16.mxu0 %v6767_v55  ;;  %3440 = vmatprep.subr.bf16.mxu1 %v6770_v56  ;;  %v6853_v53 = vld [vmem:[#allocation10 + $0x10] sm:$0xff]   ;;  %v6855_v56 = vld [vmem:[#allocation10 + $0x58] sm:$0xff]  }
 0x26c   : > { %v6854_v55 = vld [vmem:[#allocation10 + $0x90] sm:$0xff]  }
 0x26e   : > { %3400 = vmatpush1.bf16.msra.mxu0 %v6765_v57  ;;  %3441 = vmatpush1.bf16.msra.mxu1 %v6768_v58  ;;  %v6856_v57 = vld [vmem:[#allocation10 + $0xd8] sm:$0xff]  }
 0x26f   : > { %3401 = vmatprep.subr.bf16.mxu0 %v6773_v59  ;;  %3442 = vmatprep.subr.bf16.mxu1 %v6776_v60  ;;  %v6857_v58 = vld [vmem:[#allocation10 + $0x18] sm:$0xff]   ;;  %v6859_v59 = vld [vmem:[#allocation10 + $0x60] sm:$0xff]  }
 0x270   : > { %v6860_v60 = vld [vmem:[#allocation10 + $0xe0] sm:$0xff]  }
 0x272   : > { %3402 = vmatpush1.bf16.msra.mxu0 %v6771_v61  ;;  %3443 = vmatpush1.bf16.msra.mxu1 %v6774_v62  ;;  %v6861_v61 = vld [vmem:[#allocation10 + $0x20] sm:$0xff]  }
 0x273   : > { %3403 = vmatprep.subr.bf16.mxu0 %v6779_v63  ;;  %3444 = vmatprep.subr.bf16.mxu1 %v6782_v0  ;;  %v6862_v62 = vld [vmem:[#allocation10 + $0xa0] sm:$0xff]   ;;  %v6863_v63 = vld [vmem:[#allocation10 + $0x68] sm:$0xff]  }
 0x274   : > { %v6864_v0 = vld [vmem:[#allocation10 + $0xe8] sm:$0xff]  }
 0x276   : > { %3404 = vmatpush1.bf16.msra.mxu0 %v6777_v1  ;;  %3445 = vmatpush1.bf16.msra.mxu1 %v6780_v2  ;;  %v6865_v1 = vld [vmem:[#allocation10 + $0x28] sm:$0xff]  }
 0x277   : > { %3405 = vmatprep.subr.bf16.mxu0 %v6785_v3  ;;  %3446 = vmatprep.subr.bf16.mxu1 %v6788_v4  ;;  %v6866_v2 = vld [vmem:[#allocation10 + $0xa8] sm:$0xff]   ;;  %v6867_v3 = vld [vmem:[#allocation10 + $0x70] sm:$0xff]  }
 0x278   : > { %v6868_v4 = vld [vmem:[#allocation10 + $0xf0] sm:$0xff]  }
 0x27a   : > { %3406 = vmatpush1.bf16.msra.mxu0 %v6783_v5  ;;  %3447 = vmatpush1.bf16.msra.mxu1 %v6786_v6  ;;  %v6869_v5 = vld [vmem:[#allocation10 + $0x30] sm:$0xff]  }
 0x27b   : > { %3407 = vmatprep.subr.bf16.mxu0 %v6791_v7  ;;  %3448 = vmatprep.subr.bf16.mxu1 %v6794_v8  ;;  %v6870_v6 = vld [vmem:[#allocation10 + $0xb0] sm:$0xff]   ;;  %v6871_v7 = vld [vmem:[#allocation10 + $0x78] sm:$0xff]  }
 0x27c   : > { %v6872_v8 = vld [vmem:[#allocation10 + $0xf8] sm:$0xff]  }
 0x27e   : > { %3408 = vmatpush1.bf16.msra.mxu0 %v6789_v9  ;;  %3449 = vmatpush1.bf16.msra.mxu1 %v6792_v10  ;;  %v6873_v9 = vld [vmem:[#allocation10 + $0x38] sm:$0xff]  }
 0x27f   : > { %3475 = vmatprep.subr.bf16.mxu0 %v6797_v11  ;;  %3516 = vmatprep.subr.bf16.mxu1 %v6800_v12  ;;  %v6874_v10 = vld [vmem:[#allocation10 + $0xb8] sm:$0xff]   ;;  %v6875_v11 = vld [vmem:[#allocation10 + $0x140] sm:$0xff]  }
 0x280   : > { %v6876_v12 = vld [vmem:[#allocation10 + $0x1c0] sm:$0xff]  }
 0x281   : > { %3426 = vmatmul.mubr.bf16.vlgmr.msra.gmra.mrb[32].mxu0 %v7531_v43  ;;  %3467 = vmatmul.mubr.bf16.vlgmr.msra.gmra.mrb[32].mxu1 %v7531_v43 }
 0x282   : > { %3476 = vmatpush1.bf16.msra.mxu0 %v6795_v13  ;;  %3517 = vmatpush1.bf16.msra.mxu1 %v6798_v14  ;;  %v2247_v13 = vlaneseq }
 0x283   : > { %3477 = vmatprep.subr.bf16.mxu0 %v6803_v15  ;;  %3518 = vmatprep.subr.bf16.mxu1 %v6806_v16 }
 0x284   : > { %3507 = vmatprep.mubr.bf16.mxu0 %v7230_v54  ;;  %3548 = vmatprep.mubr.bf16.mxu1 %v7230_v54  ;;  %v6822_v54 = vld [vmem:[#allocation7 + $0x2c8] ss:$80 sps:$4 sm:$0xff]   ;;  %v7551_v14 = vshrl.u32 %v2247_v13, 7 }
 0x285   : > { %v6902_v13 = vld [vmem:[#allocation10 + $0x1b0] sm:$0xff]  }
 0x286   : > { %3478 = vmatpush1.bf16.msra.mxu0 %v6801_v17  ;;  %3519 = vmatpush1.bf16.msra.mxu1 %v6804_v18  ;;  %v7554_v15 = vsub.s32 0, %v7551_v14  ;;  %v7557_v16 = vsub.s32 2, %v7551_v14  ;;  %v7559_v17 = vld [vmem:[#allocation8] sm:$0xff]  ;;  %v7562_v18 = vsub.s32 1, %v7551_v14 }
 0x287   : > { %3479 = vmatprep.subr.bf16.mxu0 %v6809_v19  ;;  %3520 = vmatprep.subr.bf16.mxu1 %v6812_v20  ;;  %v7565_v19 = vsub.s32 3, %v7551_v14 }
 0x288   : > { %v2250_v20 = vrot.slane %v7559_v17, %v7554_v15 }
 0x28a   : > { %3480 = vmatpush1.bf16.msra.mxu0 %v6807_v21  ;;  %3521 = vmatpush1.bf16.msra.mxu1 %v6810_v22  ;;  %v2258_v21 = vrot.slane %v7559_v17, %v7557_v16  ;;  %v2254_v22 = vrot.slane %v7559_v17, %v7562_v18 }
 0x28b   : > { %3481 = vmatprep.subr.bf16.mxu0 %v6815_v23  ;;  %3522 = vmatprep.subr.bf16.mxu1 %v6818_v24  ;;  %v2262_v23 = vrot.slane %v7559_v17, %v7565_v19 }
 0x28e   : > { %3482 = vmatpush1.bf16.msra.mxu0 %v6813_v25  ;;  %3523 = vmatpush1.bf16.msra.mxu1 %v6816_v26 }
 0x28f   : > { %3483 = vmatprep.subr.bf16.mxu0 %v6821_v27  ;;  %3524 = vmatprep.subr.bf16.mxu1 %v6824_v28 }
 0x292   : > { %3484 = vmatpush1.bf16.msra.mxu0 %v6819_v29  ;;  %3525 = vmatpush1.bf16.msra.mxu1 %v6822_v54 }
 0x293   : > { %3485 = vmatprep.subr.bf16.mxu0 %v6827_v30  ;;  %3526 = vmatprep.subr.bf16.mxu1 %v6830_v31 }
 0x296   : > { %3486 = vmatpush1.bf16.msra.mxu0 %v6825_v32  ;;  %3527 = vmatpush1.bf16.msra.mxu1 %v6828_v33 }
 0x297   : > { %3487 = vmatprep.subr.bf16.mxu0 %v6833_v34  ;;  %3528 = vmatprep.subr.bf16.mxu1 %v6836_v35 }
 0x29a   : > { %3488 = vmatpush1.bf16.msra.mxu0 %v6831_v36  ;;  %3529 = vmatpush1.bf16.msra.mxu1 %v6834_v37 }
 0x29b   : > { %3489 = vmatprep.subr.bf16.mxu0 %v6839_v38  ;;  %3530 = vmatprep.subr.bf16.mxu1 %v6842_v39 }
 0x29e   : > { %3490 = vmatpush1.bf16.msra.mxu0 %v6837_v40  ;;  %3531 = vmatpush1.bf16.msra.mxu1 %v6840_v41  ;;  %v6877_v41 = vld [vmem:[#allocation10 + $0x100] sm:$0xff]  }
 0x29f   : > { %6128 = vmatprep.subr.bf16.mxu0 %v6843_v42  ;;  %6150 = vmatprep.subr.bf16.mxu1 %v6844_v44  ;;  %v6878_v42 = vld [vmem:[#allocation10 + $0x180] sm:$0xff]  }
 0x2a1   : > { %3508 = vmatmul.mubr.bf16.vlgmr.msra.gmra.mrb[36].mxu0 %v7531_v43  ;;  %3549 = vmatmul.mubr.bf16.vlgmr.msra.gmra.mrb[36].mxu1 %v7531_v43  ;;  %v6858_v43 = vld [vmem:[#allocation10 + $0x98] sm:$0xff]  }
 0x2a2   : > { %6129 = vmatpush3.bf16.msra.mxu0 %v6845_v45  ;;  %6151 = vmatpush3.bf16.msra.mxu1 %v6846_v46  ;;  %v6879_v46 = vld [vmem:[#allocation10 + $0x148] sm:$0xff]  }
 0x2a3   : > { %6130 = vmatprep.subr.bf16.mxu0 %v6847_v47  ;;  %6152 = vmatprep.subr.bf16.mxu1 %v6848_v48  ;;  %v6880_v47 = vld [vmem:[#allocation10 + $0x1c8] sm:$0xff]  }
 0x2a4   : > { %v6881_v48 = vld [vmem:[#allocation10 + $0x108] sm:$0xff]  }
 0x2a6   : > { %6131 = vmatpush3.bf16.msra.mxu0 %v6849_v49  ;;  %6153 = vmatpush3.bf16.msra.mxu1 %v6850_v50  ;;  %v6882_v49 = vld [vmem:[#allocation10 + $0x188] sm:$0xff]   ;;  %v6883_v50 = vld [vmem:[#allocation10 + $0x150] sm:$0xff]  }
 0x2a7   : > { %6132 = vmatprep.subr.bf16.mxu0 %v6851_v51  ;;  %6154 = vmatprep.subr.bf16.mxu1 %v6852_v52  ;;  %v6884_v51 = vld [vmem:[#allocation10 + $0x1d0] sm:$0xff]  }
 0x2a8   : > { %v6885_v52 = vld [vmem:[#allocation10 + $0x110] sm:$0xff]  }
 0x2aa   : > { %6133 = vmatpush3.bf16.msra.mxu0 %v6853_v53  ;;  %6155 = vmatpush3.bf16.msra.mxu1 %v6854_v55  ;;  %v6886_v53 = vld [vmem:[#allocation10 + $0x190] sm:$0xff]   ;;  %v6887_v55 = vld [vmem:[#allocation10 + $0x158] sm:$0xff]  }
 0x2ab   : > { %6134 = vmatprep.subr.bf16.mxu0 %v6855_v56  ;;  %6156 = vmatprep.subr.bf16.mxu1 %v6856_v57  ;;  %v6888_v56 = vld [vmem:[#allocation10 + $0x1d8] sm:$0xff]  }
 0x2ac   : > { %v6889_v57 = vld [vmem:[#allocation10 + $0x118] sm:$0xff]  }
 0x2ae   : > { %6135 = vmatpush3.bf16.msra.mxu0 %v6857_v58  ;;  %6157 = vmatpush3.bf16.msra.mxu1 %v6858_v43  ;;  %v6890_v58 = vld [vmem:[#allocation10 + $0x198] sm:$0xff]   ;;  %v6891_v43 = vld [vmem:[#allocation10 + $0x160] sm:$0xff]  }
 0x2af   : > { %6136 = vmatprep.subr.bf16.mxu0 %v6859_v59  ;;  %6158 = vmatprep.subr.bf16.mxu1 %v6860_v60  ;;  %v6892_v59 = vld [vmem:[#allocation10 + $0x1e0] sm:$0xff]  }
 0x2b0   : > { %v6893_v60 = vld [vmem:[#allocation10 + $0x120] sm:$0xff]  }
 0x2b2   : > { %6137 = vmatpush3.bf16.msra.mxu0 %v6861_v61  ;;  %6159 = vmatpush3.bf16.msra.mxu1 %v6862_v62  ;;  %v6894_v61 = vld [vmem:[#allocation10 + $0x1a0] sm:$0xff]   ;;  %v6895_v62 = vld [vmem:[#allocation10 + $0x168] sm:$0xff]  }
 0x2b3   : > { %6138 = vmatprep.subr.bf16.mxu0 %v6863_v63  ;;  %6160 = vmatprep.subr.bf16.mxu1 %v6864_v0  ;;  %v6896_v63 = vld [vmem:[#allocation10 + $0x1e8] sm:$0xff]   ;;  %v2265_v0 = vsub.s32 4, %v7551_v14 }
 0x2b6   : > { %6139 = vmatpush3.bf16.msra.mxu0 %v6865_v1  ;;  %6161 = vmatpush3.bf16.msra.mxu1 %v6866_v2  ;;  %v2273_v1 = vsub.s32 6, %v7551_v14  ;;  %v6897_v2 = vld [vmem:[#allocation10 + $0x128] sm:$0xff]  }
 0x2b7   : > { %6140 = vmatprep.subr.bf16.mxu0 %v6867_v3  ;;  %6162 = vmatprep.subr.bf16.mxu1 %v6868_v4  ;;  %v6898_v3 = vld [vmem:[#allocation10 + $0x1a8] sm:$0xff]   ;;  %v2269_v4 = vsub.s32 5, %v7551_v14 }
 0x2ba   : > { %6141 = vmatpush3.bf16.msra.mxu0 %v6869_v5  ;;  %6163 = vmatpush3.bf16.msra.mxu1 %v6870_v6  ;;  %v2277_v5 = vsub.s32 7, %v7551_v14  ;;  %v6899_v6 = vld [vmem:[#allocation10 + $0x170] sm:$0xff]   ;;  %v6969_v14 = vld [vmem:[#allocation10 + $0x338] sm:$0xff]  }
 0x2bb   : > { %6142 = vmatprep.subr.bf16.mxu0 %v6871_v7  ;;  %6164 = vmatprep.subr.bf16.mxu1 %v6872_v8  ;;  %v6900_v7 = vld [vmem:[#allocation10 + $0x1f0] sm:$0xff]   ;;  %v2266_v8 = vrot.slane %v7559_v17, %v2265_v0 }
 0x2be   : > { %6143 = vmatpush3.bf16.msra.mxu0 %v6873_v9  ;;  %6165 = vmatpush3.bf16.msra.mxu1 %v6874_v10  ;;  %v2274_v9 = vrot.slane %v7559_v17, %v2273_v1  ;;  %v2270_v10 = vrot.slane %v7559_v17, %v2269_v4 }
 0x2bf   : > { %6172 = vmatprep.subr.bf16.mxu0 %v6875_v11  ;;  %6194 = vmatprep.subr.bf16.mxu1 %v6876_v12  ;;  %v2278_v11 = vrot.slane %v7559_v17, %v2277_v5  ;;  %v6901_v12 = vld [vmem:[#allocation10 + $0x130] sm:$0xff]   ;;  %v6906_v17 = vld [vmem:[#allocation10 + $0x1b8] sm:$0xff]  }
 0x2f4   : > { %v3181_v24 = vpop.f32.mrb[20].mxu0  ;;  %v3222_v25 = vpop.f32.mrb[20].mxu1 }
 0x2f5   : > { %v3182_v26 = vadd.f32 %v3181_v24, %v2250_v20  ;;  %v3223_v27 = vadd.f32 %v3222_v25, %v2258_v21  ;;  %v3183_v28 = vpop.f32.mrb[21].mxu0  ;;  %v3224_v29 = vpop.f32.mrb[21].mxu1  ;;  %v6903_v20 = vld [vmem:[#allocation10 + $0x178] sm:$0xff]  }
 0x2f6   : > { %v3184_v54 = vadd.f32 %v3183_v28, %v2254_v22  ;;  %v3225_v30 = vadd.f32 %v3224_v29, %v2262_v23  ;;  %v3185_v31 = vpop.f32.mrb[22].mxu0  ;;  %v3226_v32 = vpop.f32.mrb[22].mxu1  ;;  %v6904_v21 = vld [vmem:[#allocation10 + $0x1f8] sm:$0xff]  }
 0x2f7   : > { %v3557_v33 = vmax.f32 %v3182_v26, 0.0  ;;  %v3559_v34 = vmax.f32 %v3223_v27, 0.0  ;;  %v3186_v35 = vpop.f32.mrb[23].mxu0  ;;  %v3227_v36 = vpop.f32.mrb[23].mxu1  ;;  %v6905_v31 = vld [vmem:[#allocation10 + $0x138] sm:$0xff]  }
 0x2f8   : > { %v3558_v37 = vmax.f32 %v3184_v54, 0.0  ;;  %v3560_v38 = vmax.f32 %v3225_v30, 0.0  ;;  %v6907_v36 = vld [vmem:[#allocation10 + $0x240] sm:$0xff]  }
 0x2f9   : > { %v3577_v44 = vpack.c.bf16 %v3557_v33, %v3557_v33  ;;  %v3579_v45 = vpack.c.bf16 %v3559_v34, %v3559_v34 }
 0x2fa   : > { %v3578_v39 = vpack.c.bf16 %v3558_v37, %v3558_v37  ;;  %v3580_v40 = vpack.c.bf16 %v3560_v38, %v3560_v38  ;;  %v6908_v37 = vld [vmem:[#allocation10 + $0x2c0] sm:$0xff]  }
 0x2fc   : > { %4916 = vmatprep.mubr.bf16.mxu0 %v3578_v39  ;;  %4956 = vmatprep.mubr.bf16.mxu1 %v3580_v40 }
 0x2fd   : > { %4917 = vmatmul.mubr.bf16.vlgmr.msra.gmra.mrb[40].mxu0 %v3577_v44  ;;  %4957 = vmatmul.mubr.bf16.vlgmr.msra.gmra.mrb[40].mxu1 %v3579_v45  ;;  %v6910_v44 = vld [vmem:[#allocation10 + $0x280] sm:$0xff]  }
 0x2fe   : > { %6173 = vmatpush3.bf16.msra.mxu0 %v6877_v41  ;;  %6195 = vmatpush3.bf16.msra.mxu1 %v6878_v42  ;;  %v6909_v42 = vld [vmem:[#allocation10 + $0x200] sm:$0xff]  }
 0x2ff   : > { %6174 = vmatprep.subr.bf16.mxu0 %v6879_v46  ;;  %6196 = vmatprep.subr.bf16.mxu1 %v6880_v47  ;;  %v6911_v47 = vld [vmem:[#allocation10 + $0x248] sm:$0xff]  }
 0x302   : > { %6175 = vmatpush3.bf16.msra.mxu0 %v6881_v48  ;;  %6197 = vmatpush3.bf16.msra.mxu1 %v6882_v49  ;;  %v6912_v48 = vld [vmem:[#allocation10 + $0x2c8] sm:$0xff]  }
 0x303   : > { %6176 = vmatprep.subr.bf16.mxu0 %v6883_v50  ;;  %6198 = vmatprep.subr.bf16.mxu1 %v6884_v51  ;;  %v6913_v49 = vld [vmem:[#allocation10 + $0x208] sm:$0xff]   ;;  %v6915_v51 = vld [vmem:[#allocation10 + $0x250] sm:$0xff]  }
 0x304   : > { %v6914_v50 = vld [vmem:[#allocation10 + $0x288] sm:$0xff]  }
 0x306   : > { %6177 = vmatpush3.bf16.msra.mxu0 %v6885_v52  ;;  %6199 = vmatpush3.bf16.msra.mxu1 %v6886_v53  ;;  %v6916_v52 = vld [vmem:[#allocation10 + $0x2d0] sm:$0xff]  }
 0x307   : > { %6178 = vmatprep.subr.bf16.mxu0 %v6887_v55  ;;  %6200 = vmatprep.subr.bf16.mxu1 %v6888_v56  ;;  %v6917_v53 = vld [vmem:[#allocation10 + $0x210] sm:$0xff]   ;;  %v6919_v56 = vld [vmem:[#allocation10 + $0x258] sm:$0xff]  }
 0x308   : > { %v6918_v55 = vld [vmem:[#allocation10 + $0x290] sm:$0xff]  }
 0x30a   : > { %6179 = vmatpush3.bf16.msra.mxu0 %v6889_v57  ;;  %6201 = vmatpush3.bf16.msra.mxu1 %v6890_v58  ;;  %v6920_v57 = vld [vmem:[#allocation10 + $0x2d8] sm:$0xff]  }
 0x30b   : > { %6180 = vmatprep.subr.bf16.mxu0 %v6891_v43  ;;  %6202 = vmatprep.subr.bf16.mxu1 %v6892_v59  ;;  %v6921_v58 = vld [vmem:[#allocation10 + $0x218] sm:$0xff]   ;;  %v6923_v59 = vld [vmem:[#allocation10 + $0x260] sm:$0xff]  }
 0x30c   : > { %v6922_v43 = vld [vmem:[#allocation10 + $0x298] sm:$0xff]  }
 0x30e   : > { %6181 = vmatpush3.bf16.msra.mxu0 %v6893_v60  ;;  %6203 = vmatpush3.bf16.msra.mxu1 %v6894_v61  ;;  %v6924_v60 = vld [vmem:[#allocation10 + $0x2e0] sm:$0xff]  }
 0x30f   : > { %6182 = vmatprep.subr.bf16.mxu0 %v6895_v62  ;;  %6204 = vmatprep.subr.bf16.mxu1 %v6896_v63  ;;  %v6925_v61 = vld [vmem:[#allocation10 + $0x220] sm:$0xff]   ;;  %v6927_v63 = vld [vmem:[#allocation10 + $0x268] sm:$0xff]  }
 0x310   : > { %v6926_v62 = vld [vmem:[#allocation10 + $0x2a0] sm:$0xff]  }
 0x312   : > { %6183 = vmatpush3.bf16.msra.mxu0 %v6897_v2  ;;  %6205 = vmatpush3.bf16.msra.mxu1 %v6898_v3  ;;  %v6928_v2 = vld [vmem:[#allocation10 + $0x2e8] sm:$0xff]  }
 0x313   : > { %6184 = vmatprep.subr.bf16.mxu0 %v6899_v6  ;;  %6206 = vmatprep.subr.bf16.mxu1 %v6900_v7  ;;  %v6929_v3 = vld [vmem:[#allocation10 + $0x228] sm:$0xff]   ;;  %v7591_v7 = vld [vmem:[#allocation8 + $0x8] sm:$0xff] }
 0x314   : > { %v3263_v22 = vpop.f32.mrb[24].mxu0  ;;  %v3304_v23 = vpop.f32.mrb[24].mxu1  ;;  %v6930_v6 = vld [vmem:[#allocation10 + $0x2a8] sm:$0xff]  }
 0x315   : > { %v3264_v24 = vadd.f32 %v3263_v22, %v2266_v8  ;;  %v3305_v25 = vadd.f32 %v3304_v23, %v2274_v9  ;;  %v3265_v26 = vpop.f32.mrb[25].mxu0  ;;  %v3306_v27 = vpop.f32.mrb[25].mxu1  ;;  %v6931_v8 = vld [vmem:[#allocation10 + $0x270] sm:$0xff]   ;;  %v6935_v22 = vld [vmem:[#allocation10 + $0x278] sm:$0xff]  }
 0x316   : > { %v3266_v28 = vadd.f32 %v3265_v26, %v2270_v10  ;;  %v3307_v29 = vadd.f32 %v3306_v27, %v2278_v11  ;;  %v3267_v54 = vpop.f32.mrb[26].mxu0  ;;  %v3308_v30 = vpop.f32.mrb[26].mxu1  ;;  %6185 = vmatpush3.bf16.msra.mxu0 %v6901_v12  ;;  %6207 = vmatpush3.bf16.msra.mxu1 %v6902_v13  ;;  %v6932_v9 = vld [vmem:[#allocation10 + $0x2f0] sm:$0xff]   ;;  %v2282_v10 = vrot.slane %v7591_v7, %v7554_v15  ;;  %v6936_v23 = vld [vmem:[#allocation10 + $0x2f8] sm:$0xff]  }
 0x317   : > { %v3561_v32 = vmax.f32 %v3264_v24, 0.0  ;;  %v3563_v33 = vmax.f32 %v3305_v25, 0.0  ;;  %v3268_v34 = vpop.f32.mrb[27].mxu0  ;;  %v3309_v35 = vpop.f32.mrb[27].mxu1  ;;  %6186 = vmatprep.subr.bf16.mxu0 %v6903_v20  ;;  %6208 = vmatprep.subr.bf16.mxu1 %v6904_v21  ;;  %v2290_v11 = vrot.slane %v7591_v7, %v7557_v16  ;;  %v2286_v12 = vrot.slane %v7591_v7, %v7562_v18  ;;  %v6933_v20 = vld [vmem:[#allocation10 + $0x230] sm:$0xff]  }
 0x318   : > { %v3562_v38 = vmax.f32 %v3266_v28, 0.0  ;;  %v3564_v39 = vmax.f32 %v3307_v29, 0.0  ;;  %v2294_v13 = vrot.slane %v7591_v7, %v7565_v19  ;;  %v6934_v21 = vld [vmem:[#allocation10 + $0x2b0] sm:$0xff]  }
 0x319   : > { %v3581_v45 = vpack.c.bf16 %v3561_v32, %v3561_v32  ;;  %v3583_v46 = vpack.c.bf16 %v3563_v33, %v3563_v33  ;;  %v6937_v32 = vld [vmem:[#allocation10 + $0x238] sm:$0xff]  }
 0x31a   : > { %v3582_v40 = vpack.c.bf16 %v3562_v38, %v3562_v38  ;;  %v3584_v41 = vpack.c.bf16 %v3564_v39, %v3564_v39  ;;  %6187 = vmatpush3.bf16.msra.mxu0 %v6905_v31  ;;  %6209 = vmatpush3.bf16.msra.mxu1 %v6906_v17  ;;  %v6938_v33 = vld [vmem:[#allocation10 + $0x2b8] sm:$0xff]   ;;  %v6939_v38 = vld [vmem:[#allocation10 + $0x340] sm:$0xff]  }
 0x31b   : > { %6216 = vmatprep.subr.bf16.mxu0 %v6907_v36  ;;  %6238 = vmatprep.subr.bf16.mxu1 %v6908_v37  ;;  %v6940_v39 = vld [vmem:[#allocation10 + $0x3c0] sm:$0xff]  }
 0x31c   : > { %4996 = vmatprep.mubr.bf16.mxu0 %v3582_v40  ;;  %5036 = vmatprep.mubr.bf16.mxu1 %v3584_v41 }
 0x31d   : > { %4997 = vmatmul.mubr.bf16.vlgmr.msra.gmra.mrb[44].mxu0 %v3581_v45  ;;  %5037 = vmatmul.mubr.bf16.vlgmr.msra.gmra.mrb[44].mxu1 %v3583_v46  ;;  %v6941_v45 = vld [vmem:[#allocation10 + $0x300] sm:$0xff]  }
 0x31e   : > { %6217 = vmatpush3.bf16.msra.mxu0 %v6909_v42  ;;  %6239 = vmatpush3.bf16.msra.mxu1 %v6910_v44  ;;  %v6942_v46 = vld [vmem:[#allocation10 + $0x380] sm:$0xff]  }
 0x31f   : > { %6218 = vmatprep.subr.bf16.mxu0 %v6911_v47  ;;  %6240 = vmatprep.subr.bf16.mxu1 %v6912_v48 }
 0x322   : > { %6219 = vmatpush3.bf16.msra.mxu0 %v6913_v49  ;;  %6241 = vmatpush3.bf16.msra.mxu1 %v6914_v50  ;;  %v6943_v49 = vld [vmem:[#allocation10 + $0x348] sm:$0xff]  }
 0x323   : > { %6220 = vmatprep.subr.bf16.mxu0 %v6915_v51  ;;  %6242 = vmatprep.subr.bf16.mxu1 %v6916_v52  ;;  %v6944_v50 = vld [vmem:[#allocation10 + $0x3c8] sm:$0xff]  }
 0x324   : > { %v6945_v51 = vld [vmem:[#allocation10 + $0x308] sm:$0xff]  }
 0x325   : > { %v6946_v52 = vld [vmem:[#allocation10 + $0x388] sm:$0xff]  }
 0x326   : > { %6221 = vmatpush3.bf16.msra.mxu0 %v6917_v53  ;;  %6243 = vmatpush3.bf16.msra.mxu1 %v6918_v55  ;;  %v6947_v53 = vld [vmem:[#allocation10 + $0x350] sm:$0xff]  }
 0x327   : > { %6222 = vmatprep.subr.bf16.mxu0 %v6919_v56  ;;  %6244 = vmatprep.subr.bf16.mxu1 %v6920_v57  ;;  %v6948_v55 = vld [vmem:[#allocation10 + $0x3d0] sm:$0xff]  }
 0x328   : > { %v6949_v56 = vld [vmem:[#allocation10 + $0x310] sm:$0xff]  }
 0x329   : > { %v6950_v57 = vld [vmem:[#allocation10 + $0x390] sm:$0xff]  }
 0x32a   : > { %6223 = vmatpush3.bf16.msra.mxu0 %v6921_v58  ;;  %6245 = vmatpush3.bf16.msra.mxu1 %v6922_v43  ;;  %v6951_v58 = vld [vmem:[#allocation10 + $0x358] sm:$0xff]  }
 0x32b   : > { %6224 = vmatprep.subr.bf16.mxu0 %v6923_v59  ;;  %6246 = vmatprep.subr.bf16.mxu1 %v6924_v60  ;;  %v6952_v43 = vld [vmem:[#allocation10 + $0x3d8] sm:$0xff]  }
 0x32c   : > { %v6953_v59 = vld [vmem:[#allocation10 + $0x318] sm:$0xff]  }
 0x32d   : > { %v6954_v60 = vld [vmem:[#allocation10 + $0x398] sm:$0xff]  }
 0x32e   : > { %6225 = vmatpush3.bf16.msra.mxu0 %v6925_v61  ;;  %6247 = vmatpush3.bf16.msra.mxu1 %v6926_v62  ;;  %v6955_v61 = vld [vmem:[#allocation10 + $0x360] sm:$0xff]  }
 0x32f   : > { %6226 = vmatprep.subr.bf16.mxu0 %v6927_v63  ;;  %6248 = vmatprep.subr.bf16.mxu1 %v6928_v2  ;;  %v6956_v62 = vld [vmem:[#allocation10 + $0x3e0] sm:$0xff]  }
 0x330   : > { %v6957_v63 = vld [vmem:[#allocation10 + $0x320] sm:$0xff]  }
 0x331   : > { %v6958_v2 = vld [vmem:[#allocation10 + $0x3a0] sm:$0xff]  }
 0x332   : > { %6227 = vmatpush3.bf16.msra.mxu0 %v6929_v3  ;;  %6249 = vmatpush3.bf16.msra.mxu1 %v6930_v6  ;;  %v6959_v3 = vld [vmem:[#allocation10 + $0x368] sm:$0xff]  }
 0x333   : > { %6228 = vmatprep.subr.bf16.mxu0 %v6931_v8  ;;  %6250 = vmatprep.subr.bf16.mxu1 %v6932_v9  ;;  %v6960_v6 = vld [vmem:[#allocation10 + $0x3e8] sm:$0xff]  }
 0x334   : > { %v3345_v24 = vpop.f32.mrb[28].mxu0  ;;  %v3386_v25 = vpop.f32.mrb[28].mxu1  ;;  %v6961_v8 = vld [vmem:[#allocation10 + $0x328] sm:$0xff]  }
 0x335   : > { %v3346_v26 = vadd.f32 %v3345_v24, %v2282_v10  ;;  %v3387_v27 = vadd.f32 %v3386_v25, %v2290_v11  ;;  %v3347_v28 = vpop.f32.mrb[29].mxu0  ;;  %v3388_v29 = vpop.f32.mrb[29].mxu1  ;;  %v6962_v9 = vld [vmem:[#allocation10 + $0x3a8] sm:$0xff]   ;;  %v6963_v10 = vld [vmem:[#allocation10 + $0x370] sm:$0xff]   ;;  %v6967_v24 = vld [vmem:[#allocation10 + $0x378] sm:$0xff]  }
 0x336   : > { %v3348_v54 = vadd.f32 %v3347_v28, %v2286_v12  ;;  %v3389_v30 = vadd.f32 %v3388_v29, %v2294_v13  ;;  %v3349_v31 = vpop.f32.mrb[30].mxu0  ;;  %v3390_v17 = vpop.f32.mrb[30].mxu1  ;;  %6229 = vmatpush3.bf16.msra.mxu0 %v6933_v20  ;;  %6251 = vmatpush3.bf16.msra.mxu1 %v6934_v21  ;;  %v6964_v11 = vld [vmem:[#allocation10 + $0x3f0] sm:$0xff]   ;;  %v2298_v12 = vrot.slane %v7591_v7, %v2265_v0  ;;  %v6968_v0 = vld [vmem:[#allocation10 + $0x3f8] sm:$0xff]  }
 0x337   : > { %v3565_v34 = vmax.f32 %v3346_v26, 0.0  ;;  %v3567_v35 = vmax.f32 %v3387_v27, 0.0  ;;  %v3350_v36 = vpop.f32.mrb[31].mxu0  ;;  %v3391_v37 = vpop.f32.mrb[31].mxu1  ;;  %6230 = vmatprep.subr.bf16.mxu0 %v6935_v22  ;;  %6252 = vmatprep.subr.bf16.mxu1 %v6936_v23  ;;  %v2306_v13 = vrot.slane %v7591_v7, %v2273_v1  ;;  %v2302_v20 = vrot.slane %v7591_v7, %v2269_v4  ;;  %v6965_v22 = vld [vmem:[#allocation10 + $0x330] sm:$0xff]  }
 0x338   : > { %v3566_v40 = vmax.f32 %v3348_v54, 0.0  ;;  %v3568_v41 = vmax.f32 %v3389_v30, 0.0  ;;  %v2310_v21 = vrot.slane %v7591_v7, %v2277_v5  ;;  %v6966_v23 = vld [vmem:[#allocation10 + $0x3b0] sm:$0xff]   ;;  %v6970_v5 = vld [vmem:[#allocation10 + $0x3b8] sm:$0xff]  }
 0x339   : > { %v3585_v47 = vpack.c.bf16 %v3565_v34, %v3565_v34  ;;  %v3587_v48 = vpack.c.bf16 %v3567_v35, %v3567_v35  ;;  %v6971_v34 = vld [vmem:[#allocation10 + $0x440] sm:$0xff]  }
 0x33a   : > { %v3586_v42 = vpack.c.bf16 %v3566_v40, %v3566_v40  ;;  %v3588_v44 = vpack.c.bf16 %v3568_v41, %v3568_v41  ;;  %6231 = vmatpush3.bf16.msra.mxu0 %v6937_v32  ;;  %6253 = vmatpush3.bf16.msra.mxu1 %v6938_v33  ;;  %v6972_v35 = vld [vmem:[#allocation10 + $0x4c0] sm:$0xff]  }
 0x33b   : > { %6260 = vmatprep.subr.bf16.mxu0 %v6939_v38  ;;  %6282 = vmatprep.subr.bf16.mxu1 %v6940_v39  ;;  %v6973_v40 = vld [vmem:[#allocation10 + $0x400] sm:$0xff]  }
 0x33c   : > { %5076 = vmatprep.mubr.bf16.mxu0 %v3586_v42  ;;  %5116 = vmatprep.mubr.bf16.mxu1 %v3588_v44  ;;  %v6974_v41 = vld [vmem:[#allocation10 + $0x480] sm:$0xff]  }
 0x33d   : > { %5077 = vmatmul.mubr.bf16.vlgmr.msra.gmra.mrb[48].mxu0 %v3585_v47  ;;  %5117 = vmatmul.mubr.bf16.vlgmr.msra.gmra.mrb[48].mxu1 %v3587_v48  ;;  %v6977_v47 = vld [vmem:[#allocation10 + $0x408] sm:$0xff]  }
 0x33e   : > { %6261 = vmatpush3.bf16.msra.mxu0 %v6941_v45  ;;  %6283 = vmatpush3.bf16.msra.mxu1 %v6942_v46  ;;  %v6975_v45 = vld [vmem:[#allocation10 + $0x448] sm:$0xff]  }
 0x33f   : > { %6262 = vmatprep.subr.bf16.mxu0 %v6943_v49  ;;  %6284 = vmatprep.subr.bf16.mxu1 %v6944_v50  ;;  %v6976_v46 = vld [vmem:[#allocation10 + $0x4c8] sm:$0xff]   ;;  %v6979_v49 = vld [vmem:[#allocation10 + $0x450] sm:$0xff]  }
 0x340   : > { %v6978_v48 = vld [vmem:[#allocation10 + $0x488] sm:$0xff]   ;;  %v6980_v50 = vld [vmem:[#allocation10 + $0x4d0] sm:$0xff]  }
 0x342   : > { %6263 = vmatpush3.bf16.msra.mxu0 %v6945_v51  ;;  %6285 = vmatpush3.bf16.msra.mxu1 %v6946_v52  ;;  %v6981_v51 = vld [vmem:[#allocation10 + $0x410] sm:$0xff]  }
 0x343   : > { %6264 = vmatprep.subr.bf16.mxu0 %v6947_v53  ;;  %6286 = vmatprep.subr.bf16.mxu1 %v6948_v55  ;;  %v6982_v52 = vld [vmem:[#allocation10 + $0x490] sm:$0xff]   ;;  %v6983_v53 = vld [vmem:[#allocation10 + $0x458] sm:$0xff]  }
 0x344   : > { %v6984_v55 = vld [vmem:[#allocation10 + $0x4d8] sm:$0xff]  }
 0x346   : > { %6265 = vmatpush3.bf16.msra.mxu0 %v6949_v56  ;;  %6287 = vmatpush3.bf16.msra.mxu1 %v6950_v57  ;;  %v6985_v56 = vld [vmem:[#allocation10 + $0x418] sm:$0xff]  }
 0x347   : > { %6266 = vmatprep.subr.bf16.mxu0 %v6951_v58  ;;  %6288 = vmatprep.subr.bf16.mxu1 %v6952_v43  ;;  %v6986_v57 = vld [vmem:[#allocation10 + $0x498] sm:$0xff]   ;;  %v6987_v58 = vld [vmem:[#allocation10 + $0x460] sm:$0xff]  }
 0x348   : > { %v6988_v43 = vld [vmem:[#allocation10 + $0x4e0] sm:$0xff]  }
 0x34a   : > { %6267 = vmatpush3.bf16.msra.mxu0 %v6953_v59  ;;  %6289 = vmatpush3.bf16.msra.mxu1 %v6954_v60  ;;  %v6989_v59 = vld [vmem:[#allocation10 + $0x420] sm:$0xff]  }
 0x34b   : > { %6268 = vmatprep.subr.bf16.mxu0 %v6955_v61  ;;  %6290 = vmatprep.subr.bf16.mxu1 %v6956_v62  ;;  %v6990_v60 = vld [vmem:[#allocation10 + $0x4a0] sm:$0xff]   ;;  %v6991_v61 = vld [vmem:[#allocation10 + $0x468] sm:$0xff]  }
 0x34c   : > { %v6992_v62 = vld [vmem:[#allocation10 + $0x4e8] sm:$0xff]  }
 0x34e   : > { %6269 = vmatpush3.bf16.msra.mxu0 %v6957_v63  ;;  %6291 = vmatpush3.bf16.msra.mxu1 %v6958_v2  ;;  %v6993_v63 = vld [vmem:[#allocation10 + $0x428] sm:$0xff]  }
 0x34f   : > { %6270 = vmatprep.subr.bf16.mxu0 %v6959_v3  ;;  %6292 = vmatprep.subr.bf16.mxu1 %v6960_v6  ;;  %v6994_v2 = vld [vmem:[#allocation10 + $0x4a8] sm:$0xff]   ;;  %v2243_v3 = vld [vmem:[#allocation8 + $0x10] sm:$0xf]  ;;  %v6995_v6 = vld [vmem:[#allocation10 + $0x470] sm:$0xff]  }
 0x352   : > { %6271 = vmatpush3.bf16.msra.mxu0 %v6961_v8  ;;  %6293 = vmatpush3.bf16.msra.mxu1 %v6962_v9  ;;  %v6996_v8 = vld [vmem:[#allocation10 + $0x4f0] sm:$0xff]   ;;  %v2314_v9 = vrot.slane %v2243_v3, %v7554_v15 }
 0x353   : > { %6272 = vmatprep.subr.bf16.mxu0 %v6963_v10  ;;  %6294 = vmatprep.subr.bf16.mxu1 %v6964_v11  ;;  %v2322_v10 = vrot.slane %v2243_v3, %v7557_v16  ;;  %v2318_v11 = vrot.slane %v2243_v3, %v7562_v18  ;;  %v7001_v18 = vld [vmem:[#allocation10 + $0x438] sm:$0xff]  }
 0x354   : > { %v3427_v25 = vpop.f32.mrb[32].mxu0  ;;  %v3468_v26 = vpop.f32.mrb[32].mxu1 }
 0x355   : > { %v3428_v27 = vadd.f32 %v3427_v25, %v2298_v12  ;;  %v3469_v1 = vadd.f32 %v3468_v26, %v2306_v13  ;;  %v3429_v28 = vpop.f32.mrb[33].mxu0  ;;  %v3470_v29 = vpop.f32.mrb[33].mxu1  ;;  %v2326_v12 = vrot.slane %v2243_v3, %v7565_v19  ;;  %v6997_v13 = vld [vmem:[#allocation10 + $0x430] sm:$0xff]   ;;  %v7002_v19 = vld [vmem:[#allocation10 + $0x4b8] sm:$0xff]  }
 0x356   : > { %v3430_v54 = vadd.f32 %v3429_v28, %v2302_v20  ;;  %v3471_v30 = vadd.f32 %v3470_v29, %v2310_v21  ;;  %v3431_v31 = vpop.f32.mrb[34].mxu0  ;;  %v3472_v4 = vpop.f32.mrb[34].mxu1  ;;  %6273 = vmatpush3.bf16.msra.mxu0 %v6965_v22  ;;  %6295 = vmatpush3.bf16.msra.mxu1 %v6966_v23  ;;  %v6998_v20 = vld [vmem:[#allocation10 + $0x4b0] sm:$0xff]   ;;  %v6999_v21 = vld [vmem:[#allocation10 + $0x478] sm:$0xff]  }
 0x357   : > { %v3569_v7 = vmax.f32 %v3428_v27, 0.0  ;;  %v3571_v17 = vmax.f32 %v3469_v1, 0.0  ;;  %v3432_v32 = vpop.f32.mrb[35].mxu0  ;;  %v3473_v33 = vpop.f32.mrb[35].mxu1  ;;  %6274 = vmatprep.subr.bf16.mxu0 %v6967_v24  ;;  %6296 = vmatprep.subr.bf16.mxu1 %v6968_v0  ;;  %v7000_v22 = vld [vmem:[#allocation10 + $0x4f8] sm:$0xff]  }
 0x358   : > { %v3570_v36 = vmax.f32 %v3430_v54, 0.0  ;;  %v3572_v37 = vmax.f32 %v3471_v30, 0.0 }
 0x359   : > { %v3589_v42 = vpack.c.bf16 %v3569_v7, %v3569_v7  ;;  %v3591_v44 = vpack.c.bf16 %v3571_v17, %v3571_v17 }
 0x35a   : > { %v3590_v38 = vpack.c.bf16 %v3570_v36, %v3570_v36  ;;  %v3592_v39 = vpack.c.bf16 %v3572_v37, %v3572_v37  ;;  %6275 = vmatpush3.bf16.msra.mxu0 %v6969_v14  ;;  %6297 = vmatpush3.bf16.msra.mxu1 %v6970_v5 }
 0x35b   : > { %6304 = vmatprep.subr.bf16.mxu0 %v6971_v34  ;;  %6326 = vmatprep.subr.bf16.mxu1 %v6972_v35  ;;  %v5743_v35 = vld [vmem:[%s7675_s6] ss:$0 sm:$0xff] }
 0x35c   : > { %5156 = vmatprep.mubr.bf16.mxu0 %v3590_v38  ;;  %5196 = vmatprep.mubr.bf16.mxu1 %v3592_v39 }
 0x35d   : > { %5157 = vmatmul.mubr.bf16.vlgmr.msra.gmra.mrb[52].mxu0 %v3589_v42  ;;  %5197 = vmatmul.mubr.bf16.vlgmr.msra.gmra.mrb[52].mxu1 %v3591_v44 }
 0x35e   : > { %6305 = vmatpush3.bf16.msra.mxu0 %v6973_v40  ;;  %6327 = vmatpush3.bf16.msra.mxu1 %v6974_v41 }
 0x35f   : > { %6306 = vmatprep.subr.bf16.mxu0 %v6975_v45  ;;  %6328 = vmatprep.subr.bf16.mxu1 %v6976_v46 }
 0x362   : > { %6307 = vmatpush3.bf16.msra.mxu0 %v6977_v47  ;;  %6329 = vmatpush3.bf16.msra.mxu1 %v6978_v48 }
 0x363   : > { %6308 = vmatprep.subr.bf16.mxu0 %v6979_v49  ;;  %6330 = vmatprep.subr.bf16.mxu1 %v6980_v50 }
 0x366   : > { %6309 = vmatpush3.bf16.msra.mxu0 %v6981_v51  ;;  %6331 = vmatpush3.bf16.msra.mxu1 %v6982_v52 }
 0x367   : > { %6310 = vmatprep.subr.bf16.mxu0 %v6983_v53  ;;  %6332 = vmatprep.subr.bf16.mxu1 %v6984_v55 }
 0x36a   : > { %6311 = vmatpush3.bf16.msra.mxu0 %v6985_v56  ;;  %6333 = vmatpush3.bf16.msra.mxu1 %v6986_v57 }
 0x36b   : > { %6312 = vmatprep.subr.bf16.mxu0 %v6987_v58  ;;  %6334 = vmatprep.subr.bf16.mxu1 %v6988_v43 }
 0x36e   : > { %6313 = vmatpush3.bf16.msra.mxu0 %v6989_v59  ;;  %6335 = vmatpush3.bf16.msra.mxu1 %v6990_v60 }
 0x36f   : > { %6314 = vmatprep.subr.bf16.mxu0 %v6991_v61  ;;  %6336 = vmatprep.subr.bf16.mxu1 %v6992_v62 }
 0x372   : > { %6315 = vmatpush3.bf16.msra.mxu0 %v6993_v63  ;;  %6337 = vmatpush3.bf16.msra.mxu1 %v6994_v2 }
 0x373   : > { %6316 = vmatprep.subr.bf16.mxu0 %v6995_v6  ;;  %6338 = vmatprep.subr.bf16.mxu1 %v6996_v8 }
 0x374   : > { %v3509_v23 = vpop.f32.mrb[36].mxu0  ;;  %v3550_v24 = vpop.f32.mrb[36].mxu1 }
 0x375   : > { %v3510_v0 = vadd.f32 %v3509_v23, %v2314_v9  ;;  %v3551_v25 = vadd.f32 %v3550_v24, %v2322_v10  ;;  %v3511_v26 = vpop.f32.mrb[37].mxu0  ;;  %v3552_v15 = vpop.f32.mrb[37].mxu1 }
 0x376   : > { %v3512_v27 = vadd.f32 %v3511_v26, %v2318_v11  ;;  %v3553_v16 = vadd.f32 %v3552_v15, %v2326_v12  ;;  %v3513_v1 = vpop.f32.mrb[38].mxu0  ;;  %v3554_v28 = vpop.f32.mrb[38].mxu1  ;;  %6317 = vmatpush3.bf16.msra.mxu0 %v6997_v13  ;;  %6339 = vmatpush3.bf16.msra.mxu1 %v6998_v20 }
 0x377   : > { %v3573_v29 = vmax.f32 %v3510_v0, 0.0  ;;  %v3575_v54 = vmax.f32 %v3551_v25, 0.0  ;;  %v3514_v30 = vpop.f32.mrb[39].mxu0  ;;  %v3555_v31 = vpop.f32.mrb[39].mxu1  ;;  %6318 = vmatprep.subr.bf16.mxu0 %v6999_v21  ;;  %6340 = vmatprep.subr.bf16.mxu1 %v7000_v22 }
 0x378   : > { %v3574_v4 = vmax.f32 %v3512_v27, 0.0  ;;  %v3576_v14 = vmax.f32 %v3553_v16, 0.0 }
 0x379   : > { %v3593_v17 = vpack.c.bf16 %v3573_v29, %v3573_v29  ;;  %v3595_v32 = vpack.c.bf16 %v3575_v54, %v3575_v54 }
 0x37a   : > { %v3594_v5 = vpack.c.bf16 %v3574_v4, %v3574_v4  ;;  %v3596_v7 = vpack.c.bf16 %v3576_v14, %v3576_v14  ;;  %6319 = vmatpush3.bf16.msra.mxu0 %v7001_v18  ;;  %6341 = vmatpush3.bf16.msra.mxu1 %v7002_v19 }
 0x37c   : > { %5236 = vmatprep.mubr.bf16.mxu0 %v3594_v5  ;;  %5276 = vmatprep.mubr.bf16.mxu1 %v3596_v7 }
 0x37d   : > { %5237 = vmatmul.mubr.bf16.vlgmr.msra.gmra.mrb[56].mxu0 %v3593_v17  ;;  %5277 = vmatmul.mubr.bf16.vlgmr.msra.gmra.mrb[56].mxu1 %v3595_v32 }
 0x3d0   : > { %v6144_v33 = vpop.f32.mrb[40].mxu0  ;;  %v6166_v34 = vpop.f32.mrb[40].mxu1 }
 0x3d1   : > { %v6145_v36 = vpop.f32.mrb[41].mxu0  ;;  %v6167_v37 = vpop.f32.mrb[41].mxu1 }
 0x3d2   : > { %v6146_v38 = vadd.f32 %v6145_v36, %v6144_v33  ;;  %v6168_v39 = vadd.f32 %v6167_v37, %v6166_v34  ;;  %v6147_v40 = vpop.f32.mrb[42].mxu0  ;;  %v6169_v41 = vpop.f32.mrb[42].mxu1 }
 0x3d3   : > { %v6148_v42 = vpop.f32.mrb[43].mxu0  ;;  %v6170_v44 = vpop.f32.mrb[43].mxu1 }
 0x3d4   : > { %v4919_v45 = vadd.f32 %v6146_v38, %v5743_v35 }
 0x3d6   : > { %v4959_v46 = vadd.f32 %v6168_v39, %v4919_v45 }
 0x3f0   : > { %v6188_v47 = vpop.f32.mrb[44].mxu0  ;;  %v6210_v48 = vpop.f32.mrb[44].mxu1 }
 0x3f1   : > { %v6189_v49 = vpop.f32.mrb[45].mxu0  ;;  %v6211_v50 = vpop.f32.mrb[45].mxu1 }
 0x3f2   : > { %v6190_v51 = vadd.f32 %v6189_v49, %v6188_v47  ;;  %v6212_v52 = vadd.f32 %v6211_v50, %v6210_v48  ;;  %v6191_v53 = vpop.f32.mrb[46].mxu0  ;;  %v6213_v55 = vpop.f32.mrb[46].mxu1 }
 0x3f3   : > { %v6192_v56 = vpop.f32.mrb[47].mxu0  ;;  %v6214_v57 = vpop.f32.mrb[47].mxu1 }
 0x3f4   : > { %v4999_v58 = vadd.f32 %v6190_v51, %v4959_v46 }
 0x3f6   : > { %v5039_v43 = vadd.f32 %v6212_v52, %v4999_v58 }
 0x410   : > { %v6232_v59 = vpop.f32.mrb[48].mxu0  ;;  %v6254_v60 = vpop.f32.mrb[48].mxu1 }
 0x411   : > { %v6233_v61 = vpop.f32.mrb[49].mxu0  ;;  %v6255_v62 = vpop.f32.mrb[49].mxu1 }
 0x412   : > { %v6234_v63 = vadd.f32 %v6233_v61, %v6232_v59  ;;  %v6256_v2 = vadd.f32 %v6255_v62, %v6254_v60  ;;  %v6235_v3 = vpop.f32.mrb[50].mxu0  ;;  %v6257_v6 = vpop.f32.mrb[50].mxu1 }
 0x413   : > { %v6236_v8 = vpop.f32.mrb[51].mxu0  ;;  %v6258_v9 = vpop.f32.mrb[51].mxu1 }
 0x414   : > { %v5079_v10 = vadd.f32 %v6234_v63, %v5039_v43 }
 0x416   : > { %v5119_v11 = vadd.f32 %v6256_v2, %v5079_v10 }
 0x430   : > { %v6276_v12 = vpop.f32.mrb[52].mxu0  ;;  %v6298_v13 = vpop.f32.mrb[52].mxu1 }
 0x431   : > { %v6277_v20 = vpop.f32.mrb[53].mxu0  ;;  %v6299_v21 = vpop.f32.mrb[53].mxu1 }
 0x432   : > { %v6278_v22 = vadd.f32 %v6277_v20, %v6276_v12  ;;  %v6300_v23 = vadd.f32 %v6299_v21, %v6298_v13  ;;  %v6279_v24 = vpop.f32.mrb[54].mxu0  ;;  %v6301_v0 = vpop.f32.mrb[54].mxu1 }
 0x433   : > { %v6280_v25 = vpop.f32.mrb[55].mxu0  ;;  %v6302_v26 = vpop.f32.mrb[55].mxu1 }
 0x434   : > { %v5159_v15 = vadd.f32 %v6278_v22, %v5119_v11 }
 0x436   : > { %v5199_v27 = vadd.f32 %v6300_v23, %v5159_v15 }
 0x450   : > { %v6320_v16 = vpop.f32.mrb[56].mxu0  ;;  %v6342_v1 = vpop.f32.mrb[56].mxu1 }
 0x451   : > { %v6321_v28 = vpop.f32.mrb[57].mxu0  ;;  %v6343_v18 = vpop.f32.mrb[57].mxu1 }
 0x452   : > { %v6322_v19 = vadd.f32 %v6321_v28, %v6320_v16  ;;  %v6344_v29 = vadd.f32 %v6343_v18, %v6342_v1  ;;  %v6323_v54 = vpop.f32.mrb[58].mxu0  ;;  %v6345_v30 = vpop.f32.mrb[58].mxu1 }
 0x453   : > { %v6324_v31 = vpop.f32.mrb[59].mxu0  ;;  %v6346_v4 = vpop.f32.mrb[59].mxu1 }
 0x454   : > { %v5239_v14 = vadd.f32 %v6322_v19, %v5199_v27 }
 0x456   : > { %v5279_v5 = vadd.f32 %v6344_v29, %v5239_v14 }
 0x458   : > { %v5284_v7 = vpack.c.bf16 %v5279_v5, %v5279_v5 }
 0x45a   : > { %5285 = vst [vmem:[%s350_s13] sm:$0xf] %v5284_v7 }
 0x45b   : > { %7158 = shalt.err (!%p7155_p0)
}
 0x45c   : > { %s7159_s22 = scalar_lea.hbm %s7625_s1, 64  ;;  %s7163_s21 = scalar_lea.hbm %s7676_s7, 128 }
 0x45d   : > { %p7160_p2 = scmp.ne.s32.totalorder %s7625_s1, %s7159_s22  ;;  %p7164_p10 = scmp.lt.u32.totalorder %s7625_s1, %s7676_s7 }
 0x45e   : > { %p7165_p11 = scmp.lt.u32.totalorder %s7163_s21, %s7159_s22  ;;  %p7167_p5 = scmp.lt.u32.totalorder %s7159_s22, %s7625_s1 }
 0x45f   : > { %p7161_p8 = pnand %p7160_p2, %p7697_p6 }
 0x460   : > { %p7166_p1 = por %p7165_p11, %p7164_p10 }
 0x461   : > { %p7162_p4 = pneg %p7161_p8 }
 0x462   : > { %p7168_p7 = por %p7167_p5, %p7166_p1 }
 0x464   : > { %p7169_p9 = pnand %p7168_p7, %p7162_p4 }
 0x466   : > { %7172 = shalt.err (!%p7169_p9)
}
 0x467   : > { %6369 = dma.vmem_to_hbm [thread:$0]  (%p7697_p6), %s7627_s28, 64, %s7625_s1, %s5287_s9  }
 0x468 PF: > { %s5312_s13 = sand.u32 1, %s7207_s24   ;;  %p7698_p12 = scmp.ne.s32.totalorder %s7690_s16, 0 }
 0x469   : > { %p7699_p3 = scmp.ge.s32.totalorder %s7219_s27, 2  ;;  %s5313_s17 = scalar_lea.sflag [#allocation4], %s5312_s13 }
 0x46b   : > { %p6389_p13 = pnand %p7699_p3, %p7698_p12 }
 0x46d   : > { %7202 = dma.done.wait (!%p6389_p13), %s5313_s17, 64  }
 0x46e   : > { %7204 = vsyncadd (!%p6389_p13), %s5313_s17, 4294967232  ;;  %p22_p0 = scmp.ge.s32.totalorder %s7418_s19, 4   ;;  %s7700_s24 = smov %s7211_s25 }
 0x46f   : > { %s7701_s25 = smov %s7215_s26  ;;  %s7702_s26 = smov %s7429_s12 }
 0x470   : > { %s7703_s27 = smov %s7418_s19  ;;  %24 = sbr.rel (!%p22_p0) target bundleno = 9 (0x9), region = 109 }
 0x477   :  { %5318 = vsyncpa [#allocation3], 1 }
 0x478   :  { %5320 = vsyncpa [#allocation3 + $0x1], 1 }
 0x479   :  { %5321 = vsyncpa [#allocation6], 1 }
 0x47a   :  { %5322 = vsyncpa [#allocation9], 1 }
 0x47b   :  { %5323 = vsyncpa [#allocation4], 1 }
 0x47c   :  { %5325 = vsyncpa [#allocation4 + $0x1], 1 }

</bundles_post_ra>
